<compile_context>
chip_gen: v7x
topology: tpu7x:2x2x1
jax: 0.10.0
libtpu: 0.0.40
codegen_flags: <defaults>
</compile_context>

<pallas_src>
import functools

import jax
import jax.numpy as jnp
from jax.experimental import pallas as pl
from jax.experimental.pallas import tpu as pltpu


KSIZE = 3
STRIDE = 2
PAD = 1
OUT_PAD = 1
NTAPS = KSIZE * KSIZE


def _pad8(c):
    return ((c + 7) // 8) * 8


# ----------------------------- fused Pallas kernel ---------------------------

def _caeconv_kernel(*refs, layer_dims, num_enc, noise_factor):
    """Single invocation: encoder -> Rayleigh channel -> decoder, all in VMEM.

    Activations use a lane-dense [C, B*H*W] layout.  Per layer:
        G   = act @ S_l                       # 1 gather matmul (0/1, exact)
        Gs  = vstack_t G[:, t-th lane block]  # [9*Cin8, B*P_out]  relayout
        out = W_l @ Gs + b_l                  # 1 channel-mix matmul, f32 acc

    refs: [x, S_0..S_{L-1}, W_all, b_all, hn, out]
      x     : bf16 [Cin8_0, B*P_0]
      S_l   : bf16 [B*P_in_l, 9*B*P_out_l]   block-diag-over-batch tap selectors
      W_all : bf16 [L, 32, 9*32]             packed channel-mix weights
      b_all : f32  [L, 32, 1]                packed biases
      hn    : f32  [2, Cfeat8, B*Pfeat]      Rayleigh fading h and noise n
      out   : f32  [Cout8_last, B*P_last]    lane-dense output
    """
    n_layers = len(layer_dims)
    x_ref = refs[0]
    s_refs = refs[1:1 + n_layers]
    w_ref = refs[1 + n_layers]
    b_ref = refs[2 + n_layers]
    hn_ref = refs[3 + n_layers]
    o_ref = refs[4 + n_layers]

    act = x_ref[...]                                    # bf16 [Cin8, B*P_in]
    for l, (cin8, cout8, bp_out) in enumerate(layer_dims):
        # --- spatial gather: one matmul covering all 9 taps ------------------
        g = jnp.dot(act, s_refs[l][...],
                    preferred_element_type=jnp.float32)  # [cin8, 9*bp_out]
        # Re-stack per-tap lane blocks onto sublanes -> [9*cin8, bp_out].
        gs = jnp.concatenate(
            [g[:, t * bp_out:(t + 1) * bp_out] for t in range(NTAPS)], axis=0)
        gs = gs.astype(jnp.bfloat16)                     # exact (0/1 gather)

        # --- channel mix: one MXU matmul, f32 accumulation --------------------
        w = w_ref[l, :cout8, :NTAPS * cin8]              # bf16 [cout8, 9*cin8]
        acc = jnp.dot(w, gs, preferred_element_type=jnp.float32)
        acc = acc + b_ref[l, :cout8, :]                  # [cout8, 1] bias bcast

        if l == n_layers - 1:
            # Stable sigmoid gate; store is lane-dense ([Cout8, B*P_last]).
            neg = acc < 0.0
            e = jnp.exp(jnp.where(neg, acc, -acc))       # exp(-|x|) on the EUP
            inv = pl.reciprocal(1.0 + e, approx=True)
            o_ref[...] = jnp.where(neg, e * inv, inv)
        else:
            a = jnp.maximum(acc, 0.0)                    # ReLU (f32)
            if l == num_enc - 1:
                # Rayleigh channel fused into the last encoder epilogue.
                a = hn_ref[0] * a + noise_factor * hn_ref[1]
            act = a.astype(jnp.bfloat16)


# -------------------- host-side precomputation of layer tables ---------------

def _conv_selectors(H, W, k, stride, pad):
    """Conv taps: S_t[(ho,wo),(h,w)] = 1 iff (h,w) == (s*ho+kh-p, s*wo+kw-p)."""
    Ho = (H + 2 * pad - k) // stride + 1
    Wo = (W + 2 * pad - k) // stride + 1
    taps = []
    for kh in range(k):
        hi = stride * jnp.arange(Ho) + kh - pad
        mh = (hi[:, None] == jnp.arange(H)[None, :]).astype(jnp.float32)
        for kw in range(k):
            wi = stride * jnp.arange(Wo) + kw - pad
            mw = (wi[:, None] == jnp.arange(W)[None, :]).astype(jnp.float32)
            taps.append(jnp.kron(mh, mw))                # [Ho*Wo, H*W]
    return taps, Ho, Wo


def _convT_selectors(H, W, k, stride, pad, out_pad):
    """ConvT taps: S_t[(ho,wo),(h,w)] = 1 iff ho == s*h+kh-p and wo == s*w+kw-p."""
    Ho = (H - 1) * stride - 2 * pad + k + out_pad
    Wo = (W - 1) * stride - 2 * pad + k + out_pad
    taps = []
    for kh in range(k):
        hi = stride * jnp.arange(H) + kh - pad
        mh = (jnp.arange(Ho)[:, None] == hi[None, :]).astype(jnp.float32)
        for kw in range(k):
            wi = stride * jnp.arange(W) + kw - pad
            mw = (jnp.arange(Wo)[:, None] == wi[None, :]).astype(jnp.float32)
            taps.append(jnp.kron(mh, mw))                # [Ho*Wo, H*W]
    return taps, Ho, Wo


def _stack_selectors(taps, batch):
    """list of [P_out, P_in] -> bf16 [B*P_in, 9*B*P_out], block-diag over batch."""
    eye_b = jnp.eye(batch, dtype=jnp.float32)
    blocks = [jnp.kron(eye_b, t.T) for t in taps]        # each [B*P_in, B*P_out]
    return jnp.concatenate(blocks, axis=1).astype(jnp.bfloat16)


def _conv_weightT(w_oihw):
    """Conv2d weight [Cout, Cin, k, k] -> bf16 [Cout8, 9*Cin8] (tap-major K)."""
    cout, cin, k, _ = w_oihw.shape
    cin8, cout8 = _pad8(cin), _pad8(cout)
    cols = []
    for kh in range(k):
        for kw in range(k):
            wt = w_oihw[:, :, kh, kw]                          # [Cout, Cin]
            cols.append(jnp.pad(wt, ((0, cout8 - cout), (0, cin8 - cin))))
    return jnp.concatenate(cols, axis=1).astype(jnp.bfloat16)


def _convT_weightT(w_iohw):
    """ConvTranspose2d weight [Cin, Cout, k, k] -> bf16 [Cout8, 9*Cin8]."""
    cin, cout, k, _ = w_iohw.shape
    cin8, cout8 = _pad8(cin), _pad8(cout)
    cols = []
    for kh in range(k):
        for kw in range(k):
            wt = jnp.transpose(w_iohw[:, :, kh, kw], (1, 0))   # [Cout, Cin]
            cols.append(jnp.pad(wt, ((0, cout8 - cout), (0, cin8 - cin))))
    return jnp.concatenate(cols, axis=1).astype(jnp.bfloat16)


def build_caeconv_tables(img_size, batch, enc_params, dec_params):
    """Per-layer gather matrices + packed weight/bias arrays + static dims."""
    s_list, w_list, b_list, dims = [], [], [], []
    H = W = img_size
    for (w, b) in enc_params:
        taps, Ho, Wo = _conv_selectors(H, W, KSIZE, STRIDE, PAD)
        s_list.append(_stack_selectors(taps, batch))
        w_list.append(_conv_weightT(w))
        b_list.append(b)
        dims.append((_pad8(w.shape[1]), _pad8(w.shape[0]), batch * Ho * Wo))
        H, W = Ho, Wo
    feat_hw = (H, W)
    for (w, b) in dec_params:
        taps, Ho, Wo = _convT_selectors(H, W, KSIZE, STRIDE, PAD, OUT_PAD)
        s_list.append(_stack_selectors(taps, batch))
        w_list.append(_convT_weightT(w))
        b_list.append(b)
        dims.append((_pad8(w.shape[0]), _pad8(w.shape[1]), batch * Ho * Wo))
        H, W = Ho, Wo

    # Pack channel-mix weights / biases into two padded arrays (fewer, larger
    # DMAs; in-kernel per-layer access is a static slice).
    cmax = max(d[1] for d in dims)                 # max Cout8
    kmax = max(NTAPS * d[0] for d in dims)         # max 9*Cin8
    w_all = jnp.stack(
        [jnp.pad(wl, ((0, cmax - wl.shape[0]), (0, kmax - wl.shape[1])))
         for wl in w_list])                                      # bf16 [L,32,288]
    b_all = jnp.stack(
        [jnp.pad(bl, (0, cmax - bl.shape[0])).reshape(cmax, 1)
         for bl in b_list]).astype(jnp.float32)                  # f32 [L,32,1]
    return s_list, w_all, b_all, tuple(dims), feat_hw, (H, W)


# --------------------------------- forward -----------------------------------

def caeconv_forward(x_nchw, s_list, w_all, b_all, hn, *, layer_dims, num_enc,
                    noise_factor, encoder_channels, img_size, out_channels,
                    out_hw):
    B, C, H, W = x_nchw.shape
    cin8 = _pad8(C)

    # Single layout change at the boundary: NCHW -> lane-dense [Cin8, B*H*W].
    xk = jnp.transpose(x_nchw, (1, 0, 2, 3)).reshape(C, B * H * W)
    xk = jnp.pad(xk, ((0, cin8 - C), (0, 0))).astype(jnp.bfloat16)

    # Same (static) shape check as the PyTorch forward.
    feat = img_size // 2 ** num_enc
    expected_elements = B * encoder_channels[-1] * feat * feat
    bp_feat = layer_dims[num_enc - 1][2]
    if bp_feat * encoder_channels[-1] != expected_elements:
        raise RuntimeError("Shape mismatch in noisy features reshape")

    cout8_last = layer_dims[-1][1]
    bp_last = layer_dims[-1][2]
    n_in = 1 + len(s_list) + 3

    kernel = functools.partial(_caeconv_kernel, layer_dims=layer_dims,
                               num_enc=num_enc, noise_factor=noise_factor)
    out = pl.pallas_call(
        kernel,
        out_shape=jax.ShapeDtypeStruct((cout8_last, bp_last), jnp.float32),
        in_specs=[pl.BlockSpec(memory_space=pltpu.MemorySpace.VMEM)] * n_in,
        out_specs=pl.BlockSpec(memory_space=pltpu.MemorySpace.VMEM),
    )(xk, *s_list, w_all, b_all, hn)

    Ho, Wo = out_hw
    out = out[:out_channels].reshape(out_channels, B, Ho, Wo)
    return jnp.transpose(out, (1, 0, 2, 3))               # [C,B,H,W] -> NCHW


# --------------------------- pure-JAX reference -------------------------------

def _ref_forward(x, enc_params, dec_params, h_nchw, n_nchw, noise_factor):
    dn = ("NCHW", "OIHW", "NCHW")
    out = x
    for (w, b) in enc_params:
        out = jax.lax.conv_general_dilated(
            out, w, (STRIDE, STRIDE), ((PAD, PAD), (PAD, PAD)),
            dimension_numbers=dn)
        out = jnp.maximum(out + b.reshape(1, -1, 1, 1), 0.0)
    out = h_nchw * out + noise_factor * n_nchw
    for i, (w, b) in enumerate(dec_params):
        w2 = jnp.transpose(w, (1, 0, 2, 3))[:, :, ::-1, ::-1]
        lo = KSIZE - 1 - PAD
        hi = KSIZE - 1 - PAD + OUT_PAD
        out = jax.lax.conv_general_dilated(
            out, w2, (1, 1), ((lo, hi), (lo, hi)),
            lhs_dilation=(STRIDE, STRIDE), dimension_numbers=dn)
        out = out + b.reshape(1, -1, 1, 1)
        if i == len(dec_params) - 1:
            out = jax.nn.sigmoid(out)
        else:
            out = jnp.maximum(out, 0.0)
    return out


# ----------------------------------- main -------------------------------------

if __name__ == "__main__":
    key = jax.random.PRNGKey(0)

    in_channels = 3
    img_size = 16
    encoder_channels = (8, 16, 32)
    decoder_channels = (32, 16, 8)
    noise_factor = 0.2
    batch = 2

    keys = jax.random.split(key, 16)
    ki = 0

    # Encoder params: Conv2d(prev -> c, k=3, s=2, p=1), PyTorch OIHW layout.
    enc_params = []
    prev = in_channels
    for c in encoder_channels:
        fan_in = prev * KSIZE * KSIZE
        w = jax.random.normal(keys[ki], (c, prev, KSIZE, KSIZE),
                              jnp.float32) / fan_in ** 0.5
        ki += 1
        b = 0.01 * jnp.arange(c, dtype=jnp.float32)
        enc_params.append((w, b))
        prev = c

    # Decoder params: ConvTranspose2d(prev -> c, k=3, s=2, p=1, out_pad=1), IOHW.
    dec_params = []
    dec_outs = list(decoder_channels[1:]) + [in_channels]
    prev = decoder_channels[0]
    for c in dec_outs:
        fan_in = prev * KSIZE * KSIZE
        w = jax.random.normal(keys[ki], (prev, c, KSIZE, KSIZE),
                              jnp.float32) / fan_in ** 0.5
        ki += 1
        b = 0.01 * jnp.arange(c, dtype=jnp.float32)
        dec_params.append((w, b))
        prev = c

    x = jax.random.normal(keys[ki], (batch, in_channels, img_size, img_size),
                          jnp.float32)
    ki += 1
    noise_key = keys[ki]

    # Precompute per-layer gather / weight tables (host side, once).
    s_list, w_all, b_all, layer_dims, feat_hw, out_hw = build_caeconv_tables(
        img_size, batch, enc_params, dec_params)

    # Rayleigh fading h and additive noise n (deterministic host-side RNG),
    # generated in NCHW and packed into the kernel's lane-dense [C, B*P] layout.
    feat_c = encoder_channels[-1]
    feat_c8 = _pad8(feat_c)
    fh, fw = feat_hw
    k1, k2, k3 = jax.random.split(noise_key, 3)
    g1 = jax.random.normal(k1, (batch, feat_c, fh, fw), jnp.float32)
    g2 = jax.random.normal(k2, (batch, feat_c, fh, fw), jnp.float32)
    h_nchw = jnp.sqrt((g1 * g1 + g2 * g2) / 2.0)
    n_nchw = jax.random.normal(k3, (batch, feat_c, fh, fw), jnp.float32)

    def to_cp(a):  # [B, C, h, w] -> [C8, B*h*w]
        a = jnp.transpose(a, (1, 0, 2, 3)).reshape(feat_c, batch * fh * fw)
        return jnp.pad(a, ((0, feat_c8 - feat_c), (0, 0)))

    hn = jnp.stack([to_cp(h_nchw), to_cp(n_nchw)])       # f32 [2, Cfeat8, B*P]

    fwd = jax.jit(functools.partial(
        caeconv_forward, layer_dims=layer_dims, num_enc=len(encoder_channels),
        noise_factor=noise_factor, encoder_channels=encoder_channels,
        img_size=img_size, out_channels=in_channels, out_hw=out_hw))

    out = fwd(x, s_list, w_all, b_all, hn)
    out = jax.block_until_ready(out)

    assert out.shape == (batch, in_channels, img_size, img_size), out.shape
    assert bool(jnp.all(jnp.isfinite(out)))

    # Correctness sanity check against a pure-JAX reference (same weights, h, n).
    ref = _ref_forward(x, enc_params, dec_params, h_nchw, n_nchw, noise_factor)
    assert bool(jnp.allclose(out, ref, atol=5e-2, rtol=5e-2)), \
        float(jnp.max(jnp.abs(out - ref)))

    print("KERNEL_OK")
</pallas_src>

<mosaic_0001>
module attributes {stable_mosaic.version = 11 : i64} {
  func.func @_caeconv_kernel(%arg0: memref<8x512xbf16, #tpu.memory_space<vmem>>, %arg1: memref<512x1152xbf16, #tpu.memory_space<vmem>>, %arg2: memref<128x288xbf16, #tpu.memory_space<vmem>>, %arg3: memref<32x72xbf16, #tpu.memory_space<vmem>>, %arg4: memref<8x288xbf16, #tpu.memory_space<vmem>>, %arg5: memref<32x1152xbf16, #tpu.memory_space<vmem>>, %arg6: memref<128x4608xbf16, #tpu.memory_space<vmem>>, %arg7: memref<6x32x288xbf16, #tpu.memory_space<vmem>>, %arg8: memref<6x32x1xf32, #tpu.memory_space<vmem>>, %arg9: memref<2x32x8xf32, #tpu.memory_space<vmem>>, %arg10: memref<8x512xf32, #tpu.memory_space<vmem>>) attributes {dimension_semantics = [], scalar_prefetch = 0 : i64, scratch_operands = 0 : i64, tpu.core_type = #tpu.core_type<tc>} {
    %c0 = arith.constant 0 : index
    %c0_0 = arith.constant 0 : index
    %0 = vector.load %arg0[%c0, %c0_0] : memref<8x512xbf16, #tpu.memory_space<vmem>>, vector<8x512xbf16>
    %c0_1 = arith.constant 0 : index
    %c0_2 = arith.constant 0 : index
    %1 = vector.load %arg1[%c0_1, %c0_2] : memref<512x1152xbf16, #tpu.memory_space<vmem>>, vector<512x1152xbf16>
    %cst = arith.constant dense<0.000000e+00> : vector<8x1152xf32>
    %2 = tpu.matmul %0, %1, %cst {dimension_numbers = #tpu.dot_dimension_numbers<[1], [0], [0], [1], [0, 0, 1, 1], [], []>} : vector<8x512xbf16>, vector<512x1152xbf16>, vector<8x1152xf32> -> vector<8x1152xf32>
    %3 = vector.extract_strided_slice %2 {offsets = [0, 0], sizes = [8, 128], strides = [1, 1]} : vector<8x1152xf32> to vector<8x128xf32>
    %4 = vector.extract_strided_slice %2 {offsets = [0, 128], sizes = [8, 128], strides = [1, 1]} : vector<8x1152xf32> to vector<8x128xf32>
    %5 = vector.extract_strided_slice %2 {offsets = [0, 256], sizes = [8, 128], strides = [1, 1]} : vector<8x1152xf32> to vector<8x128xf32>
    %6 = vector.extract_strided_slice %2 {offsets = [0, 384], sizes = [8, 128], strides = [1, 1]} : vector<8x1152xf32> to vector<8x128xf32>
    %7 = vector.extract_strided_slice %2 {offsets = [0, 512], sizes = [8, 128], strides = [1, 1]} : vector<8x1152xf32> to vector<8x128xf32>
    %8 = vector.extract_strided_slice %2 {offsets = [0, 640], sizes = [8, 128], strides = [1, 1]} : vector<8x1152xf32> to vector<8x128xf32>
    %9 = vector.extract_strided_slice %2 {offsets = [0, 768], sizes = [8, 128], strides = [1, 1]} : vector<8x1152xf32> to vector<8x128xf32>
    %10 = vector.extract_strided_slice %2 {offsets = [0, 896], sizes = [8, 128], strides = [1, 1]} : vector<8x1152xf32> to vector<8x128xf32>
    %11 = vector.extract_strided_slice %2 {offsets = [0, 1024], sizes = [8, 128], strides = [1, 1]} : vector<8x1152xf32> to vector<8x128xf32>
    %12 = tpu.concatenate %3, %4, %5, %6, %7, %8, %9, %10, %11 in 0 : vector<8x128xf32>, vector<8x128xf32>, vector<8x128xf32>, vector<8x128xf32>, vector<8x128xf32>, vector<8x128xf32>, vector<8x128xf32>, vector<8x128xf32>, vector<8x128xf32> -> vector<72x128xf32>
    %13 = arith.truncf %12 : vector<72x128xf32> to vector<72x128xbf16>
    %c0_3 = arith.constant 0 : index
    %c0_4 = arith.constant 0 : index
    %c0_5 = arith.constant 0 : index
    %14 = vector.load %arg7[%c0_3, %c0_4, %c0_5] : memref<6x32x288xbf16, #tpu.memory_space<vmem>>, vector<1x8x72xbf16>
    %15 = vector.shape_cast %14 : vector<1x8x72xbf16> to vector<8x72xbf16>
    %cst_6 = arith.constant dense<0.000000e+00> : vector<8x128xf32>
    %16 = tpu.matmul %15, %13, %cst_6 {dimension_numbers = #tpu.dot_dimension_numbers<[1], [0], [0], [1], [0, 0, 1, 1], [], []>} : vector<8x72xbf16>, vector<72x128xbf16>, vector<8x128xf32> -> vector<8x128xf32>
    %c0_7 = arith.constant 0 : index
    %c0_8 = arith.constant 0 : index
    %c0_9 = arith.constant 0 : index
    %17 = vector.load %arg8[%c0_7, %c0_8, %c0_9] : memref<6x32x1xf32, #tpu.memory_space<vmem>>, vector<1x8x1xf32>
    %18 = vector.shape_cast %17 : vector<1x8x1xf32> to vector<8x1xf32>
    %19 = vector.broadcast %18 : vector<8x1xf32> to vector<8x128xf32>
    %20 = arith.addf %16, %19 : vector<8x128xf32>
    %cst_10 = arith.constant 0.000000e+00 : f32
    %21 = vector.broadcast %cst_10 : f32 to vector<8x128xf32>
    %22 = arith.maximumf %20, %21 : vector<8x128xf32>
    %23 = arith.truncf %22 : vector<8x128xf32> to vector<8x128xbf16>
    %c0_11 = arith.constant 0 : index
    %c0_12 = arith.constant 0 : index
    %24 = vector.load %arg2[%c0_11, %c0_12] : memref<128x288xbf16, #tpu.memory_space<vmem>>, vector<128x288xbf16>
    %cst_13 = arith.constant dense<0.000000e+00> : vector<8x288xf32>
    %25 = tpu.matmul %23, %24, %cst_13 {dimension_numbers = #tpu.dot_dimension_numbers<[1], [0], [0], [1], [0, 0, 1, 1], [], []>} : vector<8x128xbf16>, vector<128x288xbf16>, vector<8x288xf32> -> vector<8x288xf32>
    %26 = vector.extract_strided_slice %25 {offsets = [0, 0], sizes = [8, 32], strides = [1, 1]} : vector<8x288xf32> to vector<8x32xf32>
    %27 = vector.extract_strided_slice %25 {offsets = [0, 32], sizes = [8, 32], strides = [1, 1]} : vector<8x288xf32> to vector<8x32xf32>
    %28 = vector.extract_strided_slice %25 {offsets = [0, 64], sizes = [8, 32], strides = [1, 1]} : vector<8x288xf32> to vector<8x32xf32>
    %29 = vector.extract_strided_slice %25 {offsets = [0, 96], sizes = [8, 32], strides = [1, 1]} : vector<8x288xf32> to vector<8x32xf32>
    %30 = vector.extract_strided_slice %25 {offsets = [0, 128], sizes = [8, 32], strides = [1, 1]} : vector<8x288xf32> to vector<8x32xf32>
    %31 = vector.extract_strided_slice %25 {offsets = [0, 160], sizes = [8, 32], strides = [1, 1]} : vector<8x288xf32> to vector<8x32xf32>
    %32 = vector.extract_strided_slice %25 {offsets = [0, 192], sizes = [8, 32], strides = [1, 1]} : vector<8x288xf32> to vector<8x32xf32>
    %33 = vector.extract_strided_slice %25 {offsets = [0, 224], sizes = [8, 32], strides = [1, 1]} : vector<8x288xf32> to vector<8x32xf32>
    %34 = vector.extract_strided_slice %25 {offsets = [0, 256], sizes = [8, 32], strides = [1, 1]} : vector<8x288xf32> to vector<8x32xf32>
    %35 = tpu.concatenate %26, %27, %28, %29, %30, %31, %32, %33, %34 in 0 : vector<8x32xf32>, vector<8x32xf32>, vector<8x32xf32>, vector<8x32xf32>, vector<8x32xf32>, vector<8x32xf32>, vector<8x32xf32>, vector<8x32xf32>, vector<8x32xf32> -> vector<72x32xf32>
    %36 = arith.truncf %35 : vector<72x32xf32> to vector<72x32xbf16>
    %c1 = arith.constant 1 : index
    %c0_14 = arith.constant 0 : index
    %c0_15 = arith.constant 0 : index
    %37 = vector.load %arg7[%c1, %c0_14, %c0_15] : memref<6x32x288xbf16, #tpu.memory_space<vmem>>, vector<1x16x72xbf16>
    %38 = vector.shape_cast %37 : vector<1x16x72xbf16> to vector<16x72xbf16>
    %cst_16 = arith.constant dense<0.000000e+00> : vector<16x32xf32>
    %39 = tpu.matmul %38, %36, %cst_16 {dimension_numbers = #tpu.dot_dimension_numbers<[1], [0], [0], [1], [0, 0, 1, 1], [], []>} : vector<16x72xbf16>, vector<72x32xbf16>, vector<16x32xf32> -> vector<16x32xf32>
    %c1_17 = arith.constant 1 : index
    %c0_18 = arith.constant 0 : index
    %c0_19 = arith.constant 0 : index
    %40 = vector.load %arg8[%c1_17, %c0_18, %c0_19] : memref<6x32x1xf32, #tpu.memory_space<vmem>>, vector<1x16x1xf32>
    %41 = vector.shape_cast %40 : vector<1x16x1xf32> to vector<16x1xf32>
    %42 = vector.broadcast %41 : vector<16x1xf32> to vector<16x32xf32>
    %43 = arith.addf %39, %42 : vector<16x32xf32>
    %cst_20 = arith.constant 0.000000e+00 : f32
    %44 = vector.broadcast %cst_20 : f32 to vector<16x32xf32>
    %45 = arith.maximumf %43, %44 : vector<16x32xf32>
    %46 = arith.truncf %45 : vector<16x32xf32> to vector<16x32xbf16>
    %c0_21 = arith.constant 0 : index
    %c0_22 = arith.constant 0 : index
    %47 = vector.load %arg3[%c0_21, %c0_22] : memref<32x72xbf16, #tpu.memory_space<vmem>>, vector<32x72xbf16>
    %cst_23 = arith.constant dense<0.000000e+00> : vector<16x72xf32>
    %48 = tpu.matmul %46, %47, %cst_23 {dimension_numbers = #tpu.dot_dimension_numbers<[1], [0], [0], [1], [0, 0, 1, 1], [], []>} : vector<16x32xbf16>, vector<32x72xbf16>, vector<16x72xf32> -> vector<16x72xf32>
    %49 = vector.extract_strided_slice %48 {offsets = [0, 0], sizes = [16, 8], strides = [1, 1]} : vector<16x72xf32> to vector<16x8xf32>
    %50 = vector.extract_strided_slice %48 {offsets = [0, 8], sizes = [16, 8], strides = [1, 1]} : vector<16x72xf32> to vector<16x8xf32>
    %51 = vector.extract_strided_slice %48 {offsets = [0, 16], sizes = [16, 8], strides = [1, 1]} : vector<16x72xf32> to vector<16x8xf32>
    %52 = vector.extract_strided_slice %48 {offsets = [0, 24], sizes = [16, 8], strides = [1, 1]} : vector<16x72xf32> to vector<16x8xf32>
    %53 = vector.extract_strided_slice %48 {offsets = [0, 32], sizes = [16, 8], strides = [1, 1]} : vector<16x72xf32> to vector<16x8xf32>
    %54 = vector.extract_strided_slice %48 {offsets = [0, 40], sizes = [16, 8], strides = [1, 1]} : vector<16x72xf32> to vector<16x8xf32>
    %55 = vector.extract_strided_slice %48 {offsets = [0, 48], sizes = [16, 8], strides = [1, 1]} : vector<16x72xf32> to vector<16x8xf32>
    %56 = vector.extract_strided_slice %48 {offsets = [0, 56], sizes = [16, 8], strides = [1, 1]} : vector<16x72xf32> to vector<16x8xf32>
    %57 = vector.extract_strided_slice %48 {offsets = [0, 64], sizes = [16, 8], strides = [1, 1]} : vector<16x72xf32> to vector<16x8xf32>
    %58 = tpu.concatenate %49, %50, %51, %52, %53, %54, %55, %56, %57 in 0 : vector<16x8xf32>, vector<16x8xf32>, vector<16x8xf32>, vector<16x8xf32>, vector<16x8xf32>, vector<16x8xf32>, vector<16x8xf32>, vector<16x8xf32>, vector<16x8xf32> -> vector<144x8xf32>
    %59 = arith.truncf %58 : vector<144x8xf32> to vector<144x8xbf16>
    %c2 = arith.constant 2 : index
    %c0_24 = arith.constant 0 : index
    %c0_25 = arith.constant 0 : index
    %60 = vector.load %arg7[%c2, %c0_24, %c0_25] : memref<6x32x288xbf16, #tpu.memory_space<vmem>>, vector<1x32x144xbf16>
    %61 = vector.shape_cast %60 : vector<1x32x144xbf16> to vector<32x144xbf16>
    %cst_26 = arith.constant dense<0.000000e+00> : vector<32x8xf32>
    %62 = tpu.matmul %61, %59, %cst_26 {dimension_numbers = #tpu.dot_dimension_numbers<[1], [0], [0], [1], [0, 0, 1, 1], [], []>} : vector<32x144xbf16>, vector<144x8xbf16>, vector<32x8xf32> -> vector<32x8xf32>
    %c2_27 = arith.constant 2 : index
    %c0_28 = arith.constant 0 : index
    %c0_29 = arith.constant 0 : index
    %63 = vector.load %arg8[%c2_27, %c0_28, %c0_29] : memref<6x32x1xf32, #tpu.memory_space<vmem>>, vector<1x32x1xf32>
    %64 = vector.shape_cast %63 : vector<1x32x1xf32> to vector<32x1xf32>
    %65 = vector.broadcast %64 : vector<32x1xf32> to vector<32x8xf32>
    %66 = arith.addf %62, %65 : vector<32x8xf32>
    %cst_30 = arith.constant 0.000000e+00 : f32
    %67 = vector.broadcast %cst_30 : f32 to vector<32x8xf32>
    %68 = arith.maximumf %66, %67 : vector<32x8xf32>
    %c0_31 = arith.constant 0 : index
    %c0_32 = arith.constant 0 : index
    %c0_33 = arith.constant 0 : index
    %69 = vector.load %arg9[%c0_31, %c0_32, %c0_33] : memref<2x32x8xf32, #tpu.memory_space<vmem>>, vector<1x32x8xf32>
    %70 = vector.shape_cast %69 : vector<1x32x8xf32> to vector<32x8xf32>
    %71 = arith.mulf %70, %68 : vector<32x8xf32>
    %c1_34 = arith.constant 1 : index
    %c0_35 = arith.constant 0 : index
    %c0_36 = arith.constant 0 : index
    %72 = vector.load %arg9[%c1_34, %c0_35, %c0_36] : memref<2x32x8xf32, #tpu.memory_space<vmem>>, vector<1x32x8xf32>
    %73 = vector.shape_cast %72 : vector<1x32x8xf32> to vector<32x8xf32>
    %cst_37 = arith.constant 2.000000e-01 : f32
    %74 = vector.broadcast %cst_37 : f32 to vector<32x8xf32>
    %75 = arith.mulf %74, %73 : vector<32x8xf32>
    %76 = arith.addf %71, %75 : vector<32x8xf32>
    %77 = arith.truncf %76 : vector<32x8xf32> to vector<32x8xbf16>
    %c0_38 = arith.constant 0 : index
    %c0_39 = arith.constant 0 : index
    %78 = vector.load %arg4[%c0_38, %c0_39] : memref<8x288xbf16, #tpu.memory_space<vmem>>, vector<8x288xbf16>
    %cst_40 = arith.constant dense<0.000000e+00> : vector<32x288xf32>
    %79 = tpu.matmul %77, %78, %cst_40 {dimension_numbers = #tpu.dot_dimension_numbers<[1], [0], [0], [1], [0, 0, 1, 1], [], []>} : vector<32x8xbf16>, vector<8x288xbf16>, vector<32x288xf32> -> vector<32x288xf32>
    %80 = vector.extract_strided_slice %79 {offsets = [0, 0], sizes = [32, 32], strides = [1, 1]} : vector<32x288xf32> to vector<32x32xf32>
    %81 = vector.extract_strided_slice %79 {offsets = [0, 32], sizes = [32, 32], strides = [1, 1]} : vector<32x288xf32> to vector<32x32xf32>
    %82 = vector.extract_strided_slice %79 {offsets = [0, 64], sizes = [32, 32], strides = [1, 1]} : vector<32x288xf32> to vector<32x32xf32>
    %83 = vector.extract_strided_slice %79 {offsets = [0, 96], sizes = [32, 32], strides = [1, 1]} : vector<32x288xf32> to vector<32x32xf32>
    %84 = vector.extract_strided_slice %79 {offsets = [0, 128], sizes = [32, 32], strides = [1, 1]} : vector<32x288xf32> to vector<32x32xf32>
    %85 = vector.extract_strided_slice %79 {offsets = [0, 160], sizes = [32, 32], strides = [1, 1]} : vector<32x288xf32> to vector<32x32xf32>
    %86 = vector.extract_strided_slice %79 {offsets = [0, 192], sizes = [32, 32], strides = [1, 1]} : vector<32x288xf32> to vector<32x32xf32>
    %87 = vector.extract_strided_slice %79 {offsets = [0, 224], sizes = [32, 32], strides = [1, 1]} : vector<32x288xf32> to vector<32x32xf32>
    %88 = vector.extract_strided_slice %79 {offsets = [0, 256], sizes = [32, 32], strides = [1, 1]} : vector<32x288xf32> to vector<32x32xf32>
    %89 = tpu.concatenate %80, %81, %82, %83, %84, %85, %86, %87, %88 in 0 : vector<32x32xf32>, vector<32x32xf32>, vector<32x32xf32>, vector<32x32xf32>, vector<32x32xf32>, vector<32x32xf32>, vector<32x32xf32>, vector<32x32xf32>, vector<32x32xf32> -> vector<288x32xf32>
    %90 = arith.truncf %89 : vector<288x32xf32> to vector<288x32xbf16>
    %c3 = arith.constant 3 : index
    %c0_41 = arith.constant 0 : index
    %c0_42 = arith.constant 0 : index
    %91 = vector.load %arg7[%c3, %c0_41, %c0_42] : memref<6x32x288xbf16, #tpu.memory_space<vmem>>, vector<1x16x288xbf16>
    %92 = vector.shape_cast %91 : vector<1x16x288xbf16> to vector<16x288xbf16>
    %cst_43 = arith.constant dense<0.000000e+00> : vector<16x32xf32>
    %93 = tpu.matmul %92, %90, %cst_43 {dimension_numbers = #tpu.dot_dimension_numbers<[1], [0], [0], [1], [0, 0, 1, 1], [], []>} : vector<16x288xbf16>, vector<288x32xbf16>, vector<16x32xf32> -> vector<16x32xf32>
    %c3_44 = arith.constant 3 : index
    %c0_45 = arith.constant 0 : index
    %c0_46 = arith.constant 0 : index
    %94 = vector.load %arg8[%c3_44, %c0_45, %c0_46] : memref<6x32x1xf32, #tpu.memory_space<vmem>>, vector<1x16x1xf32>
    %95 = vector.shape_cast %94 : vector<1x16x1xf32> to vector<16x1xf32>
    %96 = vector.broadcast %95 : vector<16x1xf32> to vector<16x32xf32>
    %97 = arith.addf %93, %96 : vector<16x32xf32>
    %cst_47 = arith.constant 0.000000e+00 : f32
    %98 = vector.broadcast %cst_47 : f32 to vector<16x32xf32>
    %99 = arith.maximumf %97, %98 : vector<16x32xf32>
    %100 = arith.truncf %99 : vector<16x32xf32> to vector<16x32xbf16>
    %c0_48 = arith.constant 0 : index
    %c0_49 = arith.constant 0 : index
    %101 = vector.load %arg5[%c0_48, %c0_49] : memref<32x1152xbf16, #tpu.memory_space<vmem>>, vector<32x1152xbf16>
    %cst_50 = arith.constant dense<0.000000e+00> : vector<16x1152xf32>
    %102 = tpu.matmul %100, %101, %cst_50 {dimension_numbers = #tpu.dot_dimension_numbers<[1], [0], [0], [1], [0, 0, 1, 1], [], []>} : vector<16x32xbf16>, vector<32x1152xbf16>, vector<16x1152xf32> -> vector<16x1152xf32>
    %103 = vector.extract_strided_slice %102 {offsets = [0, 0], sizes = [16, 128], strides = [1, 1]} : vector<16x1152xf32> to vector<16x128xf32>
    %104 = vector.extract_strided_slice %102 {offsets = [0, 128], sizes = [16, 128], strides = [1, 1]} : vector<16x1152xf32> to vector<16x128xf32>
    %105 = vector.extract_strided_slice %102 {offsets = [0, 256], sizes = [16, 128], strides = [1, 1]} : vector<16x1152xf32> to vector<16x128xf32>
    %106 = vector.extract_strided_slice %102 {offsets = [0, 384], sizes = [16, 128], strides = [1, 1]} : vector<16x1152xf32> to vector<16x128xf32>
    %107 = vector.extract_strided_slice %102 {offsets = [0, 512], sizes = [16, 128], strides = [1, 1]} : vector<16x1152xf32> to vector<16x128xf32>
    %108 = vector.extract_strided_slice %102 {offsets = [0, 640], sizes = [16, 128], strides = [1, 1]} : vector<16x1152xf32> to vector<16x128xf32>
    %109 = vector.extract_strided_slice %102 {offsets = [0, 768], sizes = [16, 128], strides = [1, 1]} : vector<16x1152xf32> to vector<16x128xf32>
    %110 = vector.extract_strided_slice %102 {offsets = [0, 896], sizes = [16, 128], strides = [1, 1]} : vector<16x1152xf32> to vector<16x128xf32>
    %111 = vector.extract_strided_slice %102 {offsets = [0, 1024], sizes = [16, 128], strides = [1, 1]} : vector<16x1152xf32> to vector<16x128xf32>
    %112 = tpu.concatenate %103, %104, %105, %106, %107, %108, %109, %110, %111 in 0 : vector<16x128xf32>, vector<16x128xf32>, vector<16x128xf32>, vector<16x128xf32>, vector<16x128xf32>, vector<16x128xf32>, vector<16x128xf32>, vector<16x128xf32>, vector<16x128xf32> -> vector<144x128xf32>
    %113 = arith.truncf %112 : vector<144x128xf32> to vector<144x128xbf16>
    %c4 = arith.constant 4 : index
    %c0_51 = arith.constant 0 : index
    %c0_52 = arith.constant 0 : index
    %114 = vector.load %arg7[%c4, %c0_51, %c0_52] : memref<6x32x288xbf16, #tpu.memory_space<vmem>>, vector<1x8x144xbf16>
    %115 = vector.shape_cast %114 : vector<1x8x144xbf16> to vector<8x144xbf16>
    %cst_53 = arith.constant dense<0.000000e+00> : vector<8x128xf32>
    %116 = tpu.matmul %115, %113, %cst_53 {dimension_numbers = #tpu.dot_dimension_numbers<[1], [0], [0], [1], [0, 0, 1, 1], [], []>} : vector<8x144xbf16>, vector<144x128xbf16>, vector<8x128xf32> -> vector<8x128xf32>
    %c4_54 = arith.constant 4 : index
    %c0_55 = arith.constant 0 : index
    %c0_56 = arith.constant 0 : index
    %117 = vector.load %arg8[%c4_54, %c0_55, %c0_56] : memref<6x32x1xf32, #tpu.memory_space<vmem>>, vector<1x8x1xf32>
    %118 = vector.shape_cast %117 : vector<1x8x1xf32> to vector<8x1xf32>
    %119 = vector.broadcast %118 : vector<8x1xf32> to vector<8x128xf32>
    %120 = arith.addf %116, %119 : vector<8x128xf32>
    %cst_57 = arith.constant 0.000000e+00 : f32
    %121 = vector.broadcast %cst_57 : f32 to vector<8x128xf32>
    %122 = arith.maximumf %120, %121 : vector<8x128xf32>
    %123 = arith.truncf %122 : vector<8x128xf32> to vector<8x128xbf16>
    %c0_58 = arith.constant 0 : index
    %c0_59 = arith.constant 0 : index
    %124 = vector.load %arg6[%c0_58, %c0_59] : memref<128x4608xbf16, #tpu.memory_space<vmem>>, vector<128x4608xbf16>
    %cst_60 = arith.constant dense<0.000000e+00> : vector<8x4608xf32>
    %125 = tpu.matmul %123, %124, %cst_60 {dimension_numbers = #tpu.dot_dimension_numbers<[1], [0], [0], [1], [0, 0, 1, 1], [], []>} : vector<8x128xbf16>, vector<128x4608xbf16>, vector<8x4608xf32> -> vector<8x4608xf32>
    %126 = vector.extract_strided_slice %125 {offsets = [0, 0], sizes = [8, 512], strides = [1, 1]} : vector<8x4608xf32> to vector<8x512xf32>
    %127 = vector.extract_strided_slice %125 {offsets = [0, 512], sizes = [8, 512], strides = [1, 1]} : vector<8x4608xf32> to vector<8x512xf32>
    %128 = vector.extract_strided_slice %125 {offsets = [0, 1024], sizes = [8, 512], strides = [1, 1]} : vector<8x4608xf32> to vector<8x512xf32>
    %129 = vector.extract_strided_slice %125 {offsets = [0, 1536], sizes = [8, 512], strides = [1, 1]} : vector<8x4608xf32> to vector<8x512xf32>
    %130 = vector.extract_strided_slice %125 {offsets = [0, 2048], sizes = [8, 512], strides = [1, 1]} : vector<8x4608xf32> to vector<8x512xf32>
    %131 = vector.extract_strided_slice %125 {offsets = [0, 2560], sizes = [8, 512], strides = [1, 1]} : vector<8x4608xf32> to vector<8x512xf32>
    %132 = vector.extract_strided_slice %125 {offsets = [0, 3072], sizes = [8, 512], strides = [1, 1]} : vector<8x4608xf32> to vector<8x512xf32>
    %133 = vector.extract_strided_slice %125 {offsets = [0, 3584], sizes = [8, 512], strides = [1, 1]} : vector<8x4608xf32> to vector<8x512xf32>
    %134 = vector.extract_strided_slice %125 {offsets = [0, 4096], sizes = [8, 512], strides = [1, 1]} : vector<8x4608xf32> to vector<8x512xf32>
    %135 = tpu.concatenate %126, %127, %128, %129, %130, %131, %132, %133, %134 in 0 : vector<8x512xf32>, vector<8x512xf32>, vector<8x512xf32>, vector<8x512xf32>, vector<8x512xf32>, vector<8x512xf32>, vector<8x512xf32>, vector<8x512xf32>, vector<8x512xf32> -> vector<72x512xf32>
    %136 = arith.truncf %135 : vector<72x512xf32> to vector<72x512xbf16>
    %c5 = arith.constant 5 : index
    %c0_61 = arith.constant 0 : index
    %c0_62 = arith.constant 0 : index
    %137 = vector.load %arg7[%c5, %c0_61, %c0_62] : memref<6x32x288xbf16, #tpu.memory_space<vmem>>, vector<1x8x72xbf16>
    %138 = vector.shape_cast %137 : vector<1x8x72xbf16> to vector<8x72xbf16>
    %cst_63 = arith.constant dense<0.000000e+00> : vector<8x512xf32>
    %139 = tpu.matmul %138, %136, %cst_63 {dimension_numbers = #tpu.dot_dimension_numbers<[1], [0], [0], [1], [0, 0, 1, 1], [], []>} : vector<8x72xbf16>, vector<72x512xbf16>, vector<8x512xf32> -> vector<8x512xf32>
    %c5_64 = arith.constant 5 : index
    %c0_65 = arith.constant 0 : index
    %c0_66 = arith.constant 0 : index
    %140 = vector.load %arg8[%c5_64, %c0_65, %c0_66] : memref<6x32x1xf32, #tpu.memory_space<vmem>>, vector<1x8x1xf32>
    %141 = vector.shape_cast %140 : vector<1x8x1xf32> to vector<8x1xf32>
    %142 = vector.broadcast %141 : vector<8x1xf32> to vector<8x512xf32>
    %143 = arith.addf %139, %142 : vector<8x512xf32>
    %cst_67 = arith.constant 0.000000e+00 : f32
    %144 = vector.broadcast %cst_67 : f32 to vector<8x512xf32>
    %145 = arith.cmpf olt, %143, %144 : vector<8x512xf32>
    %cst_68 = arith.constant 0.000000e+00 : f32
    %146 = vector.broadcast %cst_68 : f32 to vector<8x512xf32>
    %147 = arith.subf %146, %143 : vector<8x512xf32>
    %148 = arith.select %145, %143, %147 : vector<8x512xi1>, vector<8x512xf32>
    %149 = math.exp %148 : vector<8x512xf32>
    %cst_69 = arith.constant 1.000000e+00 : f32
    %150 = vector.broadcast %cst_69 : f32 to vector<8x512xf32>
    %151 = arith.addf %150, %149 : vector<8x512xf32>
    %152 = tpu.reciprocal %151 {approx = true} : vector<8x512xf32> -> vector<8x512xf32>
    %153 = arith.mulf %149, %152 : vector<8x512xf32>
    %154 = arith.select %145, %153, %152 : vector<8x512xi1>, vector<8x512xf32>
    %c0_70 = arith.constant 0 : index
    %c0_71 = arith.constant 0 : index
    %155 = vector.load %arg10[%c0_70, %c0_71] : memref<8x512xf32, #tpu.memory_space<vmem>>, vector<8x512xf32>
    tpu.vector_store %arg10[%c0_70, %c0_71], %154 {strides = array<i32>} : memref<8x512xf32, #tpu.memory_space<vmem>>, vector<8x512xf32>,
    return
  }
}

</mosaic_0001>

<bundles_post_ra>
// kernel: caeconv_forward.1
= control target key start
LH: loop header
LB: loop body
LE: loop exit
PB: predicated region body
PF: predicated region fallthrough
CT: control target
= control target key end

     0   :  { %15 = vsyncpa [#allocation3], 0  ;;  %s8964_s0 = inlined_call_operand.vmem [shape: bf16[8,512], index: 0, kind: input, shape index: {}]   ;;  %s8965_s1 = inlined_call_operand.hbm [shape: bf16[512,1152], index: 1, kind: input, shape index: {}]   ;;  %s8966_s2 = inlined_call_operand.vmem [shape: bf16[128,288], index: 2, kind: input, shape index: {}]   ;;  %s8967_s3 = inlined_call_operand.hbm [shape: bf16[32,72], index: 3, kind: input, shape index: {}]   ;;  %s8968_s4 = inlined_call_operand.hbm [shape: bf16[8,288], index: 4, kind: input, shape index: {}]   ;;  %s8969_s5 = inlined_call_operand.hbm [shape: bf16[32,1152], index: 5, kind: input, shape index: {}]   ;;  %s8970_s6 = inlined_call_operand.hbm [shape: bf16[128,4608], index: 6, kind: input, shape index: {}]   ;;  %s8971_s7 = inlined_call_operand.hbm [shape: bf16[6,32,288], index: 7, kind: input, shape index: {}]   ;;  %s8972_s8 = inlined_call_operand.vmem [shape: f32[6,32,1], index: 8, kind: input, shape index: {}]   ;;  %s8973_s9 = inlined_call_operand.vmem [shape: f32[2,32,8], index: 9, kind: input, shape index: {}]   ;;  %s8974_s10 = inlined_call_operand.vmem [shape: f32[8,512], index: 10, kind: output, shape index: {}]  }
   0x1   :  { %16 = vsyncpa [#allocation5], 0 }
   0x2   :  { %17 = vsyncpa [#allocation8], 0 }
   0x3   :  { %18 = vsyncpa [#allocation11], 0  ;;  %s8443_s13 = smov [#allocation4]   ;;  %s8303_s17 = scalar_lea.hbm %s8967_s3, 256 }
   0x4   :  { %s40_s14 = sshll.u32 %s8443_s13, 4  ;;  %p8304_p0 = scmp.ne.s32.totalorder %s8967_s3, %s8303_s17  ;;  %s41_s14 = int_to_ptr.vmem [resolvable:$true] %s40_s14 }
   0x5   :  { %p8307_p1 = scmp.lt.u32.totalorder %s8303_s17, %s8967_s3 }
   0x7   :  { %p8309_p2 = pnand %p8307_p1, %p8304_p0 }
   0x9   :  { %8312 = shalt.err (!%p8309_p2)
}
   0xa   :  { %s8313_s22 = scalar_lea.vmem %s41_s14, 256  ;;  %p8318_p4 = scmp.lt.s32.totalorder %s41_s14, %s41_s14 }
   0xb   :  { %p8314_p3 = scmp.ne.s32.totalorder %s41_s14, %s8313_s22  ;;  %p8319_p5 = scmp.lt.s32.totalorder %s8313_s22, %s8313_s22 }
   0xd   :  { %p8320_p6 = por %p8319_p5, %p8318_p4 }
   0xf   :  { %p8321_p7 = pnand %p8320_p6, %p8314_p3 }
  0x11   :  { %8324 = shalt.err (!%p8321_p7)
}
  0x12   :  { %s8444_s23 = smov 64   ;;  %s8445_s24 = smov 4  }
  0x13   :  { %46 = dma.hbm_to_vmem [thread:$0]  %s8967_s3, 256, %s41_s14, [#allocation5], %s8444_s23, %s8444_s23, %s8445_s24  }
  0x14   :  { %s8446_s27 = smov [#allocation7]   ;;  %s8447_s29 = smov [#allocation2]  }
  0x15   :  { %s62_s28 = sshll.u32 %s8446_s27, 4  ;;  %s26_s30 = sshll.u32 %s8447_s29, 4  ;;  %s63_s28 = int_to_ptr.vmem [resolvable:$true] %s62_s28  ;;  %s27_s30 = int_to_ptr.vmem [resolvable:$true] %s26_s30 }
  0x16   :  { %s8325_s13 = scalar_lea.hbm %s8969_s5, 2304 }
  0x17   :  { %p8326_p8 = scmp.ne.s32.totalorder %s8969_s5, %s8325_s13  ;;  %p8329_p9 = scmp.lt.u32.totalorder %s8325_s13, %s8969_s5 }
  0x19   :  { %p8331_p10 = pnand %p8329_p9, %p8326_p8 }
  0x1b   :  { %8334 = shalt.err (!%p8331_p10)
}
  0x1c   :  { %s8335_s3 = scalar_lea.vmem %s63_s28, 2304  ;;  %p8340_p12 = scmp.lt.s32.totalorder %s63_s28, %s63_s28 }
  0x1d   :  { %p8336_p11 = scmp.ne.s32.totalorder %s63_s28, %s8335_s3  ;;  %p8341_p13 = scmp.lt.s32.totalorder %s8335_s3, %s8335_s3 }
  0x1f   :  { %p8342_p0 = por %p8341_p13, %p8340_p12 }
  0x21   :  { %p8343_p1 = pnand %p8342_p0, %p8336_p11 }
  0x23   :  { %8346 = shalt.err (!%p8343_p1)
}
  0x24   :  { %s8448_s14 = smov 576   ;;  %s8449_s19 = smov 36  }
  0x25   :  { %68 = dma.hbm_to_vmem [thread:$0]  %s8969_s5, 2304, %s63_s28, [#allocation8], %s8448_s14, %s8448_s14, %s8449_s19  }
  0x26   :  { %s8347_s25 = scalar_lea.hbm %s8965_s1, 36864 }
  0x27   :  { %p8348_p2 = scmp.ne.s32.totalorder %s8965_s1, %s8347_s25  ;;  %p8351_p3 = scmp.lt.u32.totalorder %s8347_s25, %s8965_s1 }
  0x29   :  { %p8353_p4 = pnand %p8351_p3, %p8348_p2 }
  0x2b   :  { %8356 = shalt.err (!%p8353_p4)
}
  0x2c   :  { %s8357_s12 = scalar_lea.vmem %s27_s30, 36864  ;;  %p8362_p6 = scmp.lt.s32.totalorder %s27_s30, %s27_s30 }
  0x2d   :  { %p8358_p5 = scmp.ne.s32.totalorder %s27_s30, %s8357_s12  ;;  %p8363_p7 = scmp.lt.s32.totalorder %s8357_s12, %s8357_s12 }
  0x2f   :  { %p8364_p8 = por %p8363_p7, %p8362_p6 }
  0x31   :  { %p8365_p9 = pnand %p8364_p8, %p8358_p5 }
  0x33   :  { %8368 = shalt.err (!%p8365_p9)
}
  0x34   :  { %32 = dma.hbm_to_vmem [thread:$0]  %s8965_s1, 36864, %s27_s30, [#allocation3], %s8448_s14, %s8448_s14, %s8449_s19  }
  0x35   :  { %s8450_s13 = smov [#allocation6]   ;;  %s8451_s16 = smov [#allocation9]  }
  0x36   :  { %s53_s15 = sshll.u32 %s8450_s13, 4  ;;  %s74_s17 = sshll.u32 %s8451_s16, 4  ;;  %s54_s15 = int_to_ptr.vmem [resolvable:$true] %s53_s15  ;;  %s75_s17 = int_to_ptr.vmem [resolvable:$true] %s74_s17 }
  0x37   :  { %s8369_s20 = scalar_lea.hbm %s8968_s4, 192 }
  0x38   :  { %p8370_p10 = scmp.ne.s32.totalorder %s8968_s4, %s8369_s20  ;;  %p8373_p11 = scmp.lt.u32.totalorder %s8369_s20, %s8968_s4 }
  0x3a   :  { %p8375_p12 = pnand %p8373_p11, %p8370_p10 }
  0x3c   :  { %8378 = shalt.err (!%p8375_p12)
}
  0x3d   :  { %s8379_s1 = scalar_lea.vmem %s54_s15, 192  ;;  %p8384_p0 = scmp.lt.s32.totalorder %s54_s15, %s54_s15 }
  0x3e   :  { %p8380_p13 = scmp.ne.s32.totalorder %s54_s15, %s8379_s1  ;;  %p8385_p1 = scmp.lt.s32.totalorder %s8379_s1, %s8379_s1 }
  0x40   :  { %p8386_p2 = por %p8385_p1, %p8384_p0 }
  0x42   :  { %p8387_p3 = pnand %p8386_p2, %p8380_p13 }
  0x44   :  { %8390 = shalt.err (!%p8387_p3)
}
  0x45   :  { %56 = dma.hbm_to_vmem [thread:$0]  %s8968_s4, 192, %s54_s15, [#allocation5]  }
  0x46   :  { %s8391_s27 = scalar_lea.hbm %s8970_s6, 36864 }
  0x47   :  { %p8392_p4 = scmp.ne.s32.totalorder %s8970_s6, %s8391_s27  ;;  %p8395_p5 = scmp.lt.u32.totalorder %s8391_s27, %s8970_s6 }
  0x49   :  { %p8397_p6 = pnand %p8395_p5, %p8392_p4 }
  0x4b   :  { %8400 = shalt.err (!%p8397_p6)
}
  0x4c   :  { %s8401_s28 = scalar_lea.vmem %s75_s17, 36864  ;;  %p8406_p8 = scmp.lt.s32.totalorder %s75_s17, %s75_s17 }
  0x4d   :  { %p8402_p7 = scmp.ne.s32.totalorder %s75_s17, %s8401_s28  ;;  %p8407_p9 = scmp.lt.s32.totalorder %s8401_s28, %s8401_s28 }
  0x4f   :  { %p8408_p10 = por %p8407_p9, %p8406_p8 }
  0x51   :  { %p8409_p11 = pnand %p8408_p10, %p8402_p7 }
  0x53   :  { %8412 = shalt.err (!%p8409_p11)
}
  0x54   :  { %s8452_s4 = smov 2304   ;;  %s8453_s13 = smov 144  }
  0x55   :  { %80 = dma.hbm_to_vmem [thread:$0]  %s8970_s6, 36864, %s75_s17, [#allocation8], %s8452_s4, %s8452_s4, %s8453_s13  }
  0x56   :  { %s8454_s18 = smov [#allocation10]   ;;  %s8413_s22 = scalar_lea.hbm %s8971_s7, 4608 }
  0x57   :  { %s86_s3 = sshll.u32 %s8454_s18, 4  ;;  %p8414_p12 = scmp.ne.s32.totalorder %s8971_s7, %s8413_s22  ;;  %s87_s3 = int_to_ptr.vmem [resolvable:$true] %s86_s3 }
  0x58   :  { %p8417_p13 = scmp.lt.u32.totalorder %s8413_s22, %s8971_s7 }
  0x5a   :  { %p8419_p0 = pnand %p8417_p13, %p8414_p12 }
  0x5c   :  { %8422 = shalt.err (!%p8419_p0)
}
  0x5d   :  { %s8423_s14 = scalar_lea.vmem %s87_s3, 4608  ;;  %p8428_p2 = scmp.lt.s32.totalorder %s87_s3, %s87_s3 }
  0x5e   :  { %p8424_p1 = scmp.ne.s32.totalorder %s87_s3, %s8423_s14  ;;  %p8429_p3 = scmp.lt.s32.totalorder %s8423_s14, %s8423_s14 }
  0x60   :  { %p8430_p4 = por %p8429_p3, %p8428_p2 }
  0x62   :  { %p8431_p5 = pnand %p8430_p4, %p8424_p1 }
  0x64   :  { %8434 = shalt.err (!%p8431_p5)
}
  0x65   :  { %s8455_s6 = smov 192   ;;  %s8456_s17 = smov 12  }
  0x66   :  { %92 = dma.hbm_to_vmem [thread:$0]  %s8971_s7, 4608, %s87_s3, [#allocation11], %s8455_s6, %s8455_s6, %s8456_s17  }
  0x67   :  { %8435 = dma.done.wait [#allocation3], 36864  }
  0x68   :  { %8436 = vsyncadd [#allocation3], 4294930432 }
  0x69   :  { %8437 = dma.done.wait [#allocation5], 448  }
  0x6a   :  { %8438 = vsyncadd [#allocation5], 4294966848 }
  0x6b   :  { %8439 = dma.done.wait [#allocation8], 39168  }
  0x6c   :  { %8440 = vsyncadd [#allocation8], 4294928128 }
  0x6d   :  { %8441 = dma.done.wait [#allocation11], 4608  }
  0x6e   :  { %8442 = vsyncadd [#allocation11], 4294962688  ;;  %v7359_v0 = vld [vmem:[#allocation2 + $0x4] ss:$36 sps:$4 sm:$0xff]   ;;  %v7361_v1 = vld [vmem:[#allocation2 + $0xc] ss:$36 sps:$4 sm:$0xff]  }
  0x6f   :  { %1924 = vmatprep.subr.bf16.mxu0 %v7359_v0  ;;  %v7363_v2 = vld [vmem:[#allocation2] ss:$36 sps:$4 sm:$0xff]   ;;  %v7364_v3 = vld [vmem:[#allocation2 + $0x8] ss:$36 sps:$4 sm:$0xff]   ;;  %2006 = vmatprep.subr.bf16.mxu1 %v7361_v1  ;;  %v7367_v5 = vld [vmem:[#allocation2 + $0x54] ss:$36 sps:$4 sm:$0xff]  }
  0x70   :  { %v7365_v4 = vld [vmem:[#allocation2 + $0x4c] ss:$36 sps:$4 sm:$0xff]   ;;  %1925 = vmatpush1.bf16.msra.mxu0 %v7363_v2  ;;  %2007 = vmatpush1.bf16.msra.mxu1 %v7364_v3  ;;  %v7371_v8 = vld [vmem:[#allocation2 + $0x94] ss:$36 sps:$4 sm:$0xff]   ;;  %v7373_v9 = vld [vmem:[#allocation2 + $0x9c] ss:$36 sps:$4 sm:$0xff]  }
  0x71   :  { %v7369_v6 = vld [vmem:[#allocation2 + $0x48] ss:$36 sps:$4 sm:$0xff]   ;;  %1926 = vmatprep.subr.bf16.mxu0 %v7365_v4  ;;  %v7370_v7 = vld [vmem:[#allocation2 + $0x50] ss:$36 sps:$4 sm:$0xff]   ;;  %2008 = vmatprep.subr.bf16.mxu1 %v7367_v5  ;;  %v7376_v11 = vld [vmem:[#allocation2 + $0x98] ss:$36 sps:$4 sm:$0xff]  }
  0x72   :  { %v7375_v10 = vld [vmem:[#allocation2 + $0x90] ss:$36 sps:$4 sm:$0xff]   ;;  %v7377_v12 = vld [vmem:[#allocation2 + $0xdc] ss:$36 sps:$4 sm:$0xff]   ;;  %v7379_v13 = vld [vmem:[#allocation2 + $0xe4] ss:$36 sps:$4 sm:$0xff]  }
  0x73   :  { %v7381_v14 = vld [vmem:[#allocation2 + $0xd8] ss:$36 sps:$4 sm:$0xff]   ;;  %v7382_v15 = vld [vmem:[#allocation2 + $0xe0] ss:$36 sps:$4 sm:$0xff]   ;;  %v7385_v17 = vld [vmem:[#allocation2 + $0x12c] ss:$36 sps:$4 sm:$0xff]  }
  0x74   :  { %1927 = vmatpush1.bf16.msra.mxu0 %v7369_v6  ;;  %2009 = vmatpush1.bf16.msra.mxu1 %v7370_v7  ;;  %v7383_v16 = vld [vmem:[#allocation2 + $0x124] ss:$36 sps:$4 sm:$0xff]   ;;  %v7389_v20 = vld [vmem:[#allocation2 + $0x16c] ss:$36 sps:$4 sm:$0xff]   ;;  %v7391_v21 = vld [vmem:[#allocation2 + $0x174] ss:$36 sps:$4 sm:$0xff]  }
  0x75   :  { %1928 = vmatprep.subr.bf16.mxu0 %v7371_v8  ;;  %2010 = vmatprep.subr.bf16.mxu1 %v7373_v9  ;;  %v7387_v18 = vld [vmem:[#allocation2 + $0x120] ss:$36 sps:$4 sm:$0xff]   ;;  %v7388_v19 = vld [vmem:[#allocation2 + $0x128] ss:$36 sps:$4 sm:$0xff]   ;;  %v7394_v23 = vld [vmem:[#allocation2 + $0x170] ss:$36 sps:$4 sm:$0xff]  }
  0x76   :  { %v7393_v22 = vld [vmem:[#allocation2 + $0x168] ss:$36 sps:$4 sm:$0xff]   ;;  %v7395_v24 = vld [vmem:[#allocation2 + $0x1b4] ss:$36 sps:$4 sm:$0xff]   ;;  %v7397_v25 = vld [vmem:[#allocation2 + $0x1bc] ss:$36 sps:$4 sm:$0xff]  }
  0x77   :  { %v7399_v26 = vld [vmem:[#allocation2 + $0x1b0] ss:$36 sps:$4 sm:$0xff]   ;;  %v7400_v27 = vld [vmem:[#allocation2 + $0x1b8] ss:$36 sps:$4 sm:$0xff]   ;;  %v7403_v29 = vld [vmem:[#allocation2 + $0x204] ss:$36 sps:$4 sm:$0xff]  }
  0x78   :  { %1929 = vmatpush1.bf16.msra.mxu0 %v7375_v10  ;;  %2011 = vmatpush1.bf16.msra.mxu1 %v7376_v11  ;;  %v7401_v28 = vld [vmem:[#allocation2 + $0x1fc] ss:$36 sps:$4 sm:$0xff]   ;;  %v7407_v32 = vld [vmem:[#allocation2 + $0x244] ss:$36 sps:$4 sm:$0xff]   ;;  %v7409_v33 = vld [vmem:[#allocation2 + $0x24c] ss:$36 sps:$4 sm:$0xff]  }
  0x79   :  { %1930 = vmatprep.subr.bf16.mxu0 %v7377_v12  ;;  %2012 = vmatprep.subr.bf16.mxu1 %v7379_v13  ;;  %v7405_v30 = vld [vmem:[#allocation2 + $0x1f8] ss:$36 sps:$4 sm:$0xff]   ;;  %v7406_v31 = vld [vmem:[#allocation2 + $0x200] ss:$36 sps:$4 sm:$0xff]   ;;  %v7412_v35 = vld [vmem:[#allocation2 + $0x248] ss:$36 sps:$4 sm:$0xff]  }
  0x7a   :  { %v7411_v34 = vld [vmem:[#allocation2 + $0x240] ss:$36 sps:$4 sm:$0xff]   ;;  %v7413_v36 = vld [vmem:[#allocation2 + $0x28c] ss:$36 sps:$4 sm:$0xff]   ;;  %v7415_v37 = vld [vmem:[#allocation2 + $0x294] ss:$36 sps:$4 sm:$0xff]  }
  0x7b   :  { %v7417_v38 = vld [vmem:[#allocation2 + $0x288] ss:$36 sps:$4 sm:$0xff]   ;;  %v7418_v39 = vld [vmem:[#allocation2 + $0x290] ss:$36 sps:$4 sm:$0xff]   ;;  %v7421_v41 = vld [vmem:[#allocation2 + $0x2dc] ss:$36 sps:$4 sm:$0xff]  }
  0x7c   :  { %1931 = vmatpush1.bf16.msra.mxu0 %v7381_v14  ;;  %2013 = vmatpush1.bf16.msra.mxu1 %v7382_v15  ;;  %v7419_v40 = vld [vmem:[#allocation2 + $0x2d4] ss:$36 sps:$4 sm:$0xff]   ;;  %v7425_v44 = vld [vmem:[#allocation2 + $0x31c] ss:$36 sps:$4 sm:$0xff]   ;;  %v7427_v45 = vld [vmem:[#allocation2 + $0x324] ss:$36 sps:$4 sm:$0xff]  }
  0x7d   :  { %1932 = vmatprep.subr.bf16.mxu0 %v7383_v16  ;;  %2014 = vmatprep.subr.bf16.mxu1 %v7385_v17  ;;  %v7423_v42 = vld [vmem:[#allocation2 + $0x2d0] ss:$36 sps:$4 sm:$0xff]   ;;  %v7424_v43 = vld [vmem:[#allocation2 + $0x2d8] ss:$36 sps:$4 sm:$0xff]   ;;  %v116_v46 = vld [vmem:[%s8964_s0] sm:$0xff]  ;;  %vm8458_vm0 = vmmov 0  }
  0x7e   :  { %v7429_v47 = vld [vmem:[#allocation2 + $0x318] ss:$36 sps:$4 sm:$0xff]   ;;  %v8600_v48 = vcombine.high %v116_v46, %v116_v46  ;;  %v7430_v49 = vld [vmem:[#allocation2 + $0x320] ss:$36 sps:$4 sm:$0xff]   ;;  %v7433_v51 = vld [vmem:[#allocation2 + $0x36c] ss:$36 sps:$4 sm:$0xff]   ;;  %v8604_v5 = vcombine.low %v116_v46, %v116_v46 }
  0x7f   :  { %v7431_v50 = vld [vmem:[#allocation2 + $0x364] ss:$36 sps:$4 sm:$0xff]   ;;  %v7437_v54 = vld [vmem:[#allocation2 + $0x3ac] ss:$36 sps:$4 sm:$0xff]   ;;  %v7439_v55 = vld [vmem:[#allocation2 + $0x3b4] ss:$36 sps:$4 sm:$0xff]  }
  0x80   :  { %1933 = vmatpush1.bf16.msra.mxu0 %v7387_v18  ;;  %2015 = vmatpush1.bf16.msra.mxu1 %v7388_v19  ;;  %v7435_v52 = vld [vmem:[#allocation2 + $0x360] ss:$36 sps:$4 sm:$0xff]   ;;  %v7436_v53 = vld [vmem:[#allocation2 + $0x368] ss:$36 sps:$4 sm:$0xff]   ;;  %v7442_v57 = vld [vmem:[#allocation2 + $0x3b0] ss:$36 sps:$4 sm:$0xff]  }
  0x81   :  { %1934 = vmatprep.subr.bf16.mxu0 %v7389_v20  ;;  %2016 = vmatprep.subr.bf16.mxu1 %v7391_v21  ;;  %v7441_v56 = vld [vmem:[#allocation2 + $0x3a8] ss:$36 sps:$4 sm:$0xff]   ;;  %v7443_v58 = vld [vmem:[#allocation2 + $0x3f4] ss:$36 sps:$4 sm:$0xff]   ;;  %v7445_v59 = vld [vmem:[#allocation2 + $0x3fc] ss:$36 sps:$4 sm:$0xff]  }
  0x82   :  { %1956 = vmatprep.mubr.bf16.mxu0 %v8600_v48  ;;  %2038 = vmatprep.mubr.bf16.mxu1 %v8600_v48  ;;  %v7447_v60 = vld [vmem:[#allocation2 + $0x3f0] ss:$36 sps:$4 sm:$0xff]   ;;  %v7448_v61 = vld [vmem:[#allocation2 + $0x3f8] ss:$36 sps:$4 sm:$0xff]   ;;  %v7451_v63 = vld [vmem:[#allocation2 + $0x444] ss:$36 sps:$4 sm:$0xff]  }
  0x83   :  { %v7449_v62 = vld [vmem:[#allocation2 + $0x43c] ss:$36 sps:$4 sm:$0xff]   ;;  %v7458_v2 = vld [vmem:[#allocation2 + $0x484] ss:$36 sps:$4 sm:$0xff]   ;;  %v7461_v3 = vld [vmem:[#allocation2 + $0x48c] ss:$36 sps:$4 sm:$0xff]  }
  0x84   :  { %1935 = vmatpush1.bf16.msra.mxu0 %v7393_v22  ;;  %2017 = vmatpush1.bf16.msra.mxu1 %v7394_v23  ;;  %v7453_v0 = vld [vmem:[#allocation2 + $0x438] ss:$36 sps:$4 sm:$0xff]   ;;  %v7454_v1 = vld [vmem:[#allocation2 + $0x440] ss:$36 sps:$4 sm:$0xff]   ;;  %v7459_v6 = vld [vmem:[#allocation2 + $0x488] ss:$36 sps:$4 sm:$0xff]  }
  0x85   :  { %1936 = vmatprep.subr.bf16.mxu0 %v7395_v24  ;;  %2018 = vmatprep.subr.bf16.mxu1 %v7397_v25  ;;  %v7456_v4 = vld [vmem:[#allocation2 + $0x480] ss:$36 sps:$4 sm:$0xff]   ;;  %v7465_v7 = vld [vmem:[#allocation2 + $0x4cc] ss:$36 sps:$4 sm:$0xff]   ;;  %v7468_v8 = vld [vmem:[#allocation2 + $0x4d4] ss:$36 sps:$4 sm:$0xff]  }
  0x86   :  { %v7463_v9 = vld [vmem:[#allocation2 + $0x4c8] ss:$36 sps:$4 sm:$0xff]   ;;  %v7466_v10 = vld [vmem:[#allocation2 + $0x4d0] ss:$36 sps:$4 sm:$0xff]   ;;  %v7474_v12 = vld [vmem:[#allocation2 + $0x51c] ss:$36 sps:$4 sm:$0xff]  }
  0x87   :  { %v7471_v11 = vld [vmem:[#allocation2 + $0x514] ss:$36 sps:$4 sm:$0xff]   ;;  %v7477_v15 = vld [vmem:[#allocation2 + $0x55c] ss:$36 sps:$4 sm:$0xff]   ;;  %v7480_v16 = vld [vmem:[#allocation2 + $0x564] ss:$36 sps:$4 sm:$0xff]  }
  0x88   :  { %1937 = vmatpush1.bf16.msra.mxu0 %v7399_v26  ;;  %2019 = vmatpush1.bf16.msra.mxu1 %v7400_v27  ;;  %v7469_v13 = vld [vmem:[#allocation2 + $0x510] ss:$36 sps:$4 sm:$0xff]   ;;  %v7472_v14 = vld [vmem:[#allocation2 + $0x518] ss:$36 sps:$4 sm:$0xff]   ;;  %v7478_v18 = vld [vmem:[#allocation2 + $0x560] ss:$36 sps:$4 sm:$0xff]  }
  0x89   :  { %1938 = vmatprep.subr.bf16.mxu0 %v7401_v28  ;;  %2020 = vmatprep.subr.bf16.mxu1 %v7403_v29  ;;  %v7475_v17 = vld [vmem:[#allocation2 + $0x558] ss:$36 sps:$4 sm:$0xff]   ;;  %v7483_v19 = vld [vmem:[#allocation2 + $0x5a4] ss:$36 sps:$4 sm:$0xff]   ;;  %v7486_v20 = vld [vmem:[#allocation2 + $0x5ac] ss:$36 sps:$4 sm:$0xff]  }
  0x8a   :  { %v7481_v21 = vld [vmem:[#allocation2 + $0x5a0] ss:$36 sps:$4 sm:$0xff]   ;;  %v7484_v22 = vld [vmem:[#allocation2 + $0x5a8] ss:$36 sps:$4 sm:$0xff]   ;;  %v7492_v24 = vld [vmem:[#allocation2 + $0x5f4] ss:$36 sps:$4 sm:$0xff]  }
  0x8b   :  { %v7489_v23 = vld [vmem:[#allocation2 + $0x5ec] ss:$36 sps:$4 sm:$0xff]   ;;  %v7495_v27 = vld [vmem:[#allocation2 + $0x634] ss:$36 sps:$4 sm:$0xff]   ;;  %v7498_v28 = vld [vmem:[#allocation2 + $0x63c] ss:$36 sps:$4 sm:$0xff]  }
  0x8c   :  { %1939 = vmatpush1.bf16.msra.mxu0 %v7405_v30  ;;  %2021 = vmatpush1.bf16.msra.mxu1 %v7406_v31  ;;  %v7487_v25 = vld [vmem:[#allocation2 + $0x5e8] ss:$36 sps:$4 sm:$0xff]   ;;  %v7490_v26 = vld [vmem:[#allocation2 + $0x5f0] ss:$36 sps:$4 sm:$0xff]   ;;  %v7522_v46 = vld [vmem:[#allocation2 + $0x75c] ss:$36 sps:$4 sm:$0xff]  }
  0x8d   :  { %1940 = vmatprep.subr.bf16.mxu0 %v7407_v32  ;;  %2022 = vmatprep.subr.bf16.mxu1 %v7409_v33  ;;  %v8611_v29 = vld [vmem:[%s8964_s0 + $0x8] sm:$0xff]  ;;  %v7493_v31 = vld [vmem:[#allocation2 + $0x630] ss:$36 sps:$4 sm:$0xff]   ;;  %v7496_v32 = vld [vmem:[#allocation2 + $0x638] ss:$36 sps:$4 sm:$0xff]   ;;  %vm2348_vm1 = vcmask 1043456  }
  0x8e   :  { %v8615_v30 = vcombine.high %v8611_v29, %v8611_v29  ;;  %v7501_v33 = vld [vmem:[#allocation2 + $0x67c] ss:$36 sps:$4 sm:$0xff]   ;;  %vm2344_vm2 = vcmask 588800   ;;  %s8461_s29 = smov 32   ;;  %vm2747_vm3 = vcmask 261120   ;;  %s8462_s28 = smov 112  }
  0x8f   :  { %s8463_s4 = smov 120   ;;  %s8464_s13 = smov 104   ;;  %vm2899_vm4 = vcmask 130048   ;;  %vm2992_vm5 = vcmask 64512  }
  0x90   :  { %1941 = vmatpush1.bf16.msra.mxu0 %v7411_v34  ;;  %2023 = vmatpush1.bf16.msra.mxu1 %v7412_v35  ;;  %v7504_v34 = vld [vmem:[#allocation2 + $0x684] ss:$36 sps:$4 sm:$0xff]   ;;  %v7499_v35 = vld [vmem:[#allocation2 + $0x678] ss:$36 sps:$4 sm:$0xff]   ;;  %s8465_s15 = smov 80   ;;  %s8466_s16 = smov 88  }
  0x91   :  { %1942 = vmatprep.subr.bf16.mxu0 %v7413_v36  ;;  %2024 = vmatprep.subr.bf16.mxu1 %v7415_v37  ;;  %v7502_v36 = vld [vmem:[#allocation2 + $0x680] ss:$36 sps:$4 sm:$0xff]   ;;  %s8467_s18 = smov 72  }
  0x92   :  { %v7507_v37 = vld [vmem:[#allocation2 + $0x6c4] ss:$36 sps:$4 sm:$0xff]  }
  0x94   :  { %1943 = vmatpush1.bf16.msra.mxu0 %v7417_v38  ;;  %2025 = vmatpush1.bf16.msra.mxu1 %v7418_v39  ;;  %v7510_v38 = vld [vmem:[#allocation2 + $0x6cc] ss:$36 sps:$4 sm:$0xff]   ;;  %v7505_v39 = vld [vmem:[#allocation2 + $0x6c0] ss:$36 sps:$4 sm:$0xff]  }
  0x95   :  { %1944 = vmatprep.subr.bf16.mxu0 %v7419_v40  ;;  %2026 = vmatprep.subr.bf16.mxu1 %v7421_v41  ;;  %v7508_v40 = vld [vmem:[#allocation2 + $0x6c8] ss:$36 sps:$4 sm:$0xff]  }
  0x96   :  { %v7513_v41 = vld [vmem:[#allocation2 + $0x70c] ss:$36 sps:$4 sm:$0xff]  }
  0x98   :  { %1945 = vmatpush1.bf16.msra.mxu0 %v7423_v42  ;;  %2027 = vmatpush1.bf16.msra.mxu1 %v7424_v43  ;;  %v7516_v42 = vld [vmem:[#allocation2 + $0x714] ss:$36 sps:$4 sm:$0xff]   ;;  %v7511_v43 = vld [vmem:[#allocation2 + $0x708] ss:$36 sps:$4 sm:$0xff]  }
  0x99   :  { %1946 = vmatprep.subr.bf16.mxu0 %v7425_v44  ;;  %2028 = vmatprep.subr.bf16.mxu1 %v7427_v45  ;;  %v7514_v44 = vld [vmem:[#allocation2 + $0x710] ss:$36 sps:$4 sm:$0xff]  }
  0x9a   :  { %v7519_v45 = vld [vmem:[#allocation2 + $0x754] ss:$36 sps:$4 sm:$0xff]  }
  0x9c   :  { %1947 = vmatpush1.bf16.msra.mxu0 %v7429_v47  ;;  %2029 = vmatpush1.bf16.msra.mxu1 %v7430_v49  ;;  %v7517_v47 = vld [vmem:[#allocation2 + $0x750] ss:$36 sps:$4 sm:$0xff]   ;;  %v7520_v49 = vld [vmem:[#allocation2 + $0x758] ss:$36 sps:$4 sm:$0xff]  }
  0x9d   :  { %1948 = vmatprep.subr.bf16.mxu0 %v7431_v50  ;;  %2030 = vmatprep.subr.bf16.mxu1 %v7433_v51  ;;  %v7525_v50 = vld [vmem:[#allocation2 + $0x79c] ss:$36 sps:$4 sm:$0xff]   ;;  %v7528_v51 = vld [vmem:[#allocation2 + $0x7a4] ss:$36 sps:$4 sm:$0xff]  }
  0xa0   :  { %1949 = vmatpush1.bf16.msra.mxu0 %v7435_v52  ;;  %2031 = vmatpush1.bf16.msra.mxu1 %v7436_v53  ;;  %v7523_v52 = vld [vmem:[#allocation2 + $0x798] ss:$36 sps:$4 sm:$0xff]   ;;  %v7526_v53 = vld [vmem:[#allocation2 + $0x7a0] ss:$36 sps:$4 sm:$0xff]  }
  0xa1   :  { %1950 = vmatprep.subr.bf16.mxu0 %v7437_v54  ;;  %2032 = vmatprep.subr.bf16.mxu1 %v7439_v55  ;;  %v7531_v54 = vld [vmem:[#allocation2 + $0x7e4] ss:$36 sps:$4 sm:$0xff]   ;;  %v7534_v55 = vld [vmem:[#allocation2 + $0x7ec] ss:$36 sps:$4 sm:$0xff]  }
  0xa4   :  { %1951 = vmatpush1.bf16.msra.mxu0 %v7441_v56  ;;  %2033 = vmatpush1.bf16.msra.mxu1 %v7442_v57  ;;  %v7529_v56 = vld [vmem:[#allocation2 + $0x7e0] ss:$36 sps:$4 sm:$0xff]   ;;  %v7532_v57 = vld [vmem:[#allocation2 + $0x7e8] ss:$36 sps:$4 sm:$0xff]  }
  0xa5   :  { %1952 = vmatprep.subr.bf16.mxu0 %v7443_v58  ;;  %2034 = vmatprep.subr.bf16.mxu1 %v7445_v59  ;;  %v7537_v58 = vld [vmem:[#allocation2 + $0x82c] ss:$36 sps:$4 sm:$0xff]   ;;  %v7540_v59 = vld [vmem:[#allocation2 + $0x834] ss:$36 sps:$4 sm:$0xff]  }
  0xa8   :  { %1953 = vmatpush1.bf16.msra.mxu0 %v7447_v60  ;;  %2035 = vmatpush1.bf16.msra.mxu1 %v7448_v61  ;;  %v7535_v60 = vld [vmem:[#allocation2 + $0x828] ss:$36 sps:$4 sm:$0xff]   ;;  %v7538_v61 = vld [vmem:[#allocation2 + $0x830] ss:$36 sps:$4 sm:$0xff]  }
  0xa9   :  { %1954 = vmatprep.subr.bf16.mxu0 %v7449_v62  ;;  %2036 = vmatprep.subr.bf16.mxu1 %v7451_v63  ;;  %v7543_v62 = vld [vmem:[#allocation2 + $0x874] ss:$36 sps:$4 sm:$0xff]   ;;  %v7546_v63 = vld [vmem:[#allocation2 + $0x87c] ss:$36 sps:$4 sm:$0xff]  }
  0xac   :  { %1955 = vmatpush1.bf16.msra.mxu0 %v7453_v0  ;;  %2037 = vmatpush1.bf16.msra.mxu1 %v7454_v1  ;;  %v7541_v0 = vld [vmem:[#allocation2 + $0x870] ss:$36 sps:$4 sm:$0xff]   ;;  %v7544_v1 = vld [vmem:[#allocation2 + $0x878] ss:$36 sps:$4 sm:$0xff]  }
  0xad   :  { %1965 = vmatprep.subr.bf16.mxu0 %v7458_v2  ;;  %2047 = vmatprep.subr.bf16.mxu1 %v7461_v3  ;;  %v7549_v2 = vld [vmem:[#allocation2 + $0x8bc] ss:$36 sps:$4 sm:$0xff]   ;;  %v7552_v3 = vld [vmem:[#allocation2 + $0x8c4] ss:$36 sps:$4 sm:$0xff]  }
  0xaf   :  { %1957 = vmatmul.mubr.bf16.vlgmr.msra.gmra.mrb[0].mxu0 %v8604_v5  ;;  %2039 = vmatmul.mubr.bf16.vlgmr.msra.gmra.mrb[0].mxu1 %v8604_v5 }
  0xb0   :  { %1966 = vmatpush1.bf16.msra.mxu0 %v7456_v4  ;;  %2048 = vmatpush1.bf16.msra.mxu1 %v7459_v6  ;;  %v7547_v4 = vld [vmem:[#allocation2 + $0x8b8] ss:$36 sps:$4 sm:$0xff]   ;;  %v7550_v6 = vld [vmem:[#allocation2 + $0x8c0] ss:$36 sps:$4 sm:$0xff]  }
  0xb1   :  { %1967 = vmatprep.subr.bf16.mxu0 %v7465_v7  ;;  %2049 = vmatprep.subr.bf16.mxu1 %v7468_v8  ;;  %v7557_v7 = vld [vmem:[#allocation2 + $0x14] ss:$36 sps:$4 sm:$0xff]   ;;  %v7560_v8 = vld [vmem:[#allocation2 + $0x1c] ss:$36 sps:$4 sm:$0xff]  }
  0xb2   :  { %1997 = vmatprep.mubr.bf16.mxu0 %v8615_v30  ;;  %2079 = vmatprep.mubr.bf16.mxu1 %v8615_v30 }
  0xb4   :  { %1968 = vmatpush1.bf16.msra.mxu0 %v7463_v9  ;;  %2050 = vmatpush1.bf16.msra.mxu1 %v7466_v10  ;;  %v8621_v9 = vcombine.low %v8611_v29, %v8611_v29  ;;  %v7555_v10 = vld [vmem:[#allocation2 + $0x10] ss:$36 sps:$4 sm:$0xff]   ;;  %v7590_v29 = vld [vmem:[#allocation2 + $0x184] ss:$36 sps:$4 sm:$0xff]  }
  0xb5   :  { %1969 = vmatprep.subr.bf16.mxu0 %v7471_v11  ;;  %2051 = vmatprep.subr.bf16.mxu1 %v7474_v12  ;;  %v7558_v11 = vld [vmem:[#allocation2 + $0x18] ss:$36 sps:$4 sm:$0xff]  }
  0xb6   :  { %v7563_v12 = vld [vmem:[#allocation2 + $0x5c] ss:$36 sps:$4 sm:$0xff]  }
  0xb8   :  { %1970 = vmatpush1.bf16.msra.mxu0 %v7469_v13  ;;  %2052 = vmatpush1.bf16.msra.mxu1 %v7472_v14  ;;  %v7566_v13 = vld [vmem:[#allocation2 + $0x64] ss:$36 sps:$4 sm:$0xff]   ;;  %v7561_v14 = vld [vmem:[#allocation2 + $0x58] ss:$36 sps:$4 sm:$0xff]  }
  0xb9   :  { %1971 = vmatprep.subr.bf16.mxu0 %v7477_v15  ;;  %2053 = vmatprep.subr.bf16.mxu1 %v7480_v16  ;;  %v7564_v15 = vld [vmem:[#allocation2 + $0x60] ss:$36 sps:$4 sm:$0xff]  }
  0xba   :  { %v7569_v16 = vld [vmem:[#allocation2 + $0xa4] ss:$36 sps:$4 sm:$0xff]  }
  0xbc   :  { %1972 = vmatpush1.bf16.msra.mxu0 %v7475_v17  ;;  %2054 = vmatpush1.bf16.msra.mxu1 %v7478_v18  ;;  %v7572_v17 = vld [vmem:[#allocation2 + $0xac] ss:$36 sps:$4 sm:$0xff]   ;;  %v7567_v18 = vld [vmem:[#allocation2 + $0xa0] ss:$36 sps:$4 sm:$0xff]  }
  0xbd   :  { %1973 = vmatprep.subr.bf16.mxu0 %v7483_v19  ;;  %2055 = vmatprep.subr.bf16.mxu1 %v7486_v20  ;;  %v7570_v19 = vld [vmem:[#allocation2 + $0xa8] ss:$36 sps:$4 sm:$0xff]  }
  0xbe   :  { %v7575_v20 = vld [vmem:[#allocation2 + $0xec] ss:$36 sps:$4 sm:$0xff]  }
  0xc0   :  { %1974 = vmatpush1.bf16.msra.mxu0 %v7481_v21  ;;  %2056 = vmatpush1.bf16.msra.mxu1 %v7484_v22  ;;  %v7578_v21 = vld [vmem:[#allocation2 + $0xf4] ss:$36 sps:$4 sm:$0xff]   ;;  %v7573_v22 = vld [vmem:[#allocation2 + $0xe8] ss:$36 sps:$4 sm:$0xff]  }
  0xc1   :  { %1975 = vmatprep.subr.bf16.mxu0 %v7489_v23  ;;  %2057 = vmatprep.subr.bf16.mxu1 %v7492_v24  ;;  %v7576_v23 = vld [vmem:[#allocation2 + $0xf0] ss:$36 sps:$4 sm:$0xff]  }
  0xc2   :  { %v7581_v24 = vld [vmem:[#allocation2 + $0x134] ss:$36 sps:$4 sm:$0xff]  }
  0xc4   :  { %1976 = vmatpush1.bf16.msra.mxu0 %v7487_v25  ;;  %2058 = vmatpush1.bf16.msra.mxu1 %v7490_v26  ;;  %v7584_v25 = vld [vmem:[#allocation2 + $0x13c] ss:$36 sps:$4 sm:$0xff]   ;;  %v7579_v26 = vld [vmem:[#allocation2 + $0x130] ss:$36 sps:$4 sm:$0xff]  }
  0xc5   :  { %1977 = vmatprep.subr.bf16.mxu0 %v7495_v27  ;;  %2059 = vmatprep.subr.bf16.mxu1 %v7498_v28  ;;  %v7582_v27 = vld [vmem:[#allocation2 + $0x138] ss:$36 sps:$4 sm:$0xff]  }
  0xc6   :  { %v7587_v28 = vld [vmem:[#allocation2 + $0x17c] ss:$36 sps:$4 sm:$0xff]  }
  0xc8   :  { %1978 = vmatpush1.bf16.msra.mxu0 %v7493_v31  ;;  %2060 = vmatpush1.bf16.msra.mxu1 %v7496_v32  ;;  %v7585_v31 = vld [vmem:[#allocation2 + $0x178] ss:$36 sps:$4 sm:$0xff]   ;;  %v7588_v32 = vld [vmem:[#allocation2 + $0x180] ss:$36 sps:$4 sm:$0xff]  }
  0xc9   :  { %1979 = vmatprep.subr.bf16.mxu0 %v7501_v33  ;;  %2061 = vmatprep.subr.bf16.mxu1 %v7504_v34  ;;  %v7593_v33 = vld [vmem:[#allocation2 + $0x1c4] ss:$36 sps:$4 sm:$0xff]   ;;  %v7596_v34 = vld [vmem:[#allocation2 + $0x1cc] ss:$36 sps:$4 sm:$0xff]  }
  0xcc   :  { %1980 = vmatpush1.bf16.msra.mxu0 %v7499_v35  ;;  %2062 = vmatpush1.bf16.msra.mxu1 %v7502_v36  ;;  %v7591_v35 = vld [vmem:[#allocation2 + $0x1c0] ss:$36 sps:$4 sm:$0xff]   ;;  %v7594_v36 = vld [vmem:[#allocation2 + $0x1c8] ss:$36 sps:$4 sm:$0xff]  }
  0xcd   :  { %1981 = vmatprep.subr.bf16.mxu0 %v7507_v37  ;;  %2063 = vmatprep.subr.bf16.mxu1 %v7510_v38  ;;  %v7599_v37 = vld [vmem:[#allocation2 + $0x20c] ss:$36 sps:$4 sm:$0xff]   ;;  %v7602_v38 = vld [vmem:[#allocation2 + $0x214] ss:$36 sps:$4 sm:$0xff]  }
  0xd0   :  { %1982 = vmatpush1.bf16.msra.mxu0 %v7505_v39  ;;  %2064 = vmatpush1.bf16.msra.mxu1 %v7508_v40  ;;  %v7597_v39 = vld [vmem:[#allocation2 + $0x208] ss:$36 sps:$4 sm:$0xff]   ;;  %v7600_v40 = vld [vmem:[#allocation2 + $0x210] ss:$36 sps:$4 sm:$0xff]  }
  0xd1   :  { %1983 = vmatprep.subr.bf16.mxu0 %v7513_v41  ;;  %2065 = vmatprep.subr.bf16.mxu1 %v7516_v42  ;;  %v7605_v41 = vld [vmem:[#allocation2 + $0x254] ss:$36 sps:$4 sm:$0xff]   ;;  %v7608_v42 = vld [vmem:[#allocation2 + $0x25c] ss:$36 sps:$4 sm:$0xff]  }
  0xd4   :  { %1984 = vmatpush1.bf16.msra.mxu0 %v7511_v43  ;;  %2066 = vmatpush1.bf16.msra.mxu1 %v7514_v44  ;;  %v7603_v43 = vld [vmem:[#allocation2 + $0x250] ss:$36 sps:$4 sm:$0xff]   ;;  %v7606_v44 = vld [vmem:[#allocation2 + $0x258] ss:$36 sps:$4 sm:$0xff]  }
  0xd5   :  { %1985 = vmatprep.subr.bf16.mxu0 %v7519_v45  ;;  %2067 = vmatprep.subr.bf16.mxu1 %v7522_v46  ;;  %v7611_v45 = vld [vmem:[#allocation2 + $0x29c] ss:$36 sps:$4 sm:$0xff]   ;;  %v7614_v46 = vld [vmem:[#allocation2 + $0x2a4] ss:$36 sps:$4 sm:$0xff]  }
  0xd8   :  { %1986 = vmatpush1.bf16.msra.mxu0 %v7517_v47  ;;  %2068 = vmatpush1.bf16.msra.mxu1 %v7520_v49  ;;  %v7609_v47 = vld [vmem:[#allocation2 + $0x298] ss:$36 sps:$4 sm:$0xff]   ;;  %v7612_v49 = vld [vmem:[#allocation2 + $0x2a0] ss:$36 sps:$4 sm:$0xff]  }
  0xd9   :  { %1987 = vmatprep.subr.bf16.mxu0 %v7525_v50  ;;  %2069 = vmatprep.subr.bf16.mxu1 %v7528_v51  ;;  %v7617_v50 = vld [vmem:[#allocation2 + $0x2e4] ss:$36 sps:$4 sm:$0xff]   ;;  %v7620_v51 = vld [vmem:[#allocation2 + $0x2ec] ss:$36 sps:$4 sm:$0xff]  }
  0xdc   :  { %1988 = vmatpush1.bf16.msra.mxu0 %v7523_v52  ;;  %2070 = vmatpush1.bf16.msra.mxu1 %v7526_v53  ;;  %v7615_v52 = vld [vmem:[#allocation2 + $0x2e0] ss:$36 sps:$4 sm:$0xff]   ;;  %v7618_v53 = vld [vmem:[#allocation2 + $0x2e8] ss:$36 sps:$4 sm:$0xff]  }
  0xdd   :  { %1989 = vmatprep.subr.bf16.mxu0 %v7531_v54  ;;  %2071 = vmatprep.subr.bf16.mxu1 %v7534_v55  ;;  %v7623_v54 = vld [vmem:[#allocation2 + $0x32c] ss:$36 sps:$4 sm:$0xff]   ;;  %v7626_v55 = vld [vmem:[#allocation2 + $0x334] ss:$36 sps:$4 sm:$0xff]  }
  0xe0   :  { %1990 = vmatpush1.bf16.msra.mxu0 %v7529_v56  ;;  %2072 = vmatpush1.bf16.msra.mxu1 %v7532_v57  ;;  %v7621_v56 = vld [vmem:[#allocation2 + $0x328] ss:$36 sps:$4 sm:$0xff]   ;;  %v7624_v57 = vld [vmem:[#allocation2 + $0x330] ss:$36 sps:$4 sm:$0xff]  }
  0xe1   :  { %1991 = vmatprep.subr.bf16.mxu0 %v7537_v58  ;;  %2073 = vmatprep.subr.bf16.mxu1 %v7540_v59  ;;  %v7629_v58 = vld [vmem:[#allocation2 + $0x374] ss:$36 sps:$4 sm:$0xff]   ;;  %v7632_v59 = vld [vmem:[#allocation2 + $0x37c] ss:$36 sps:$4 sm:$0xff]  }
  0xe4   :  { %1992 = vmatpush1.bf16.msra.mxu0 %v7535_v60  ;;  %2074 = vmatpush1.bf16.msra.mxu1 %v7538_v61  ;;  %v7627_v60 = vld [vmem:[#allocation2 + $0x370] ss:$36 sps:$4 sm:$0xff]   ;;  %v7630_v61 = vld [vmem:[#allocation2 + $0x378] ss:$36 sps:$4 sm:$0xff]  }
  0xe5   :  { %1993 = vmatprep.subr.bf16.mxu0 %v7543_v62  ;;  %2075 = vmatprep.subr.bf16.mxu1 %v7546_v63  ;;  %v7635_v62 = vld [vmem:[#allocation2 + $0x3bc] ss:$36 sps:$4 sm:$0xff]   ;;  %v7638_v63 = vld [vmem:[#allocation2 + $0x3c4] ss:$36 sps:$4 sm:$0xff]  }
  0xe8   :  { %1994 = vmatpush1.bf16.msra.mxu0 %v7541_v0  ;;  %2076 = vmatpush1.bf16.msra.mxu1 %v7544_v1  ;;  %v7633_v0 = vld [vmem:[#allocation2 + $0x3b8] ss:$36 sps:$4 sm:$0xff]   ;;  %v7636_v1 = vld [vmem:[#allocation2 + $0x3c0] ss:$36 sps:$4 sm:$0xff]  }
  0xe9   :  { %1995 = vmatprep.subr.bf16.mxu0 %v7549_v2  ;;  %2077 = vmatprep.subr.bf16.mxu1 %v7552_v3  ;;  %v7641_v2 = vld [vmem:[#allocation2 + $0x404] ss:$36 sps:$4 sm:$0xff]   ;;  %v7644_v3 = vld [vmem:[#allocation2 + $0x40c] ss:$36 sps:$4 sm:$0xff]  }
  0xec   :  { %1996 = vmatpush1.bf16.msra.mxu0 %v7547_v4  ;;  %2078 = vmatpush1.bf16.msra.mxu1 %v7550_v6  ;;  %v7639_v4 = vld [vmem:[#allocation2 + $0x400] ss:$36 sps:$4 sm:$0xff]   ;;  %v7642_v6 = vld [vmem:[#allocation2 + $0x408] ss:$36 sps:$4 sm:$0xff]  }
  0xed   :  { %2088 = vmatprep.subr.bf16.mxu0 %v7557_v7  ;;  %2170 = vmatprep.subr.bf16.mxu1 %v7560_v8  ;;  %v7647_v7 = vld [vmem:[#allocation2 + $0x44c] ss:$36 sps:$4 sm:$0xff]   ;;  %v7650_v8 = vld [vmem:[#allocation2 + $0x454] ss:$36 sps:$4 sm:$0xff]  }
  0xef   :  { %1998 = vmatmul.mubr.bf16.vlgmr.msra.gmra.mrb[0].mxu0 %v8621_v9  ;;  %2080 = vmatmul.mubr.bf16.vlgmr.msra.gmra.mrb[0].mxu1 %v8621_v9 }
  0xf0   :  { %2089 = vmatpush1.bf16.msra.mxu0 %v7555_v10  ;;  %2171 = vmatpush1.bf16.msra.mxu1 %v7558_v11  ;;  %v7645_v10 = vld [vmem:[#allocation2 + $0x448] ss:$36 sps:$4 sm:$0xff]   ;;  %v7648_v11 = vld [vmem:[#allocation2 + $0x450] ss:$36 sps:$4 sm:$0xff]  }
  0xf1   :  { %2090 = vmatprep.subr.bf16.mxu0 %v7563_v12  ;;  %2172 = vmatprep.subr.bf16.mxu1 %v7566_v13  ;;  %v7653_v12 = vld [vmem:[#allocation2 + $0x494] ss:$36 sps:$4 sm:$0xff]   ;;  %v7656_v13 = vld [vmem:[#allocation2 + $0x49c] ss:$36 sps:$4 sm:$0xff]  }
  0xf2   :  { %2120 = vmatprep.mubr.bf16.mxu0 %v8600_v48  ;;  %2202 = vmatprep.mubr.bf16.mxu1 %v8600_v48 }
  0xf4   :  { %2091 = vmatpush1.bf16.msra.mxu0 %v7561_v14  ;;  %2173 = vmatpush1.bf16.msra.mxu1 %v7564_v15  ;;  %v7651_v14 = vld [vmem:[#allocation2 + $0x490] ss:$36 sps:$4 sm:$0xff]   ;;  %v7654_v15 = vld [vmem:[#allocation2 + $0x498] ss:$36 sps:$4 sm:$0xff]  }
  0xf5   :  { %2092 = vmatprep.subr.bf16.mxu0 %v7569_v16  ;;  %2174 = vmatprep.subr.bf16.mxu1 %v7572_v17  ;;  %v7659_v16 = vld [vmem:[#allocation2 + $0x4dc] ss:$36 sps:$4 sm:$0xff]   ;;  %v7662_v17 = vld [vmem:[#allocation2 + $0x4e4] ss:$36 sps:$4 sm:$0xff]  }
  0xf8   :  { %2093 = vmatpush1.bf16.msra.mxu0 %v7567_v18  ;;  %2175 = vmatpush1.bf16.msra.mxu1 %v7570_v19  ;;  %v7657_v18 = vld [vmem:[#allocation2 + $0x4d8] ss:$36 sps:$4 sm:$0xff]   ;;  %v7660_v19 = vld [vmem:[#allocation2 + $0x4e0] ss:$36 sps:$4 sm:$0xff]  }
  0xf9   :  { %2094 = vmatprep.subr.bf16.mxu0 %v7575_v20  ;;  %2176 = vmatprep.subr.bf16.mxu1 %v7578_v21  ;;  %v7665_v20 = vld [vmem:[#allocation2 + $0x524] ss:$36 sps:$4 sm:$0xff]   ;;  %v7668_v21 = vld [vmem:[#allocation2 + $0x52c] ss:$36 sps:$4 sm:$0xff]  }
  0xfc   :  { %2095 = vmatpush1.bf16.msra.mxu0 %v7573_v22  ;;  %2177 = vmatpush1.bf16.msra.mxu1 %v7576_v23  ;;  %v7663_v22 = vld [vmem:[#allocation2 + $0x520] ss:$36 sps:$4 sm:$0xff]   ;;  %v7666_v23 = vld [vmem:[#allocation2 + $0x528] ss:$36 sps:$4 sm:$0xff]  }
  0xfd   :  { %2096 = vmatprep.subr.bf16.mxu0 %v7581_v24  ;;  %2178 = vmatprep.subr.bf16.mxu1 %v7584_v25  ;;  %v7671_v24 = vld [vmem:[#allocation2 + $0x56c] ss:$36 sps:$4 sm:$0xff]   ;;  %v7674_v25 = vld [vmem:[#allocation2 + $0x574] ss:$36 sps:$4 sm:$0xff]  }
 0x100   :  { %2097 = vmatpush1.bf16.msra.mxu0 %v7579_v26  ;;  %2179 = vmatpush1.bf16.msra.mxu1 %v7582_v27  ;;  %v7669_v26 = vld [vmem:[#allocation2 + $0x568] ss:$36 sps:$4 sm:$0xff]   ;;  %v7672_v27 = vld [vmem:[#allocation2 + $0x570] ss:$36 sps:$4 sm:$0xff]  }
 0x101   :  { %2098 = vmatprep.subr.bf16.mxu0 %v7587_v28  ;;  %2180 = vmatprep.subr.bf16.mxu1 %v7590_v29  ;;  %v7677_v28 = vld [vmem:[#allocation2 + $0x5b4] ss:$36 sps:$4 sm:$0xff]   ;;  %v7680_v29 = vld [vmem:[#allocation2 + $0x5bc] ss:$36 sps:$4 sm:$0xff]  }
 0x104   :  { %2099 = vmatpush1.bf16.msra.mxu0 %v7585_v31  ;;  %2181 = vmatpush1.bf16.msra.mxu1 %v7588_v32  ;;  %v7675_v31 = vld [vmem:[#allocation2 + $0x5b0] ss:$36 sps:$4 sm:$0xff]   ;;  %v7678_v32 = vld [vmem:[#allocation2 + $0x5b8] ss:$36 sps:$4 sm:$0xff]  }
 0x105   :  { %2100 = vmatprep.subr.bf16.mxu0 %v7593_v33  ;;  %2182 = vmatprep.subr.bf16.mxu1 %v7596_v34  ;;  %v7683_v33 = vld [vmem:[#allocation2 + $0x5fc] ss:$36 sps:$4 sm:$0xff]   ;;  %v7686_v34 = vld [vmem:[#allocation2 + $0x604] ss:$36 sps:$4 sm:$0xff]  }
 0x108   :  { %2101 = vmatpush1.bf16.msra.mxu0 %v7591_v35  ;;  %2183 = vmatpush1.bf16.msra.mxu1 %v7594_v36  ;;  %v7681_v35 = vld [vmem:[#allocation2 + $0x5f8] ss:$36 sps:$4 sm:$0xff]   ;;  %v7684_v36 = vld [vmem:[#allocation2 + $0x600] ss:$36 sps:$4 sm:$0xff]  }
 0x109   :  { %2102 = vmatprep.subr.bf16.mxu0 %v7599_v37  ;;  %2184 = vmatprep.subr.bf16.mxu1 %v7602_v38  ;;  %v7689_v37 = vld [vmem:[#allocation2 + $0x644] ss:$36 sps:$4 sm:$0xff]   ;;  %v7692_v38 = vld [vmem:[#allocation2 + $0x64c] ss:$36 sps:$4 sm:$0xff]  }
 0x10c   :  { %2103 = vmatpush1.bf16.msra.mxu0 %v7597_v39  ;;  %2185 = vmatpush1.bf16.msra.mxu1 %v7600_v40  ;;  %v7687_v39 = vld [vmem:[#allocation2 + $0x640] ss:$36 sps:$4 sm:$0xff]   ;;  %v7690_v40 = vld [vmem:[#allocation2 + $0x648] ss:$36 sps:$4 sm:$0xff]  }
 0x10d   :  { %2104 = vmatprep.subr.bf16.mxu0 %v7605_v41  ;;  %2186 = vmatprep.subr.bf16.mxu1 %v7608_v42  ;;  %v7695_v41 = vld [vmem:[#allocation2 + $0x68c] ss:$36 sps:$4 sm:$0xff]   ;;  %v7698_v42 = vld [vmem:[#allocation2 + $0x694] ss:$36 sps:$4 sm:$0xff]  }
 0x110   :  { %2105 = vmatpush1.bf16.msra.mxu0 %v7603_v43  ;;  %2187 = vmatpush1.bf16.msra.mxu1 %v7606_v44  ;;  %v7693_v43 = vld [vmem:[#allocation2 + $0x688] ss:$36 sps:$4 sm:$0xff]   ;;  %v7696_v44 = vld [vmem:[#allocation2 + $0x690] ss:$36 sps:$4 sm:$0xff]  }
 0x111   :  { %2106 = vmatprep.subr.bf16.mxu0 %v7611_v45  ;;  %2188 = vmatprep.subr.bf16.mxu1 %v7614_v46  ;;  %v7701_v45 = vld [vmem:[#allocation2 + $0x6d4] ss:$36 sps:$4 sm:$0xff]   ;;  %v7704_v46 = vld [vmem:[#allocation2 + $0x6dc] ss:$36 sps:$4 sm:$0xff]  }
 0x114   :  { %2107 = vmatpush1.bf16.msra.mxu0 %v7609_v47  ;;  %2189 = vmatpush1.bf16.msra.mxu1 %v7612_v49  ;;  %v7699_v47 = vld [vmem:[#allocation2 + $0x6d0] ss:$36 sps:$4 sm:$0xff]   ;;  %v7702_v49 = vld [vmem:[#allocation2 + $0x6d8] ss:$36 sps:$4 sm:$0xff]  }
 0x115   :  { %2108 = vmatprep.subr.bf16.mxu0 %v7617_v50  ;;  %2190 = vmatprep.subr.bf16.mxu1 %v7620_v51  ;;  %v7707_v50 = vld [vmem:[#allocation2 + $0x71c] ss:$36 sps:$4 sm:$0xff]   ;;  %v7710_v51 = vld [vmem:[#allocation2 + $0x724] ss:$36 sps:$4 sm:$0xff]  }
 0x118   :  { %2109 = vmatpush1.bf16.msra.mxu0 %v7615_v52  ;;  %2191 = vmatpush1.bf16.msra.mxu1 %v7618_v53  ;;  %v7705_v52 = vld [vmem:[#allocation2 + $0x718] ss:$36 sps:$4 sm:$0xff]   ;;  %v7708_v53 = vld [vmem:[#allocation2 + $0x720] ss:$36 sps:$4 sm:$0xff]  }
 0x119   :  { %2110 = vmatprep.subr.bf16.mxu0 %v7623_v54  ;;  %2192 = vmatprep.subr.bf16.mxu1 %v7626_v55  ;;  %v7713_v54 = vld [vmem:[#allocation2 + $0x764] ss:$36 sps:$4 sm:$0xff]   ;;  %v7716_v55 = vld [vmem:[#allocation2 + $0x76c] ss:$36 sps:$4 sm:$0xff]  }
 0x11c   :  { %2111 = vmatpush1.bf16.msra.mxu0 %v7621_v56  ;;  %2193 = vmatpush1.bf16.msra.mxu1 %v7624_v57  ;;  %v7711_v56 = vld [vmem:[#allocation2 + $0x760] ss:$36 sps:$4 sm:$0xff]   ;;  %v7714_v57 = vld [vmem:[#allocation2 + $0x768] ss:$36 sps:$4 sm:$0xff]  }
 0x11d   :  { %2112 = vmatprep.subr.bf16.mxu0 %v7629_v58  ;;  %2194 = vmatprep.subr.bf16.mxu1 %v7632_v59  ;;  %v7719_v58 = vld [vmem:[#allocation2 + $0x7ac] ss:$36 sps:$4 sm:$0xff]   ;;  %v7722_v59 = vld [vmem:[#allocation2 + $0x7b4] ss:$36 sps:$4 sm:$0xff]  }
 0x120   :  { %2113 = vmatpush1.bf16.msra.mxu0 %v7627_v60  ;;  %2195 = vmatpush1.bf16.msra.mxu1 %v7630_v61  ;;  %v7717_v60 = vld [vmem:[#allocation2 + $0x7a8] ss:$36 sps:$4 sm:$0xff]   ;;  %v7720_v61 = vld [vmem:[#allocation2 + $0x7b0] ss:$36 sps:$4 sm:$0xff]  }
 0x121   :  { %2114 = vmatprep.subr.bf16.mxu0 %v7635_v62  ;;  %2196 = vmatprep.subr.bf16.mxu1 %v7638_v63  ;;  %v7725_v62 = vld [vmem:[#allocation2 + $0x7f4] ss:$36 sps:$4 sm:$0xff]   ;;  %v7728_v63 = vld [vmem:[#allocation2 + $0x7fc] ss:$36 sps:$4 sm:$0xff]  }
 0x124   :  { %2115 = vmatpush1.bf16.msra.mxu0 %v7633_v0  ;;  %2197 = vmatpush1.bf16.msra.mxu1 %v7636_v1  ;;  %v7723_v0 = vld [vmem:[#allocation2 + $0x7f0] ss:$36 sps:$4 sm:$0xff]   ;;  %v7726_v1 = vld [vmem:[#allocation2 + $0x7f8] ss:$36 sps:$4 sm:$0xff]  }
 0x125   :  { %2116 = vmatprep.subr.bf16.mxu0 %v7641_v2  ;;  %2198 = vmatprep.subr.bf16.mxu1 %v7644_v3  ;;  %v7731_v2 = vld [vmem:[#allocation2 + $0x83c] ss:$36 sps:$4 sm:$0xff]   ;;  %v7734_v3 = vld [vmem:[#allocation2 + $0x844] ss:$36 sps:$4 sm:$0xff]  }
 0x128   :  { %2117 = vmatpush1.bf16.msra.mxu0 %v7639_v4  ;;  %2199 = vmatpush1.bf16.msra.mxu1 %v7642_v6  ;;  %v7729_v4 = vld [vmem:[#allocation2 + $0x838] ss:$36 sps:$4 sm:$0xff]   ;;  %v7732_v6 = vld [vmem:[#allocation2 + $0x840] ss:$36 sps:$4 sm:$0xff]  }
 0x129   :  { %2118 = vmatprep.subr.bf16.mxu0 %v7647_v7  ;;  %2200 = vmatprep.subr.bf16.mxu1 %v7650_v8  ;;  %v7737_v7 = vld [vmem:[#allocation2 + $0x884] ss:$36 sps:$4 sm:$0xff]   ;;  %v7740_v8 = vld [vmem:[#allocation2 + $0x88c] ss:$36 sps:$4 sm:$0xff]  }
 0x12c   :  { %2119 = vmatpush1.bf16.msra.mxu0 %v7645_v10  ;;  %2201 = vmatpush1.bf16.msra.mxu1 %v7648_v11  ;;  %v7735_v10 = vld [vmem:[#allocation2 + $0x880] ss:$36 sps:$4 sm:$0xff]   ;;  %v7738_v11 = vld [vmem:[#allocation2 + $0x888] ss:$36 sps:$4 sm:$0xff]  }
 0x12d   :  { %2129 = vmatprep.subr.bf16.mxu0 %v7653_v12  ;;  %2211 = vmatprep.subr.bf16.mxu1 %v7656_v13  ;;  %v7743_v12 = vld [vmem:[#allocation2 + $0x8cc] ss:$36 sps:$4 sm:$0xff]   ;;  %v7746_v13 = vld [vmem:[#allocation2 + $0x8d4] ss:$36 sps:$4 sm:$0xff]  }
 0x12f   :  { %2121 = vmatmul.mubr.bf16.vlgmr.msra.gmra.mrb[4].mxu0 %v8604_v5  ;;  %2203 = vmatmul.mubr.bf16.vlgmr.msra.gmra.mrb[4].mxu1 %v8604_v5 }
 0x130   :  { %2130 = vmatpush1.bf16.msra.mxu0 %v7651_v14  ;;  %2212 = vmatpush1.bf16.msra.mxu1 %v7654_v15  ;;  %v7741_v14 = vld [vmem:[#allocation2 + $0x8c8] ss:$36 sps:$4 sm:$0xff]   ;;  %v7744_v15 = vld [vmem:[#allocation2 + $0x8d0] ss:$36 sps:$4 sm:$0xff]  }
 0x131   :  { %2131 = vmatprep.subr.bf16.mxu0 %v7659_v16  ;;  %2213 = vmatprep.subr.bf16.mxu1 %v7662_v17  ;;  %v7747_v16 = vld [vmem:[#allocation2 + $0x260] ss:$36 sps:$4 sm:$0xff]  }
 0x132   :  { %2161 = vmatprep.mubr.bf16.mxu0 %v8615_v30  ;;  %2243 = vmatprep.mubr.bf16.mxu1 %v8615_v30  ;;  %v7748_v17 = vld [vmem:[#allocation2 + $0x6e0] ss:$36 sps:$4 sm:$0xff]  }
 0x134   :  { %2132 = vmatpush1.bf16.msra.mxu0 %v7657_v18  ;;  %2214 = vmatpush1.bf16.msra.mxu1 %v7660_v19  ;;  %v7749_v18 = vld [vmem:[#allocation2 + $0x20] ss:$36 sps:$4 sm:$0xff]  }
 0x135   :  { %2133 = vmatprep.subr.bf16.mxu0 %v7665_v20  ;;  %2215 = vmatprep.subr.bf16.mxu1 %v7668_v21  ;;  %v7750_v19 = vld [vmem:[#allocation2 + $0x4a0] ss:$36 sps:$4 sm:$0xff]   ;;  %v7751_v20 = vld [vmem:[#allocation2 + $0x2a8] ss:$36 sps:$4 sm:$0xff]  }
 0x136   :  { %v7752_v21 = vld [vmem:[#allocation2 + $0x728] ss:$36 sps:$4 sm:$0xff]  }
 0x138   :  { %2134 = vmatpush1.bf16.msra.mxu0 %v7663_v22  ;;  %2216 = vmatpush1.bf16.msra.mxu1 %v7666_v23  ;;  %v7753_v22 = vld [vmem:[#allocation2 + $0x68] ss:$36 sps:$4 sm:$0xff]  }
 0x139   :  { %2135 = vmatprep.subr.bf16.mxu0 %v7671_v24  ;;  %2217 = vmatprep.subr.bf16.mxu1 %v7674_v25  ;;  %v7754_v23 = vld [vmem:[#allocation2 + $0x4e8] ss:$36 sps:$4 sm:$0xff]   ;;  %v7755_v24 = vld [vmem:[#allocation2 + $0x2f0] ss:$36 sps:$4 sm:$0xff]  }
 0x13a   :  { %v7756_v25 = vld [vmem:[#allocation2 + $0x770] ss:$36 sps:$4 sm:$0xff]  }
 0x13c   :  { %2136 = vmatpush1.bf16.msra.mxu0 %v7669_v26  ;;  %2218 = vmatpush1.bf16.msra.mxu1 %v7672_v27  ;;  %v7757_v26 = vld [vmem:[#allocation2 + $0xb0] ss:$36 sps:$4 sm:$0xff]  }
 0x13d   :  { %2137 = vmatprep.subr.bf16.mxu0 %v7677_v28  ;;  %2219 = vmatprep.subr.bf16.mxu1 %v7680_v29  ;;  %v7758_v27 = vld [vmem:[#allocation2 + $0x530] ss:$36 sps:$4 sm:$0xff]   ;;  %v7759_v28 = vld [vmem:[#allocation2 + $0x338] ss:$36 sps:$4 sm:$0xff]  }
 0x13e   :  { %v7760_v29 = vld [vmem:[#allocation2 + $0x7b8] ss:$36 sps:$4 sm:$0xff]  }
 0x140   :  { %2138 = vmatpush1.bf16.msra.mxu0 %v7675_v31  ;;  %2220 = vmatpush1.bf16.msra.mxu1 %v7678_v32  ;;  %v7761_v31 = vld [vmem:[#allocation2 + $0xf8] ss:$36 sps:$4 sm:$0xff]  }
 0x141   :  { %2139 = vmatprep.subr.bf16.mxu0 %v7683_v33  ;;  %2221 = vmatprep.subr.bf16.mxu1 %v7686_v34  ;;  %v7762_v32 = vld [vmem:[#allocation2 + $0x578] ss:$36 sps:$4 sm:$0xff]   ;;  %v7763_v33 = vld [vmem:[#allocation2 + $0x380] ss:$36 sps:$4 sm:$0xff]  }
 0x142   :  { %v7764_v34 = vld [vmem:[#allocation2 + $0x800] ss:$36 sps:$4 sm:$0xff]  }
 0x144   :  { %2140 = vmatpush1.bf16.msra.mxu0 %v7681_v35  ;;  %2222 = vmatpush1.bf16.msra.mxu1 %v7684_v36  ;;  %v7765_v35 = vld [vmem:[#allocation2 + $0x140] ss:$36 sps:$4 sm:$0xff]  }
 0x145   :  { %2141 = vmatprep.subr.bf16.mxu0 %v7689_v37  ;;  %2223 = vmatprep.subr.bf16.mxu1 %v7692_v38  ;;  %v7766_v36 = vld [vmem:[#allocation2 + $0x5c0] ss:$36 sps:$4 sm:$0xff]   ;;  %v7767_v37 = vld [vmem:[#allocation2 + $0x3c8] ss:$36 sps:$4 sm:$0xff]  }
 0x146   :  { %v7770_v38 = vld [vmem:[#allocation2 + $0x608] ss:$36 sps:$4 sm:$0xff]  }
 0x148   :  { %2142 = vmatpush1.bf16.msra.mxu0 %v7687_v39  ;;  %2224 = vmatpush1.bf16.msra.mxu1 %v7690_v40  ;;  %v7771_v39 = vld [vmem:[#allocation2 + $0x410] ss:$36 sps:$4 sm:$0xff]  }
 0x149   :  { %2143 = vmatprep.subr.bf16.mxu0 %v7695_v41  ;;  %2225 = vmatprep.subr.bf16.mxu1 %v7698_v42  ;;  %v7772_v40 = vld [vmem:[#allocation2 + $0x890] ss:$36 sps:$4 sm:$0xff]  }
 0x14a   :  { %v7773_v41 = vld [vmem:[#allocation2 + $0x1d0] ss:$36 sps:$4 sm:$0xff]  }
 0x14b   :  { %v7774_v42 = vld [vmem:[#allocation2 + $0x650] ss:$36 sps:$4 sm:$0xff]  }
 0x14c   :  { %2144 = vmatpush1.bf16.msra.mxu0 %v7693_v43  ;;  %2226 = vmatpush1.bf16.msra.mxu1 %v7696_v44  ;;  %v7775_v43 = vld [vmem:[#allocation2 + $0x458] ss:$36 sps:$4 sm:$0xff]  }
 0x14d   :  { %2145 = vmatprep.subr.bf16.mxu0 %v7701_v45  ;;  %2227 = vmatprep.subr.bf16.mxu1 %v7704_v46  ;;  %v7776_v44 = vld [vmem:[#allocation2 + $0x8d8] ss:$36 sps:$4 sm:$0xff]  }
 0x14e   :  { %v7777_v45 = vld [vmem:[#allocation2 + $0x218] ss:$36 sps:$4 sm:$0xff]  }
 0x14f   :  { %v7778_v46 = vld [vmem:[#allocation2 + $0x698] ss:$36 sps:$4 sm:$0xff]  }
 0x150   :  { %2146 = vmatpush1.bf16.msra.mxu0 %v7699_v47  ;;  %2228 = vmatpush1.bf16.msra.mxu1 %v7702_v49  ;;  %v8457_v47 = vmov 0.0  }
 0x151   :  { %2147 = vmatprep.subr.bf16.mxu0 %v7707_v50  ;;  %2229 = vmatprep.subr.bf16.mxu1 %v7710_v51 }
 0x154   :  { %2148 = vmatpush1.bf16.msra.mxu0 %v7705_v52  ;;  %2230 = vmatpush1.bf16.msra.mxu1 %v7708_v53 }
 0x155   :  { %2149 = vmatprep.subr.bf16.mxu0 %v7713_v54  ;;  %2231 = vmatprep.subr.bf16.mxu1 %v7716_v55 }
 0x158   :  { %2150 = vmatpush1.bf16.msra.mxu0 %v7711_v56  ;;  %2232 = vmatpush1.bf16.msra.mxu1 %v7714_v57 }
 0x159   :  { %2151 = vmatprep.subr.bf16.mxu0 %v7719_v58  ;;  %2233 = vmatprep.subr.bf16.mxu1 %v7722_v59  ;;  %v7781_v59 = vld [vmem:[%s8966_s2 + $0x4] ss:$12 sps:$4 sm:$0xff]  }
 0x15c   :  { %2152 = vmatpush1.bf16.msra.mxu0 %v7717_v60  ;;  %2234 = vmatpush1.bf16.msra.mxu1 %v7720_v61  ;;  %v8459_v60 = vmov 0   ;;  %v7785_v61 = vld [vmem:[%s8966_s2 + $0x1c] ss:$12 sps:$4 sm:$0xff]  }
 0x15d   :  { %2153 = vmatprep.subr.bf16.mxu0 %v7725_v62  ;;  %2235 = vmatprep.subr.bf16.mxu1 %v7728_v63  ;;  %v7783_v62 = vld [vmem:[%s8966_s2 + $0x18] ss:$12 sps:$4 sm:$0xff]   ;;  %v7789_v63 = vld [vmem:[%s8966_s2 + $0x34] ss:$12 sps:$4 sm:$0xff]  }
 0x15e   :  { %7257 = vset.pattern.permute.xlu0 %v8459_v60  ;;  %7258 = vset.pattern.permute.xlu1 %v8459_v60 }
 0x160   :  { %2154 = vmatpush1.bf16.msra.mxu0 %v7723_v0  ;;  %2236 = vmatpush1.bf16.msra.mxu1 %v7726_v1  ;;  %v7787_v0 = vld [vmem:[%s8966_s2 + $0x30] ss:$12 sps:$4 sm:$0xff]   ;;  %v7793_v1 = vld [vmem:[%s8966_s2 + $0x4c] ss:$12 sps:$4 sm:$0xff]  }
 0x161   :  { %2155 = vmatprep.subr.bf16.mxu0 %v7731_v2  ;;  %2237 = vmatprep.subr.bf16.mxu1 %v7734_v3  ;;  %v7791_v2 = vld [vmem:[%s8966_s2 + $0x48] ss:$12 sps:$4 sm:$0xff]   ;;  %v7797_v3 = vld [vmem:[%s8966_s2 + $0x64] ss:$12 sps:$4 sm:$0xff]  }
 0x164   :  { %2156 = vmatpush1.bf16.msra.mxu0 %v7729_v4  ;;  %2238 = vmatpush1.bf16.msra.mxu1 %v7732_v6  ;;  %v7795_v4 = vld [vmem:[%s8966_s2 + $0x60] ss:$12 sps:$4 sm:$0xff]   ;;  %v7801_v6 = vld [vmem:[%s8966_s2 + $0x7c] ss:$12 sps:$4 sm:$0xff]  }
 0x165   :  { %2157 = vmatprep.subr.bf16.mxu0 %v7737_v7  ;;  %2239 = vmatprep.subr.bf16.mxu1 %v7740_v8  ;;  %v7799_v7 = vld [vmem:[%s8966_s2 + $0x78] ss:$12 sps:$4 sm:$0xff]   ;;  %v7805_v8 = vld [vmem:[%s8966_s2 + $0x94] ss:$12 sps:$4 sm:$0xff]  }
 0x168   :  { %2158 = vmatpush1.bf16.msra.mxu0 %v7735_v10  ;;  %2240 = vmatpush1.bf16.msra.mxu1 %v7738_v11  ;;  %v7803_v10 = vld [vmem:[%s8966_s2 + $0x90] ss:$12 sps:$4 sm:$0xff]  }
 0x169   :  { %2159 = vmatprep.subr.bf16.mxu0 %v7743_v12  ;;  %2241 = vmatprep.subr.bf16.mxu1 %v7746_v13 }
 0x16c   :  { %2160 = vmatpush1.bf16.msra.mxu0 %v7741_v14  ;;  %2242 = vmatpush1.bf16.msra.mxu1 %v7744_v15 }
 0x16d   :  { %7038 = vmatprep.subr.bf16.mxu0 %v7747_v16  ;;  %7060 = vmatprep.subr.bf16.mxu1 %v7748_v17 }
 0x16f   :  { %2162 = vmatmul.mubr.bf16.vlgmr.msra.gmra.mrb[4].mxu0 %v8621_v9  ;;  %2244 = vmatmul.mubr.bf16.vlgmr.msra.gmra.mrb[4].mxu1 %v8621_v9 }
 0x170   :  { %7039 = vmatpush3.bf16.msra.mxu0 %v7749_v18  ;;  %7061 = vmatpush3.bf16.msra.mxu1 %v7750_v19 }
 0x171   :  { %7040 = vmatprep.subr.bf16.mxu0 %v7751_v20  ;;  %7062 = vmatprep.subr.bf16.mxu1 %v7752_v21 }
 0x172   :  { %2284 = vmatprep.mubr.bf16.mxu0 %v8600_v48  ;;  %2324 = vmatprep.mubr.bf16.mxu1 %v8615_v30  ;;  %v7768_v48 = vld [vmem:[#allocation2 + $0x848] ss:$36 sps:$4 sm:$0xff]  }
 0x173   :  { %v7769_v30 = vld [vmem:[#allocation2 + $0x188] ss:$36 sps:$4 sm:$0xff]  }
 0x174   :  { %7041 = vmatpush3.bf16.msra.mxu0 %v7753_v22  ;;  %7063 = vmatpush3.bf16.msra.mxu1 %v7754_v23 }
 0x175   :  { %7042 = vmatprep.subr.bf16.mxu0 %v7755_v24  ;;  %7064 = vmatprep.subr.bf16.mxu1 %v7756_v25 }
 0x178   :  { %7043 = vmatpush3.bf16.msra.mxu0 %v7757_v26  ;;  %7065 = vmatpush3.bf16.msra.mxu1 %v7758_v27 }
 0x179   :  { %7044 = vmatprep.subr.bf16.mxu0 %v7759_v28  ;;  %7066 = vmatprep.subr.bf16.mxu1 %v7760_v29 }
 0x17c   :  { %7045 = vmatpush3.bf16.msra.mxu0 %v7761_v31  ;;  %7067 = vmatpush3.bf16.msra.mxu1 %v7762_v32 }
 0x17d   :  { %7046 = vmatprep.subr.bf16.mxu0 %v7763_v33  ;;  %7068 = vmatprep.subr.bf16.mxu1 %v7764_v34 }
 0x180   :  { %7047 = vmatpush3.bf16.msra.mxu0 %v7765_v35  ;;  %7069 = vmatpush3.bf16.msra.mxu1 %v7766_v36  ;;  %v2337_v35 = vld [vmem:[#allocation10] sm:$0xf]  ;;  %v7782_v36 = vld [vmem:[%s8966_s2 + $0x8] ss:$12 sps:$4 sm:$0xff]  }
 0x181   :  { %7048 = vmatprep.subr.bf16.mxu0 %v7767_v37  ;;  %7070 = vmatprep.subr.bf16.mxu1 %v7768_v48  ;;  %v7786_v37 = vld [vmem:[%s8966_s2 + $0x20] ss:$12 sps:$4 sm:$0xff]   ;;  %v7790_v48 = vld [vmem:[%s8966_s2 + $0x38] ss:$12 sps:$4 sm:$0xff]  }
 0x184   :  { %7049 = vmatpush3.bf16.msra.mxu0 %v7769_v30  ;;  %7071 = vmatpush3.bf16.msra.mxu1 %v7770_v38  ;;  %v7794_v30 = vld [vmem:[%s8966_s2 + $0x50] ss:$12 sps:$4 sm:$0xff]   ;;  %v7798_v38 = vld [vmem:[%s8966_s2 + $0x68] ss:$12 sps:$4 sm:$0xff]  }
 0x185   :  { %7050 = vmatprep.subr.bf16.mxu0 %v7771_v39  ;;  %7072 = vmatprep.subr.bf16.mxu1 %v7772_v40  ;;  %v7802_v39 = vld [vmem:[%s8966_s2 + $0x80] ss:$12 sps:$4 sm:$0xff]   ;;  %v7806_v40 = vld [vmem:[%s8966_s2 + $0x98] ss:$12 sps:$4 sm:$0xff]  }
 0x188   :  { %7051 = vmatpush3.bf16.msra.mxu0 %v7773_v41  ;;  %7073 = vmatpush3.bf16.msra.mxu1 %v7774_v42  ;;  %v7809_v41 = vld [vmem:[%s8966_s2 + $0xac] ss:$12 sps:$4 sm:$0xff]   ;;  %v7807_v42 = vld [vmem:[%s8966_s2 + $0xa8] ss:$12 sps:$4 sm:$0xff]  }
 0x189   :  { %7052 = vmatprep.subr.bf16.mxu0 %v7775_v43  ;;  %7074 = vmatprep.subr.bf16.mxu1 %v7776_v44  ;;  %v7810_v43 = vld [vmem:[%s8966_s2 + $0xb0] ss:$12 sps:$4 sm:$0xff]  }
 0x18c   :  { %7053 = vmatpush3.bf16.msra.mxu0 %v7777_v45  ;;  %7075 = vmatpush3.bf16.msra.mxu1 %v7778_v46 }
 0x18d   :  { %7137 = vmatprep.subr.bf16.mxu0 %v8457_v47  ;;  %2554 = vmatprep.subr.bf16.mxu1 %v7781_v59 }
 0x18f   :  { %2285 = vmatmul.mubr.bf16.vlgmr.msra.gmra.mrb[8].mxu0 %v8604_v5  ;;  %2325 = vmatmul.mubr.bf16.vlgmr.msra.gmra.mrb[8].mxu1 %v8621_v9  ;;  %v2338_v5 = vld [vmem:[%s8972_s8] sm:$0xff] }
 0x190   :  { %7147 = vmatprep.mubr.msk.bf16.mxu0 %vm8458_vm0, %v8457_v47  ;;  %v7779_v9 = vld [vmem:[%s8966_s2] ss:$12 sps:$4 sm:$0xff]   ;;  %2586 = vmatprep.mubr.bf16.mxu1 %v8459_v60  ;;  %s8460_s2 = smov 96  }
 0x191   :  { %2341 = vperm.xlu0 %7257, %v2338_v5   ;;  %2555 = vmatpush1.bf16.msra.mxu1 %v7779_v9 }
 0x192   :  { %2556 = vmatprep.subr.bf16.mxu1 %v7785_v61  ;;  %v6684_v61 = vld [vmem:[%s8972_s8 + $0x28] sm:$0xff] }
 0x195   :  { %2557 = vmatpush1.bf16.msra.mxu1 %v7783_v62  ;;  %v6683_v62 = vld [vmem:[%s8972_s8 + $0x20] sm:$0xff] }
 0x196   :  { %2558 = vmatprep.subr.bf16.mxu1 %v7789_v63 }
 0x199   :  { %2559 = vmatpush1.bf16.msra.mxu1 %v7787_v0 }
 0x19a   :  { %2560 = vmatprep.subr.bf16.mxu1 %v7793_v1 }
 0x19d   :  { %2561 = vmatpush1.bf16.msra.mxu1 %v7791_v2 }
 0x19e   :  { %2562 = vmatprep.subr.bf16.mxu1 %v7797_v3 }
 0x1a1   :  { %2563 = vmatpush1.bf16.msra.mxu1 %v7795_v4 }
 0x1a2   :  { %2564 = vmatprep.subr.bf16.mxu1 %v7801_v6 }
 0x1a5   :  { %2565 = vmatpush1.bf16.msra.mxu1 %v7799_v7 }
 0x1a6   :  { %2566 = vmatprep.subr.bf16.mxu1 %v7805_v8 }
 0x1a9   :  { %2567 = vmatpush1.bf16.msra.mxu1 %v7803_v10 }
 0x1aa   :  { %2568 = vmatprep.subr.bf16.mxu1 %v7809_v41 }
 0x1ad   :  { %2569 = vmatpush1.bf16.msra.mxu1 %v7807_v42 }
 0x1ae   :  { %7171 = vmatprep.subr.bf16.mxu1 %v8457_v47 }
 0x1c2   :  { %v1999_v49 = vpop.f32.mrb[0].mxu0  ;;  %v2081_v50 = vpop.f32.mrb[0].mxu1 }
 0x1c3   :  { %v2001_v51 = vpop.f32.mrb[1].mxu0  ;;  %v2083_v52 = vpop.f32.mrb[1].mxu1 }
 0x1c4   :  { %v2332_v53 = vpack.c.bf16 %v2001_v51, %v1999_v49  ;;  %v2333_v54 = vpack.c.bf16 %v2083_v52, %v2081_v50  ;;  %v2003_v55 = vpop.f32.mrb[2].mxu0  ;;  %v2085_v56 = vpop.f32.mrb[2].mxu1 }
 0x1c5   :  { %v2004_v57 = vpop.f32.mrb[3].mxu0  ;;  %v2086_v58 = vpop.f32.mrb[3].mxu1 }
 0x1c6   :  { %7138 = vmatpush3.bf16.msra.mxu0 %v2332_v53 }
 0x1c7   :  { %7139 = vmatprep.subr.bf16.mxu0 %v8457_v47 }
 0x1ca   :  { %7140 = vmatpush3.bf16.msra.mxu0 %v2333_v54 }
 0x1cb   :  { %7141 = vmatprep.subr.bf16.mxu0 %v8457_v47 }
 0x210   :  { %v2342_v44 = vpop.permute.xlu0 %2341 }
 0x242   :  { %v2163_v11 = vpop.f32.mrb[4].mxu0  ;;  %v2245_v12 = vpop.f32.mrb[4].mxu1 }
 0x243   :  { %v2165_v13 = vpop.f32.mrb[5].mxu0  ;;  %v2247_v14 = vpop.f32.mrb[5].mxu1 }
 0x244   :  { %v2334_v15 = vpack.c.bf16 %v2165_v13, %v2163_v11  ;;  %v2335_v16 = vpack.c.bf16 %v2247_v14, %v2245_v12  ;;  %v2167_v17 = vpop.f32.mrb[6].mxu0  ;;  %v2249_v18 = vpop.f32.mrb[6].mxu1  ;;  %v7811_v13 = vld [vmem:[#allocation10 + $0x30] ss:$12 sps:$4 sm:$0xff]   ;;  %v7812_v14 = vld [vmem:[#allocation4] sm:$0xff]  }
 0x245   :  { %v2168_v19 = vpop.f32.mrb[7].mxu0  ;;  %v2250_v20 = vpop.f32.mrb[7].mxu1 }
 0x246   :  { %7142 = vmatpush3.bf16.msra.mxu0 %v2334_v15  ;;  %v7813_v15 = vld [vmem:[#allocation4 + $0x8] sm:$0xff]  }
 0x247   :  { %7143 = vmatprep.subr.bf16.mxu0 %v8457_v47 }
 0x24a   :  { %7144 = vmatpush3.bf16.msra.mxu0 %v2335_v16 }
 0x24b   :  { %7145 = vmatprep.subr.bf16.mxu0 %v8457_v47 }
 0x262   :  { %v7054_v21 = vpop.f32.mrb[8].mxu0  ;;  %v7076_v22 = vpop.f32.mrb[8].mxu1 }
 0x263   :  { %v7055_v23 = vpop.f32.mrb[9].mxu0  ;;  %v7077_v24 = vpop.f32.mrb[9].mxu1 }
 0x264   :  { %v7056_v25 = vadd.f32 %v7055_v23, %v7054_v21  ;;  %v7078_v26 = vadd.f32 %v7077_v24, %v7076_v22  ;;  %v7057_v27 = vpop.f32.mrb[10].mxu0  ;;  %v7079_v28 = vpop.f32.mrb[10].mxu1 }
 0x265   :  { %v7058_v29 = vpop.f32.mrb[11].mxu0  ;;  %v7080_v31 = vpop.f32.mrb[11].mxu1 }
 0x266   :  { %v2327_v32 = vadd.f32 %v7078_v26, %v7056_v25 }
 0x268   :  { %v2336_v33 = vpack.c.bf16 %v2327_v32, %v2327_v32 }
 0x26a   :  { %v2350_v34 = vsel %vm2348_vm1, %v2336_v33, 0 }
 0x26b   :  { %7146 = vmatpush3.bf16.msra.mxu0 %v2350_v34  ;;  %v6691_v34 = vld [vmem:[%s8972_s8 + $0x48] sm:$0xff] }
 0x26c   :  { %7151 = vmatprep.subr.bf16.mxu0 %v8457_v47 }
 0x26e   :  { %7148 = vmatmul.mubr.msk.bf16.vlgmr.msra.gmra.mrb[12].mxu0 %vm2344_vm2, %v2337_v35  ;;  %v6690_v35 = vld [vmem:[%s8972_s8 + $0x40] sm:$0xff] }
 0x26f   :  { %7152 = vmatpush3.bf16.msra.mxu0 %v7782_v36  ;;  %7167 = vmatprep.mubr.msk.bf16.mxu0 %vm8458_vm0, %v8457_v47  ;;  %v6693_v36 = vld [vmem:[%s8972_s8 + $0x58] sm:$0xff] }
 0x270   :  { %7153 = vmatprep.subr.bf16.mxu0 %v8457_v47 }
 0x273   :  { %7154 = vmatpush3.bf16.msra.mxu0 %v7786_v37  ;;  %v6692_v37 = vld [vmem:[%s8972_s8 + $0x50] sm:$0xff] }
 0x274   :  { %7155 = vmatprep.subr.bf16.mxu0 %v8457_v47 }
 0x277   :  { %7156 = vmatpush3.bf16.msra.mxu0 %v7790_v48  ;;  %v7814_v48 = vld [vmem:[#allocation10 + $0x64] ss:$12 sps:$4 sm:$0xff]  }
 0x278   :  { %7157 = vmatprep.subr.bf16.mxu0 %v8457_v47 }
 0x27b   :  { %7158 = vmatpush3.bf16.msra.mxu0 %v7794_v30 }
 0x27c   :  { %7159 = vmatprep.subr.bf16.mxu0 %v8457_v47 }
 0x27f   :  { %7160 = vmatpush3.bf16.msra.mxu0 %v7798_v38 }
 0x280   :  { %7161 = vmatprep.subr.bf16.mxu0 %v8457_v47 }
 0x283   :  { %7162 = vmatpush3.bf16.msra.mxu0 %v7802_v39 }
 0x284   :  { %7163 = vmatprep.subr.bf16.mxu0 %v8457_v47 }
 0x287   :  { %7164 = vmatpush3.bf16.msra.mxu0 %v7806_v40 }
 0x288   :  { %7165 = vmatprep.subr.bf16.mxu0 %v8457_v47 }
 0x28b   :  { %7166 = vmatpush3.bf16.msra.mxu0 %v7810_v43 }
 0x28c   :  { %7185 = vmatprep.subr.bf16.mxu0 %v8457_v47 }
 0x341   :  { %v2386_v45 = vpop.f32.mrb[12].mxu0 }
 0x342   :  { %v2387_v46 = vadd.f32 %v2386_v45, %v2342_v44  ;;  %v7149_v49 = vpop.f32.mrb[13].mxu0 }
 0x343   :  { %v2389_v50 = vpop.f32.mrb[14].mxu0 }
 0x344   :  { %v2392_v51 = vmax.f32 %v2387_v46, 0.0  ;;  %v7150_v52 = vpop.f32.mrb[15].mxu0 }
 0x346   :  { %v2393_v53 = vpack.c.bf16 %v2392_v51, %v2392_v51 }
 0x348   :  { %2587 = vmatmul.mubr.bf16.vlgmr.msra.gmra.mrb[12].mxu1 %v2393_v53  ;;  %7168 = vmatmul.mubr.bf16.vlgmr.msra.gmra.mrb[16].mxu0 %v2393_v53 }
 0x349   :  { %7181 = vmatprep.mubr.msk.bf16.mxu1 %vm8458_vm0, %v8457_v47  ;;  %7189 = vmatprep.mubr.msk.bf16.mxu0 %vm8458_vm0, %v8457_v47 }
 0x34a   :  { %7186 = vmatpush3.bf16.msra.mxu0 %v7812_v14 }
 0x34b   :  { %7187 = vmatprep.subr.bf16.mxu0 %v8457_v47 }
 0x34e   :  { %7188 = vmatpush3.bf16.msra.mxu0 %v7813_v15  ;;  %v7822_v15 = vld [vmem:[#allocation6 + $0x8] ss:$0 sps:$4 sm:$0xff]  }
 0x41b   :  { %v2588_v54 = vpop.f32.mrb[12].mxu1  ;;  %v2629_v55 = vpop.f32.mrb[16].mxu0 }
 0x41c   :  { %2639 = vrot.lane.b32.xlu1 %v2588_v54, %s8444_s23  ;;  %2636 = vrot.lane.b32.xlu0 %v2588_v54, %s8460_s2  ;;  %v2590_v56 = vpop.f32.mrb[13].mxu1  ;;  %v7169_v57 = vpop.f32.mrb[17].mxu0  ;;  %v2659_v11 = vpack.c.bf16 %v2629_v55, %v2629_v55 }
 0x41d   :  { %v2592_v58 = vpop.f32.mrb[14].mxu1  ;;  %v2632_v5 = vpop.f32.mrb[18].mxu0 }
 0x41e   :  { %v2593_v9 = vpop.f32.mrb[15].mxu1  ;;  %v7170_v59 = vpop.f32.mrb[19].mxu0  ;;  %v2685_v12 = vsel %vm2348_vm1, %v2659_v11, 0  ;;  %v2982_v11 = vld [vmem:[#allocation6] sm:$0xff] }
 0x420   :  { %2642 = vrot.lane.b32.xlu1 %v2588_v54, %s8461_s29  ;;  %2646 = vrot.lane.b32.xlu0 %v2590_v56, %s8460_s2 }
 0x424   :  { %2649 = vrot.lane.b32.xlu1 %v2590_v56, %s8444_s23  ;;  %2652 = vrot.lane.b32.xlu0 %v2590_v56, %s8461_s29 }
 0x428   :  { %2673 = vperm.xlu0 %7257, %v6684_v61   ;;  %2668 = vperm.xlu1 %7258, %v6683_v62  }
 0x48e   :  { %v2640_v63 = vpop.permute.xlu1 %2639  ;;  %v2637_v0 = vpop.permute.xlu0 %2636 }
 0x48f   :  { %v2655_v1 = vpack.c.bf16 %v2637_v0, %v2588_v54 }
 0x491   :  { %7172 = vmatpush3.bf16.msra.mxu1 %v2655_v1 }
 0x492   :  { %v2643_v2 = vpop.permute.xlu1 %2642  ;;  %v2647_v3 = vpop.permute.xlu0 %2646  ;;  %7173 = vmatprep.subr.bf16.mxu1 %v8457_v47 }
 0x493   :  { %v2656_v4 = vpack.c.bf16 %v2643_v2, %v2640_v63  ;;  %v2657_v6 = vpack.c.bf16 %v2647_v3, %v2590_v56 }
 0x495   :  { %7174 = vmatpush3.bf16.msra.mxu1 %v2656_v4 }
 0x496   :  { %7175 = vmatprep.subr.bf16.mxu1 %v8457_v47  ;;  %v2650_v7 = vpop.permute.xlu1 %2649  ;;  %v2653_v8 = vpop.permute.xlu0 %2652 }
 0x497   :  { %v2658_v10 = vpack.c.bf16 %v2653_v8, %v2650_v7  ;;  %v7816_v7 = vld [vmem:[#allocation10 + $0x60] ss:$12 sps:$4 sm:$0xff]   ;;  %v7817_v8 = vld [vmem:[#allocation10 + $0x7c] ss:$12 sps:$4 sm:$0xff]  }
 0x499   :  { %7176 = vmatpush3.bf16.msra.mxu1 %v2657_v6 }
 0x49a   :  { %7177 = vmatprep.subr.bf16.mxu1 %v8457_v47 }
 0x49d   :  { %7178 = vmatpush3.bf16.msra.mxu1 %v2658_v10  ;;  %v7819_v10 = vld [vmem:[#allocation10 + $0x78] ss:$12 sps:$4 sm:$0xff]  }
 0x49e   :  { %7179 = vmatprep.subr.bf16.mxu1 %v8457_v47 }
 0x4a1   :  { %7180 = vmatpush3.bf16.msra.mxu1 %v2685_v12  ;;  %v6705_v12 = vcombine.high %v2982_v11, %v2982_v11 }
 0x4a2   :  { %2906 = vmatprep.subr.bf16.mxu1 %v8459_v60 }
 0x4a3   :  { %6707 = vmatprep.subr.msk.bf16.mxu0 %vm2348_vm1, %v6705_v12 }
 0x4a4   :  { %7182 = vmatmul.mubr.msk.bf16.vlgmr.msra.gmra.mrb[16].mxu1 %vm2344_vm2, %v7811_v13  ;;  %v6704_v13 = vcombine.low %v2982_v11, %v2982_v11 }
 0x4a5   :  { %6698 = vmatprep.mubr.msk.bf16.mxu1 %vm2899_vm4, %v7814_v48 }
 0x4a6   :  { %v3000_v14 = vsel %vm2348_vm1, %v6704_v13, 0 }
 0x4a7   :  { %v2669_v16 = vpop.permute.xlu1 %2668  ;;  %v2674_v20 = vpop.permute.xlu0 %2673 }
 0x577   :  { %v2721_v17 = vpop.f32.mrb[16].mxu1 }
 0x578   :  { %v2722_v18 = vadd.f32 %v2721_v17, %v2669_v16  ;;  %v7183_v19 = vpop.f32.mrb[17].mxu1 }
 0x579   :  { %v2724_v21 = vpop.f32.mrb[18].mxu1 }
 0x57a   :  { %v2725_v22 = vadd.f32 %v2724_v21, %v2674_v20  ;;  %v7184_v23 = vpop.f32.mrb[19].mxu1  ;;  %v2728_v24 = vmax.f32 %v2722_v18, 0.0  ;;  %v2959_v21 = vld [vmem:[%s8973_s9] sm:$0xff] }
 0x57c   :  { %v2729_v25 = vmax.f32 %v2725_v22, 0.0  ;;  %v6700_v22 = vld [vmem:[%s8973_s9 + $0x20] sm:$0xff] }
 0x57e   :  { %v2730_v26 = vpack.c.bf16 %v2729_v25, %v2728_v24  ;;  %v6701_v24 = vld [vmem:[%s8973_s9 + $0x28] sm:$0xff] }
 0x580   :  { %7190 = vmatmul.mubr.msk.bf16.vlgmr.msra.gmra.mrb[20].mxu0 %vm2747_vm3, %v2730_v26 }
 0x581   :  { %3040 = vmatprep.mubr.bf16.mxu0 %v8459_v60  ;;  %3009 = vmatpush1.bf16.msra.mxu0 %v3000_v14 }
 0x582   :  { %7231 = vmatprep.subr.msk.bf16.mxu0 %vm2348_vm1, %v7822_v15 }
 0x653   :  { %v2785_v27 = vpop.f32.mrb[20].mxu0 }
 0x654   :  { %v7191_v28 = vpop.f32.mrb[21].mxu0 }
 0x655   :  { %v2788_v29 = vpop.f32.mrb[22].mxu0  ;;  %v2960_v28 = vld [vmem:[%s8973_s9 + $0x8] sm:$0xff] }
 0x656   :  { %v7192_v31 = vpop.f32.mrb[23].mxu0  ;;  %v7264_v32 = vpack.i.bf16 %v2788_v29, %v2785_v27  ;;  %v2842_v33 = vpack.c.bf16 %v2788_v29, %v2785_v27 }
 0x657   :  { %v2972_v31 = vmul.f32 0.2, %v6700_v22  ;;  %v6712_v22 = vld [vmem:[%s8972_s8 + $0x60] sm:$0xff] }
 0x658   :  { %7265 = vrot.lane.b32.xlu0 %v7264_v32, %s8462_s28  ;;  %7260 = vrot.lane.b32.xlu1 %v7264_v32, %s8463_s4 }
 0x659   :  { %2907 = vmatpush1.bf16.msra.mxu1 %v2842_v33  ;;  %v2973_v33 = vmul.f32 0.2, %v6701_v24  ;;  %v6741_v24 = vld [vmem:[%s8972_s8 + $0x80] sm:$0xff] }
 0x65a   :  { %2908 = vmatprep.subr.bf16.mxu1 %v8459_v60 }
 0x65c   :  { %7275 = vrot.lane.b32.xlu0 %v7264_v32, %s8460_s2  ;;  %7270 = vrot.lane.b32.xlu1 %v7264_v32, %s8464_s13 }
 0x660   :  { %7285 = vrot.lane.b32.xlu0 %v7264_v32, %s8465_s15  ;;  %7280 = vrot.lane.b32.xlu1 %v7264_v32, %s8466_s16 }
 0x664   :  { %7295 = vrot.lane.b32.xlu0 %v7264_v32, %s8444_s23  ;;  %7290 = vrot.lane.b32.xlu1 %v7264_v32, %s8467_s18 }
 0x668   :  { %2868 = vperm.xlu0 %7257, %v6691_v34   ;;  %2863 = vperm.xlu1 %7258, %v6690_v35  }
 0x66c   :  { %2878 = vperm.xlu0 %7257, %v6693_v36   ;;  %2873 = vperm.xlu1 %7258, %v6692_v37  }
 0x6ca   :  { %v7266_v30 = vpop.permute.xlu0 %7265  ;;  %v7261_v38 = vpop.permute.xlu1 %7260 }
 0x6cb   :  { %v7263_v39 = vunpack.i.h.bf16 %v7261_v38  ;;  %v7262_v40 = vunpack.i.l.bf16 %v7261_v38  ;;  %v7268_v41 = vunpack.i.h.bf16 %v7266_v30  ;;  %v7267_v42 = vunpack.i.l.bf16 %v7266_v30 }
 0x6cd   :  { %v2843_v43 = vpack.c.bf16 %v7263_v39, %v7262_v40  ;;  %v2844_v45 = vpack.c.bf16 %v7268_v41, %v7267_v42  ;;  %v2961_v40 = vld [vmem:[%s8973_s9 + $0x10] sm:$0xff] }
 0x6ce   :  { %v7271_v44 = vpop.permute.xlu1 %7270  ;;  %v7276_v50 = vpop.permute.xlu0 %7275  ;;  %v6702_v41 = vld [vmem:[%s8973_s9 + $0x30] sm:$0xff] }
 0x6cf   :  { %2909 = vmatpush1.bf16.msra.mxu1 %v2843_v43  ;;  %v7273_v46 = vunpack.i.h.bf16 %v7271_v44  ;;  %v7272_v49 = vunpack.i.l.bf16 %v7271_v44  ;;  %v7278_v51 = vunpack.i.h.bf16 %v7276_v50  ;;  %v7277_v52 = vunpack.i.l.bf16 %v7276_v50  ;;  %v6703_v43 = vld [vmem:[%s8973_s9 + $0x38] sm:$0xff] }
 0x6d0   :  { %2910 = vmatprep.subr.bf16.mxu1 %v8459_v60  ;;  %v3006_v50 = vsel %vm2348_vm1, %v7822_v15, 0 }
 0x6d1   :  { %v2845_v53 = vpack.c.bf16 %v7273_v46, %v7272_v49  ;;  %v2846_v55 = vpack.c.bf16 %v7278_v51, %v7277_v52  ;;  %v2962_v51 = vld [vmem:[%s8973_s9 + $0x18] sm:$0xff] }
 0x6d2   :  { %v7281_v54 = vpop.permute.xlu1 %7280  ;;  %v7286_v58 = vpop.permute.xlu0 %7285 }
 0x6d3   :  { %2911 = vmatpush1.bf16.msra.mxu1 %v2844_v45  ;;  %v7283_v56 = vunpack.i.h.bf16 %v7281_v54  ;;  %v7282_v57 = vunpack.i.l.bf16 %v7281_v54  ;;  %v7288_v5 = vunpack.i.h.bf16 %v7286_v58  ;;  %v7287_v9 = vunpack.i.l.bf16 %v7286_v58 }
 0x6d4   :  { %2912 = vmatprep.subr.bf16.mxu1 %v8459_v60 }
 0x6d5   :  { %v2847_v59 = vpack.c.bf16 %v7283_v56, %v7282_v57  ;;  %v2848_v62 = vpack.c.bf16 %v7288_v5, %v7287_v9 }
 0x6d6   :  { %v7291_v61 = vpop.permute.xlu1 %7290  ;;  %v7296_v1 = vpop.permute.xlu0 %7295 }
 0x6d7   :  { %2913 = vmatpush1.bf16.msra.mxu1 %v2845_v53  ;;  %v7293_v63 = vunpack.i.h.bf16 %v7291_v61  ;;  %v7292_v0 = vunpack.i.l.bf16 %v7291_v61  ;;  %v7298_v2 = vunpack.i.h.bf16 %v7296_v1  ;;  %v7297_v3 = vunpack.i.l.bf16 %v7296_v1 }
 0x6d8   :  { %2914 = vmatprep.subr.bf16.mxu1 %v8459_v60  ;;  %v2974_v53 = vmul.f32 0.2, %v6702_v41 }
 0x6d9   :  { %v2849_v4 = vpack.c.bf16 %v7293_v63, %v7292_v0  ;;  %v2850_v6 = vpack.c.bf16 %v7298_v2, %v7297_v3 }
 0x6db   :  { %2915 = vmatpush1.bf16.msra.mxu1 %v2846_v55  ;;  %v2975_v55 = vmul.f32 0.2, %v6703_v43 }
 0x6dc   :  { %2916 = vmatprep.subr.bf16.mxu1 %v8459_v60 }
 0x6df   :  { %2917 = vmatpush1.bf16.msra.mxu1 %v2847_v59 }
 0x6e0   :  { %2918 = vmatprep.subr.bf16.mxu1 %v8459_v60 }
 0x6e3   :  { %2919 = vmatpush1.bf16.msra.mxu1 %v2848_v62 }
 0x6e4   :  { %2920 = vmatprep.subr.bf16.mxu1 %v8459_v60 }
 0x6e7   :  { %2921 = vmatpush1.bf16.msra.mxu1 %v2849_v4  ;;  %v2864_v16 = vpop.permute.xlu1 %2863  ;;  %v2869_v20 = vpop.permute.xlu0 %2868 }
 0x6e8   :  { %2922 = vmatprep.subr.bf16.mxu1 %v8459_v60 }
 0x6eb   :  { %2923 = vmatpush1.bf16.msra.mxu1 %v2850_v6  ;;  %v2874_v35 = vpop.permute.xlu1 %2873  ;;  %v2879_v39 = vpop.permute.xlu0 %2878 }
 0x6ec   :  { %7199 = vmatprep.subr.bf16.mxu1 %v8457_v47 }
 0x6ee   :  { %2939 = vmatmul.mubr.bf16.vlgmr.msra.gmra.mrb[20].mxu1 %v7816_v7 }
 0x6ef   :  { %6699 = vmatprep.mubr.msk.bf16.mxu1 %vm2899_vm4, %v7817_v8 }
 0x6f6   :  { %2947 = vmatmul.mubr.bf16.gmra.mrb[24].mxu1 %v7819_v10 }
 0x6f7   :  { %7203 = vmatprep.mubr.msk.bf16.mxu1 %vm8458_vm0, %v8457_v47 }
 0x7c1   :  { %v2940_v17 = vpop.f32.mrb[20].mxu1 }
 0x7c2   :  { %v2941_v18 = vadd.f32 %v2940_v17, %v2864_v16  ;;  %v2942_v19 = vpop.f32.mrb[21].mxu1 }
 0x7c3   :  { %v2943_v23 = vpop.f32.mrb[22].mxu1  ;;  %v7825_v19 = vld [vmem:[#allocation10 + $0x94] ss:$12 sps:$4 sm:$0xff]  }
 0x7c4   :  { %v2955_v25 = vmax.f32 %v2941_v18, 0.0  ;;  %v2944_v26 = vadd.f32 %v2943_v23, %v2869_v20  ;;  %v2945_v27 = vpop.f32.mrb[23].mxu1  ;;  %v7826_v20 = vld [vmem:[#allocation10 + $0x98] ss:$12 sps:$4 sm:$0xff]  }
 0x7c5   :  { %v7033_v23 = vld [vmem:[%s8972_s8 + $0xa0] sm:$0xff] }
 0x7c6   :  { %v2963_v29 = vmul.f32 %v2959_v21, %v2955_v25  ;;  %v2956_v32 = vmax.f32 %v2944_v26, 0.0  ;;  %v6713_v21 = vld [vmem:[%s8972_s8 + $0x68] sm:$0xff] }
 0x7c8   :  { %v2964_v34 = vmul.f32 %v2960_v28, %v2956_v32  ;;  %v2976_v37 = vadd.f32 %v2972_v31, %v2963_v29 }
 0x7c9   :  { %v2948_v36 = vpop.f32.mrb[24].mxu1 }
 0x7ca   :  { %v2977_v48 = vadd.f32 %v2973_v33, %v2964_v34  ;;  %v2949_v30 = vadd.f32 %v2948_v36, %v2874_v35  ;;  %v2950_v38 = vpop.f32.mrb[25].mxu1 }
 0x7cb   :  { %v2951_v42 = vpop.f32.mrb[26].mxu1 }
 0x7cc   :  { %v2980_v44 = vpack.c.bf16 %v2977_v48, %v2976_v37  ;;  %v2957_v45 = vmax.f32 %v2949_v30, 0.0  ;;  %v2952_v46 = vadd.f32 %v2951_v42, %v2879_v39  ;;  %v2953_v49 = vpop.f32.mrb[27].mxu1 }
 0x7ce   :  { %v2965_v52 = vmul.f32 %v2961_v40, %v2957_v45  ;;  %v2958_v54 = vmax.f32 %v2952_v46, 0.0  ;;  %6708 = vmatmul.mubr.msk.bf16.vlgmr.msra.gmra.mrb[24].mxu0 %vm2992_vm5, %v2980_v44 }
 0x7cf   :  { %3050 = vmatprep.mubr.bf16.mxu0 %v8459_v60  ;;  %7194 = vmatpush3.bf16.msra.mxu0 %v3006_v50 }
 0x7d0   :  { %v2966_v56 = vmul.f32 %v2962_v51, %v2958_v54  ;;  %v2978_v57 = vadd.f32 %v2974_v53, %v2965_v52 }
 0x7d2   :  { %v2979_v58 = vadd.f32 %v2975_v55, %v2966_v56 }
 0x7d4   :  { %v2981_v5 = vpack.c.bf16 %v2979_v58, %v2978_v57 }
 0x7d6   :  { %6709 = vmatmul.mubr.msk.bf16.gmra.mrb[28].mxu0 %vm2992_vm5, %v2981_v5 }
 0x7d7   :  { %7195 = vmatprep.mubr.msk.bf16.mxu0 %vm2992_vm5, %v2980_v44 }
 0x7de   :  { %7196 = vmatmul.mubr.msk.bf16.vlgmr.msra.gmra.mrb[32].mxu0 %vm2992_vm5, %v2981_v5 }
 0x7df   :  { %3276 = vmatprep.mubr.bf16.mxu0 %v7825_v19  ;;  %v7830_v19 = vld [vmem:[#allocation7 + $0x10] ss:$36 sps:$4 sm:$0xff]  }
 0x8a1   :  { %v3042_v9 = vpop.f32.mrb[24].mxu0 }
 0x8a2   :  { %v3044_v59 = vpop.f32.mrb[25].mxu0 }
 0x8a3   :  { %v3046_v61 = vpop.f32.mrb[26].mxu0 }
 0x8a4   :  { %v3190_v62 = vpack.c.bf16 %v3046_v61, %v3042_v9  ;;  %v3048_v63 = vpop.f32.mrb[27].mxu0  ;;  %v7299_v0 = vpack.i.bf16 %v3046_v61, %v3042_v9 }
 0x8a5   :  { %v7304_v1 = vpack.i.bf16 %v3048_v63, %v3044_v59  ;;  %v3198_v2 = vpack.c.bf16 %v3048_v63, %v3044_v59 }
 0x8a6   :  { %7300 = vrot.lane.b32.xlu0 %v7299_v0, %s8460_s2 }
 0x8a7   :  { %7305 = vrot.lane.b32.xlu1 %v7304_v1, %s8460_s2  ;;  %7109 = vmatprep.subr.bf16.mxu0 %v3198_v2 }
 0x8a8   :  { %7110 = vmatpush3.bf16.msra.mxu0 %v3190_v62 }
 0x8a9   :  { %v3052_v3 = vpop.f32.mrb[28].mxu0 }
 0x8aa   :  { %v3054_v4 = vpop.f32.mrb[29].mxu0 }
 0x8ab   :  { %v3056_v6 = vpop.f32.mrb[30].mxu0 }
 0x8ac   :  { %v3191_v7 = vpack.c.bf16 %v3056_v6, %v3052_v3  ;;  %v3058_v8 = vpop.f32.mrb[31].mxu0  ;;  %v7309_v10 = vpack.i.bf16 %v3056_v6, %v3052_v3 }
 0x8ad   :  { %v7314_v11 = vpack.i.bf16 %v3058_v8, %v3054_v4  ;;  %v3199_v12 = vpack.c.bf16 %v3058_v8, %v3054_v4 }
 0x8ae   :  { %7310 = vrot.lane.b32.xlu0 %v7309_v10, %s8460_s2 }
 0x8af   :  { %7315 = vrot.lane.b32.xlu1 %v7314_v11, %s8460_s2  ;;  %7111 = vmatprep.subr.bf16.mxu0 %v3199_v12 }
 0x8b0   :  { %7112 = vmatpush3.bf16.msra.mxu0 %v3191_v7 }
 0x8b1   :  { %v7197_v13 = vpop.f32.mrb[32].mxu0 }
 0x8b2   :  { %7325 = vrot.lane.b32.xlu0 %v7299_v0, %s8444_s23  ;;  %v3095_v14 = vpop.f32.mrb[33].mxu0 }
 0x8b3   :  { %7320 = vrot.lane.b32.xlu1 %v7304_v1, %s8444_s23  ;;  %v7198_v15 = vpop.f32.mrb[34].mxu0 }
 0x8b4   :  { %v3207_v16 = vpack.c.bf16 %v7198_v15, %v7197_v13  ;;  %v3098_v17 = vpop.f32.mrb[35].mxu0  ;;  %v7829_v15 = vld [vmem:[#allocation7 + $0x4] ss:$36 sps:$4 sm:$0xff]  }
 0x8b5   :  { %v3206_v18 = vpack.c.bf16 %v3098_v17, %v3095_v14 }
 0x8b6   :  { %7330 = vrot.lane.b32.xlu0 %v7309_v10, %s8444_s23 }
 0x8b7   :  { %7335 = vrot.lane.b32.xlu1 %v7314_v11, %s8444_s23  ;;  %7200 = vmatpush3.bf16.msra.mxu1 %v3206_v18  ;;  %v7827_v18 = vld [vmem:[#allocation7] ss:$36 sps:$4 sm:$0xff]  }
 0x8b8   :  { %7201 = vmatprep.subr.bf16.mxu1 %v8457_v47 }
 0x8ba   :  { %7345 = vrot.lane.b32.xlu0 %v7299_v0, %s8461_s29 }
 0x8bb   :  { %7340 = vrot.lane.b32.xlu1 %v7304_v1, %s8461_s29  ;;  %7202 = vmatpush3.bf16.msra.mxu1 %v3207_v16  ;;  %v7832_v16 = vld [vmem:[#allocation7 + $0x14] ss:$36 sps:$4 sm:$0xff]  }
 0x8bc   :  { %3444 = vmatprep.subr.bf16.mxu1 %v7829_v15 }
 0x8be   :  { %7355 = vrot.lane.b32.xlu0 %v7309_v10, %s8461_s29  ;;  %7204 = vmatmul.mubr.msk.bf16.vlgmr.msra.gmra.mrb[28].mxu1 %vm2747_vm3, %v7826_v20  ;;  %v7835_v20 = vld [vmem:[#allocation7 + $0x4c] ss:$36 sps:$4 sm:$0xff]  }
 0x8bf   :  { %7350 = vrot.lane.b32.xlu1 %v7314_v11, %s8461_s29  ;;  %3476 = vmatprep.mubr.bf16.mxu1 %v8459_v60  ;;  %v7823_v11 = vld [vmem:[#allocation10 + $0x90] ss:$12 sps:$4 sm:$0xff]  }
 0x8c0   :  { %3445 = vmatpush1.bf16.msra.mxu1 %v7827_v18 }
 0x8c1   :  { %3446 = vmatprep.subr.bf16.mxu1 %v7835_v20 }
 0x8c2   :  { %3223 = vperm.xlu0 %7257, %v6713_v21   ;;  %v7838_v21 = vld [vmem:[#allocation7 + $0x5c] ss:$36 sps:$4 sm:$0xff]  }
 0x8c3   :  { %3218 = vperm.xlu1 %7258, %v6712_v22   ;;  %v7833_v22 = vld [vmem:[#allocation7 + $0x48] ss:$36 sps:$4 sm:$0xff]  }
 0x8c4   :  { %3447 = vmatpush1.bf16.msra.mxu1 %v7833_v22 }
 0x8c6   :  { %6218 = vperm.xlu0 %7257, %v7033_v23   ;;  %v7836_v23 = vld [vmem:[#allocation7 + $0x58] ss:$36 sps:$4 sm:$0xff]  }
 0x8c7   :  { %3672 = vperm.xlu1 %7258, %v6741_v24   ;;  %v7841_v24 = vld [vmem:[#allocation7 + $0xc] ss:$36 sps:$4 sm:$0xff]  }
 0x8c8   :  { %3487 = vmatprep.subr.bf16.mxu1 %v7841_v24 }
 0x918   :  { %v7301_v25 = vpop.permute.xlu0 %7300 }
 0x919   :  { %v7303_v26 = vunpack.i.h.bf16 %v7301_v25  ;;  %v7302_v27 = vunpack.i.l.bf16 %v7301_v25  ;;  %v7306_v28 = vpop.permute.xlu1 %7305 }
 0x91a   :  { %v7308_v29 = vunpack.i.h.bf16 %v7306_v28  ;;  %v7307_v31 = vunpack.i.l.bf16 %v7306_v28 }
 0x91b   :  { %v3192_v33 = vpack.c.bf16 %v7303_v26, %v7302_v27 }
 0x91c   :  { %v3200_v32 = vpack.c.bf16 %v7308_v29, %v7307_v31 }
 0x91e   :  { %7113 = vmatprep.subr.bf16.mxu0 %v3200_v32 }
 0x91f   :  { %7114 = vmatpush3.bf16.msra.mxu0 %v3192_v33 }
 0x920   :  { %v7311_v34 = vpop.permute.xlu0 %7310 }
 0x921   :  { %v7313_v35 = vunpack.i.h.bf16 %v7311_v34  ;;  %v7312_v36 = vunpack.i.l.bf16 %v7311_v34  ;;  %v7316_v37 = vpop.permute.xlu1 %7315 }
 0x922   :  { %v7318_v48 = vunpack.i.h.bf16 %v7316_v37  ;;  %v7317_v30 = vunpack.i.l.bf16 %v7316_v37 }
 0x923   :  { %v3193_v40 = vpack.c.bf16 %v7313_v35, %v7312_v36 }
 0x924   :  { %v3201_v38 = vpack.c.bf16 %v7318_v48, %v7317_v30  ;;  %v7326_v39 = vpop.permute.xlu0 %7325 }
 0x925   :  { %v7328_v41 = vunpack.i.h.bf16 %v7326_v39  ;;  %v7327_v42 = vunpack.i.l.bf16 %v7326_v39  ;;  %v7321_v43 = vpop.permute.xlu1 %7320  ;;  %v7842_v39 = vld [vmem:[#allocation7 + $0x20] ss:$36 sps:$4 sm:$0xff]  }
 0x926   :  { %v7323_v44 = vunpack.i.h.bf16 %v7321_v43  ;;  %v7322_v45 = vunpack.i.l.bf16 %v7321_v43  ;;  %7115 = vmatprep.subr.bf16.mxu0 %v3201_v38  ;;  %v7839_v38 = vld [vmem:[#allocation7 + $0x8] ss:$36 sps:$4 sm:$0xff]  }
 0x927   :  { %7116 = vmatpush3.bf16.msra.mxu0 %v3193_v40  ;;  %v3194_v50 = vpack.c.bf16 %v7328_v41, %v7327_v42  ;;  %v7845_v41 = vld [vmem:[#allocation7 + $0x54] ss:$36 sps:$4 sm:$0xff]   ;;  %v7846_v43 = vld [vmem:[#allocation7 + $0x68] ss:$36 sps:$4 sm:$0xff]  }
 0x928   :  { %v3202_v46 = vpack.c.bf16 %v7323_v44, %v7322_v45  ;;  %v7331_v49 = vpop.permute.xlu0 %7330  ;;  %v7843_v42 = vld [vmem:[#allocation7 + $0x50] ss:$36 sps:$4 sm:$0xff]   ;;  %v7849_v44 = vld [vmem:[#allocation7 + $0x1c] ss:$36 sps:$4 sm:$0xff]  }
 0x929   :  { %v7333_v51 = vunpack.i.h.bf16 %v7331_v49  ;;  %v7332_v52 = vunpack.i.l.bf16 %v7331_v49  ;;  %v7336_v53 = vpop.permute.xlu1 %7335  ;;  %v7847_v45 = vld [vmem:[#allocation7 + $0x18] ss:$36 sps:$4 sm:$0xff]   ;;  %v7850_v49 = vld [vmem:[#allocation7 + $0x60] ss:$36 sps:$4 sm:$0xff]  }
 0x92a   :  { %v7338_v54 = vunpack.i.h.bf16 %v7336_v53  ;;  %v7337_v55 = vunpack.i.l.bf16 %v7336_v53  ;;  %7117 = vmatprep.subr.bf16.mxu0 %v3202_v46  ;;  %v7852_v46 = vld [vmem:[#allocation7 + $0x64] ss:$36 sps:$4 sm:$0xff]  }
 0x92b   :  { %7118 = vmatpush3.bf16.msra.mxu0 %v3194_v50  ;;  %v3195_v58 = vpack.c.bf16 %v7333_v51, %v7332_v52  ;;  %v7855_v51 = vld [vmem:[#allocation9] ss:$144 sps:$4 sm:$0xff]   ;;  %v7857_v52 = vld [vmem:[#allocation9 + $0x4] ss:$144 sps:$4 sm:$0xff]  }
 0x92c   :  { %v3203_v56 = vpack.c.bf16 %v7338_v54, %v7337_v55  ;;  %v7346_v57 = vpop.permute.xlu0 %7345  ;;  %v7863_v53 = vld [vmem:[#allocation9 + $0x124] ss:$144 sps:$4 sm:$0xff]   ;;  %v7861_v54 = vld [vmem:[#allocation9 + $0x120] ss:$144 sps:$4 sm:$0xff]  }
 0x92d   :  { %v7348_v5 = vunpack.i.h.bf16 %v7346_v57  ;;  %v7347_v9 = vunpack.i.l.bf16 %v7346_v57  ;;  %v7341_v59 = vpop.permute.xlu1 %7340  ;;  %v7869_v55 = vld [vmem:[#allocation9 + $0x244] ss:$144 sps:$4 sm:$0xff]  }
 0x92e   :  { %v7343_v61 = vunpack.i.h.bf16 %v7341_v59  ;;  %v7342_v62 = vunpack.i.l.bf16 %v7341_v59  ;;  %7119 = vmatprep.subr.bf16.mxu0 %v3203_v56  ;;  %v7867_v56 = vld [vmem:[#allocation9 + $0x240] ss:$144 sps:$4 sm:$0xff]   ;;  %v7875_v57 = vld [vmem:[#allocation9 + $0x364] ss:$144 sps:$4 sm:$0xff]  }
 0x92f   :  { %7120 = vmatpush3.bf16.msra.mxu0 %v3195_v58  ;;  %v3196_v1 = vpack.c.bf16 %v7348_v5, %v7347_v9  ;;  %v7873_v58 = vld [vmem:[#allocation9 + $0x360] ss:$144 sps:$4 sm:$0xff]   ;;  %v7881_v5 = vld [vmem:[#allocation9 + $0x484] ss:$144 sps:$4 sm:$0xff]  }
 0x930   :  { %v3204_v63 = vpack.c.bf16 %v7343_v61, %v7342_v62  ;;  %v7356_v0 = vpop.permute.xlu0 %7355  ;;  %v7879_v9 = vld [vmem:[#allocation9 + $0x480] ss:$144 sps:$4 sm:$0xff]   ;;  %v7887_v59 = vld [vmem:[#allocation9 + $0x5a4] ss:$144 sps:$4 sm:$0xff]  }
 0x931   :  { %v7358_v2 = vunpack.i.h.bf16 %v7356_v0  ;;  %v7357_v3 = vunpack.i.l.bf16 %v7356_v0  ;;  %v7351_v4 = vpop.permute.xlu1 %7350  ;;  %v7885_v61 = vld [vmem:[#allocation9 + $0x5a0] ss:$144 sps:$4 sm:$0xff]   ;;  %v7893_v62 = vld [vmem:[#allocation9 + $0x6c4] ss:$144 sps:$4 sm:$0xff]  }
 0x932   :  { %v7353_v6 = vunpack.i.h.bf16 %v7351_v4  ;;  %v7352_v7 = vunpack.i.l.bf16 %v7351_v4  ;;  %7121 = vmatprep.subr.bf16.mxu0 %v3204_v63  ;;  %v7891_v63 = vld [vmem:[#allocation9 + $0x6c0] ss:$144 sps:$4 sm:$0xff]  }
 0x933   :  { %7122 = vmatpush3.bf16.msra.mxu0 %v3196_v1  ;;  %v3197_v10 = vpack.c.bf16 %v7358_v2, %v7357_v3 }
 0x934   :  { %v3205_v8 = vpack.c.bf16 %v7353_v6, %v7352_v7 }
 0x936   :  { %7123 = vmatprep.subr.bf16.mxu0 %v3205_v8 }
 0x937   :  { %7124 = vmatpush3.bf16.msra.mxu0 %v3197_v10 }
 0x938   :  { %3530 = vmatprep.subr.bf16.mxu0 %v7832_v16 }
 0x93a   :  { %3277 = vmatmul.mubr.bf16.vlgmr.msra.gmra.mrb[36].mxu0 %v7823_v11 }
 0x93b   :  { %3562 = vmatprep.mubr.bf16.mxu0 %v8459_v60  ;;  %3531 = vmatpush1.bf16.msra.mxu0 %v7830_v19 }
 0x93c   :  { %3532 = vmatprep.subr.bf16.mxu0 %v7838_v21 }
 0x93f   :  { %3533 = vmatpush1.bf16.msra.mxu0 %v7836_v23 }
 0x940   :  { %7207 = vmatprep.subr.bf16.mxu0 %v8457_v47 }
 0x941   :  { %v3224_v34 = vpop.permute.xlu0 %3223 }
 0x942   :  { %v3219_v29 = vpop.permute.xlu1 %3218 }
 0x991   :  { %v3319_v12 = vpop.f32.mrb[28].mxu1 }
 0x992   :  { %v7205_v13 = vpop.f32.mrb[29].mxu1 }
 0x993   :  { %v3322_v14 = vpop.f32.mrb[30].mxu1 }
 0x994   :  { %v7206_v17 = vpop.f32.mrb[31].mxu1 }
 0xa0d   :  { %v7125_v25 = vpop.f32.mrb[36].mxu0 }
 0xa0e   :  { %v7126_v26 = vpop.f32.mrb[37].mxu0 }
 0xa0f   :  { %v7127_v27 = vadd.f32 %v7126_v26, %v7125_v25  ;;  %v7128_v28 = vpop.f32.mrb[38].mxu0 }
 0xa10   :  { %v7129_v31 = vpop.f32.mrb[39].mxu0 }
 0xa11   :  { %v3279_v32 = vadd.f32 %v7127_v27, %v3219_v29  ;;  %v7130_v33 = vadd.f32 %v7129_v31, %v7128_v28 }
 0xa13   :  { %v3320_v35 = vadd.f32 %v3319_v12, %v3279_v32  ;;  %v3282_v36 = vadd.f32 %v7130_v33, %v3224_v34  ;;  %v7860_v32 = vld [vmem:[#allocation9 + $0x14] ss:$144 sps:$4 sm:$0xff]   ;;  %v7858_v34 = vld [vmem:[#allocation9 + $0x10] ss:$144 sps:$4 sm:$0xff]  }
 0xa15   :  { %v3323_v37 = vadd.f32 %v3322_v14, %v3282_v36  ;;  %v3326_v48 = vmax.f32 %v3320_v35, 0.0  ;;  %v7866_v35 = vld [vmem:[#allocation9 + $0x134] ss:$144 sps:$4 sm:$0xff]   ;;  %v7864_v36 = vld [vmem:[#allocation9 + $0x130] ss:$144 sps:$4 sm:$0xff]  }
 0xa17   :  { %v3327_v30 = vmax.f32 %v3323_v37, 0.0  ;;  %v7872_v37 = vld [vmem:[#allocation9 + $0x254] ss:$144 sps:$4 sm:$0xff]  }
 0xa19   :  { %v3328_v40 = vpack.c.bf16 %v3327_v30, %v3326_v48  ;;  %v7870_v48 = vld [vmem:[#allocation9 + $0x250] ss:$144 sps:$4 sm:$0xff]   ;;  %v7878_v30 = vld [vmem:[#allocation9 + $0x374] ss:$144 sps:$4 sm:$0xff]  }
 0xa1b   :  { %6736 = vmatmul.mubr.msk.bf16.vlgmr.msra.gmra.mrb[32].mxu1 %vm2747_vm3, %v3328_v40  ;;  %6738 = vmatmul.mubr.msk.bf16.vlgmr.msra.gmra.mrb[40].mxu0 %vm2747_vm3, %v3328_v40 }
 0xa1c   :  { %3488 = vmatpush1.bf16.msra.mxu1 %v7839_v38  ;;  %7208 = vmatpush3.bf16.msra.mxu0 %v7842_v39  ;;  %v7876_v38 = vld [vmem:[#allocation9 + $0x370] ss:$144 sps:$4 sm:$0xff]   ;;  %v7884_v39 = vld [vmem:[#allocation9 + $0x494] ss:$144 sps:$4 sm:$0xff]  }
 0xa1d   :  { %3489 = vmatprep.subr.bf16.mxu1 %v7845_v41  ;;  %7209 = vmatprep.subr.bf16.mxu0 %v8457_v47  ;;  %v7890_v41 = vld [vmem:[#allocation9 + $0x5b4] ss:$144 sps:$4 sm:$0xff]  }
 0xa1e   :  { %3519 = vmatprep.mubr.bf16.mxu1 %v8459_v60  ;;  %7211 = vmatprep.mubr.msk.bf16.mxu0 %vm8458_vm0, %v8457_v47  ;;  %v8863_v47 = vld [vmem:[#allocation10 + $0xc0] sm:$0xff] }
 0xa1f   :  { %v6743_v50 = vcombine.high %v8863_v47, %v8863_v47  ;;  %v6742_v33 = vcombine.low %v8863_v47, %v8863_v47  ;;  %v7900_v47 = vld [vmem:[#allocation9 + $0x7f0] ss:$144 sps:$4 sm:$0xff]  }
 0xa20   :  { %3490 = vmatpush1.bf16.msra.mxu1 %v7843_v42  ;;  %7210 = vmatpush3.bf16.msra.mxu0 %v7846_v43  ;;  %v7888_v42 = vld [vmem:[#allocation9 + $0x5b0] ss:$144 sps:$4 sm:$0xff]   ;;  %v7896_v43 = vld [vmem:[#allocation9 + $0x6d4] ss:$144 sps:$4 sm:$0xff]  }
 0xa21   :  { %3573 = vmatprep.subr.bf16.mxu1 %v7849_v44  ;;  %5454 = vmatprep.subr.bf16.mxu0 %v7857_v52  ;;  %v7894_v44 = vld [vmem:[#allocation9 + $0x6d0] ss:$144 sps:$4 sm:$0xff]   ;;  %v3673_v52 = vpop.permute.xlu1 %3672 }
 0xa23   :  { %6737 = vmatmul.mubr.msk.bf16.vlgmr.msra.gmra.mrb[36].mxu1 %vm2747_vm3, %v3328_v40  ;;  %7212 = vmatmul.mubr.msk.bf16.vlgmr.msra.gmra.mrb[44].mxu0 %vm2747_vm3, %v3328_v40 }
 0xa24   :  { %3574 = vmatpush1.bf16.msra.mxu1 %v7847_v45  ;;  %3605 = vmatprep.mubr.bf16.mxu1 %v8459_v60  ;;  %v7899_v45 = vld [vmem:[#allocation9 + $0x7e4] ss:$144 sps:$4 sm:$0xff]  }
 0xa25   :  { %3575 = vmatprep.subr.bf16.mxu1 %v7852_v46  ;;  %5486 = vmatprep.mubr.bf16.mxu0 %v8459_v60  ;;  %v7902_v46 = vld [vmem:[#allocation9 + $0x7f4] ss:$144 sps:$4 sm:$0xff]  }
 0xa26   :  { %5455 = vmatpush1.bf16.msra.mxu0 %v7855_v51  ;;  %v7908_v51 = vld [vmem:[#allocation9 + $0x24] ss:$144 sps:$4 sm:$0xff]  }
 0xa27   :  { %5456 = vmatprep.subr.bf16.mxu0 %v7863_v53 }
 0xa28   :  { %3576 = vmatpush1.bf16.msra.mxu1 %v7850_v49  ;;  %v7897_v49 = vld [vmem:[#allocation9 + $0x7e0] ss:$144 sps:$4 sm:$0xff]  }
 0xa29   :  { %3684 = vmatprep.subr.bf16.mxu1 %v8459_v60 }
 0xa2a   :  { %5457 = vmatpush1.bf16.msra.mxu0 %v7861_v54 }
 0xa2b   :  { %6739 = vmatmul.mubr.msk.bf16.vlgmr.msra.gmra.mrb[40].mxu1 %vm2747_vm3, %v3328_v40  ;;  %5458 = vmatprep.subr.bf16.mxu0 %v7869_v55  ;;  %v7882_v40 = vld [vmem:[#allocation9 + $0x490] ss:$144 sps:$4 sm:$0xff]  }
 0xa2c   :  { %6744 = vmatprep.mubr.msk.bf16.mxu1 %vm2899_vm4, %v6743_v50  ;;  %v7905_v50 = vld [vmem:[#allocation9 + $0xc] ss:$144 sps:$4 sm:$0xff]  }
 0xa2e   :  { %5459 = vmatpush1.bf16.msra.mxu0 %v7867_v56 }
 0xa2f   :  { %5460 = vmatprep.subr.bf16.mxu0 %v7875_v57 }
 0xa32   :  { %5461 = vmatpush1.bf16.msra.mxu0 %v7873_v58 }
 0xa33   :  { %5462 = vmatprep.subr.bf16.mxu0 %v7881_v5  ;;  %v7903_v5 = vld [vmem:[#allocation9 + $0x8] ss:$144 sps:$4 sm:$0xff]  }
 0xa36   :  { %5463 = vmatpush1.bf16.msra.mxu0 %v7879_v9  ;;  %v7906_v9 = vld [vmem:[#allocation9 + $0x20] ss:$144 sps:$4 sm:$0xff]  }
 0xa37   :  { %5464 = vmatprep.subr.bf16.mxu0 %v7887_v59 }
 0xa3a   :  { %5465 = vmatpush1.bf16.msra.mxu0 %v7885_v61  ;;  %v7911_v61 = vld [vmem:[#allocation9 + $0x12c] ss:$144 sps:$4 sm:$0xff]  }
 0xa3b   :  { %5466 = vmatprep.subr.bf16.mxu0 %v7893_v62  ;;  %v7914_v62 = vld [vmem:[#allocation9 + $0x144] ss:$144 sps:$4 sm:$0xff]  }
 0xa3e   :  { %5467 = vmatpush1.bf16.msra.mxu0 %v7891_v63  ;;  %v7909_v63 = vld [vmem:[#allocation9 + $0x128] ss:$144 sps:$4 sm:$0xff]  }
 0xa3f   :  { %5468 = vmatprep.subr.bf16.mxu0 %v7899_v45  ;;  %v7978_v45 = vld [vmem:[#allocation9 + $0x4b0] ss:$144 sps:$4 sm:$0xff]  }
 0xa42   :  { %5469 = vmatpush1.bf16.msra.mxu0 %v7897_v49  ;;  %v7986_v49 = vld [vmem:[#allocation9 + $0x5d4] ss:$144 sps:$4 sm:$0xff]  }
 0xa43   :  { %5495 = vmatprep.subr.bf16.mxu0 %v7905_v50  ;;  %v7984_v50 = vld [vmem:[#allocation9 + $0x5d0] ss:$144 sps:$4 sm:$0xff]  }
 0xaee   :  { %v3478_v0 = vpop.f32.mrb[32].mxu1  ;;  %v3564_v1 = vpop.f32.mrb[40].mxu0 }
 0xaef   :  { %v3480_v2 = vpop.f32.mrb[33].mxu1  ;;  %v3566_v3 = vpop.f32.mrb[41].mxu0 }
 0xaf0   :  { %v3482_v4 = vpop.f32.mrb[34].mxu1  ;;  %v3568_v6 = vpop.f32.mrb[42].mxu0 }
 0xaf1   :  { %v3657_v7 = vpack.c.bf16 %v3482_v4, %v3478_v0  ;;  %v3661_v8 = vpack.c.bf16 %v3568_v6, %v3564_v1  ;;  %v3484_v10 = vpop.f32.mrb[35].mxu1  ;;  %v3570_v11 = vpop.f32.mrb[43].mxu0  ;;  %v7912_v0 = vld [vmem:[#allocation9 + $0x140] ss:$144 sps:$4 sm:$0xff]   ;;  %v7917_v1 = vld [vmem:[#allocation9 + $0x24c] ss:$144 sps:$4 sm:$0xff]  }
 0xaf2   :  { %v3658_v12 = vpack.c.bf16 %v3484_v10, %v3480_v2  ;;  %v3662_v13 = vpack.c.bf16 %v3570_v11, %v3566_v3  ;;  %v7920_v2 = vld [vmem:[#allocation9 + $0x264] ss:$144 sps:$4 sm:$0xff]   ;;  %v7915_v3 = vld [vmem:[#allocation9 + $0x248] ss:$144 sps:$4 sm:$0xff]   ;;  %v7918_v4 = vld [vmem:[#allocation9 + $0x260] ss:$144 sps:$4 sm:$0xff]  }
 0xaf3   :  { %3685 = vmatpush1.bf16.msra.mxu1 %v3657_v7  ;;  %v7923_v6 = vld [vmem:[#allocation9 + $0x36c] ss:$144 sps:$4 sm:$0xff]   ;;  %v7926_v7 = vld [vmem:[#allocation9 + $0x384] ss:$144 sps:$4 sm:$0xff]   ;;  %v7924_v10 = vld [vmem:[#allocation9 + $0x380] ss:$144 sps:$4 sm:$0xff]  }
 0xaf4   :  { %3686 = vmatprep.subr.bf16.mxu1 %v8459_v60  ;;  %v7929_v11 = vld [vmem:[#allocation9 + $0x48c] ss:$144 sps:$4 sm:$0xff]  }
 0xaf6   :  { %v3521_v14 = vpop.f32.mrb[36].mxu1  ;;  %v3650_v15 = vpop.f32.mrb[44].mxu0 }
 0xaf7   :  { %v3523_v16 = vpop.f32.mrb[37].mxu1  ;;  %v7213_v17 = vpop.f32.mrb[45].mxu0  ;;  %3687 = vmatpush1.bf16.msra.mxu1 %v3658_v12  ;;  %v7932_v12 = vld [vmem:[#allocation9 + $0x4a4] ss:$144 sps:$4 sm:$0xff]  }
 0xaf8   :  { %v3525_v18 = vpop.f32.mrb[38].mxu1  ;;  %v3653_v19 = vpop.f32.mrb[46].mxu0  ;;  %3688 = vmatprep.subr.bf16.mxu1 %v8459_v60  ;;  %v7933_v17 = vld [vmem:[#allocation9 + $0x5a8] ss:$144 sps:$4 sm:$0xff]  }
 0xaf9   :  { %v3659_v20 = vpack.c.bf16 %v3525_v18, %v3521_v14  ;;  %v3665_v21 = vpack.c.bf16 %v3653_v19, %v3650_v15  ;;  %v3527_v22 = vpop.f32.mrb[39].mxu1  ;;  %v7214_v23 = vpop.f32.mrb[47].mxu0  ;;  %v7930_v14 = vld [vmem:[#allocation9 + $0x4a0] ss:$144 sps:$4 sm:$0xff]   ;;  %v7935_v15 = vld [vmem:[#allocation9 + $0x5ac] ss:$144 sps:$4 sm:$0xff]  }
 0xafa   :  { %v3660_v24 = vpack.c.bf16 %v3527_v22, %v3523_v16  ;;  %v7938_v16 = vld [vmem:[#allocation9 + $0x5c4] ss:$144 sps:$4 sm:$0xff]   ;;  %v7936_v18 = vld [vmem:[#allocation9 + $0x5c0] ss:$144 sps:$4 sm:$0xff]   ;;  %v7941_v19 = vld [vmem:[#allocation9 + $0x6cc] ss:$144 sps:$4 sm:$0xff]  }
 0xafb   :  { %3689 = vmatpush1.bf16.msra.mxu1 %v3659_v20  ;;  %v7944_v20 = vld [vmem:[#allocation9 + $0x6e4] ss:$144 sps:$4 sm:$0xff]   ;;  %v7942_v22 = vld [vmem:[#allocation9 + $0x6e0] ss:$144 sps:$4 sm:$0xff]   ;;  %v7947_v23 = vld [vmem:[#allocation9 + $0x7ec] ss:$144 sps:$4 sm:$0xff]  }
 0xafc   :  { %3690 = vmatprep.subr.bf16.mxu1 %v8459_v60 }
 0xafe   :  { %v3607_v25 = vpop.f32.mrb[40].mxu1 }
 0xaff   :  { %v3609_v26 = vpop.f32.mrb[41].mxu1  ;;  %3691 = vmatpush1.bf16.msra.mxu1 %v3660_v24  ;;  %v7950_v24 = vld [vmem:[#allocation9 + $0x804] ss:$144 sps:$4 sm:$0xff]  }
 0xb00   :  { %v3611_v27 = vpop.f32.mrb[42].mxu1  ;;  %3692 = vmatprep.subr.bf16.mxu1 %v8459_v60 }
 0xb01   :  { %v3663_v28 = vpack.c.bf16 %v3611_v27, %v3607_v25  ;;  %v3613_v29 = vpop.f32.mrb[43].mxu1  ;;  %v7945_v25 = vld [vmem:[#allocation9 + $0x7e8] ss:$144 sps:$4 sm:$0xff]   ;;  %v7953_v27 = vld [vmem:[#allocation9 + $0x1c] ss:$144 sps:$4 sm:$0xff]  }
 0xb02   :  { %v3664_v31 = vpack.c.bf16 %v3613_v29, %v3609_v26  ;;  %v7948_v26 = vld [vmem:[#allocation9 + $0x800] ss:$144 sps:$4 sm:$0xff]   ;;  %v7951_v29 = vld [vmem:[#allocation9 + $0x18] ss:$144 sps:$4 sm:$0xff]  }
 0xb03   :  { %3693 = vmatpush1.bf16.msra.mxu1 %v3661_v8  ;;  %v7921_v8 = vld [vmem:[#allocation9 + $0x368] ss:$144 sps:$4 sm:$0xff]  }
 0xb04   :  { %3694 = vmatprep.subr.bf16.mxu1 %v8459_v60 }
 0xb07   :  { %3695 = vmatpush1.bf16.msra.mxu1 %v3662_v13  ;;  %v7927_v13 = vld [vmem:[#allocation9 + $0x488] ss:$144 sps:$4 sm:$0xff]  }
 0xb08   :  { %3696 = vmatprep.subr.bf16.mxu1 %v8459_v60 }
 0xb0b   :  { %3697 = vmatpush1.bf16.msra.mxu1 %v3663_v28  ;;  %v7956_v28 = vld [vmem:[#allocation9 + $0x34] ss:$144 sps:$4 sm:$0xff]  }
 0xb0c   :  { %3698 = vmatprep.subr.bf16.mxu1 %v8459_v60 }
 0xb0f   :  { %3699 = vmatpush1.bf16.msra.mxu1 %v3664_v31  ;;  %v7954_v31 = vld [vmem:[#allocation9 + $0x30] ss:$144 sps:$4 sm:$0xff]  }
 0xb10   :  { %3700 = vmatprep.subr.bf16.mxu1 %v8459_v60 }
 0xb13   :  { %3701 = vmatpush1.bf16.msra.mxu1 %v3665_v21  ;;  %v7939_v21 = vld [vmem:[#allocation9 + $0x6c8] ss:$144 sps:$4 sm:$0xff]  }
 0xb14   :  { %5536 = vmatprep.subr.bf16.mxu1 %v7860_v32  ;;  %v7959_v32 = vld [vmem:[#allocation9 + $0x13c] ss:$144 sps:$4 sm:$0xff]  }
 0xb16   :  { %3717 = vmatmul.mubr.bf16.vlgmr.msra.gmra.mrb[44].mxu1 %v6742_v33  ;;  %v7962_v33 = vld [vmem:[#allocation9 + $0x154] ss:$144 sps:$4 sm:$0xff]  }
 0xb17   :  { %5537 = vmatpush1.bf16.msra.mxu1 %v7858_v34  ;;  %5568 = vmatprep.mubr.bf16.mxu1 %v8459_v60  ;;  %v7957_v34 = vld [vmem:[#allocation9 + $0x138] ss:$144 sps:$4 sm:$0xff]  }
 0xb18   :  { %5538 = vmatprep.subr.bf16.mxu1 %v7866_v35  ;;  %v7960_v35 = vld [vmem:[#allocation9 + $0x150] ss:$144 sps:$4 sm:$0xff]  }
 0xb1b   :  { %5539 = vmatpush1.bf16.msra.mxu1 %v7864_v36  ;;  %v7965_v36 = vld [vmem:[#allocation9 + $0x25c] ss:$144 sps:$4 sm:$0xff]  }
 0xb1c   :  { %5540 = vmatprep.subr.bf16.mxu1 %v7872_v37  ;;  %v7968_v37 = vld [vmem:[#allocation9 + $0x274] ss:$144 sps:$4 sm:$0xff]  }
 0xb1f   :  { %5541 = vmatpush1.bf16.msra.mxu1 %v7870_v48  ;;  %v7963_v48 = vld [vmem:[#allocation9 + $0x258] ss:$144 sps:$4 sm:$0xff]  }
 0xb20   :  { %5542 = vmatprep.subr.bf16.mxu1 %v7878_v30  ;;  %v7966_v30 = vld [vmem:[#allocation9 + $0x270] ss:$144 sps:$4 sm:$0xff]  }
 0xb23   :  { %5543 = vmatpush1.bf16.msra.mxu1 %v7876_v38  ;;  %v7971_v38 = vld [vmem:[#allocation9 + $0x37c] ss:$144 sps:$4 sm:$0xff]  }
 0xb24   :  { %5544 = vmatprep.subr.bf16.mxu1 %v7884_v39  ;;  %v7974_v39 = vld [vmem:[#allocation9 + $0x394] ss:$144 sps:$4 sm:$0xff]  }
 0xb27   :  { %5545 = vmatpush1.bf16.msra.mxu1 %v7882_v40  ;;  %v7969_v40 = vld [vmem:[#allocation9 + $0x378] ss:$144 sps:$4 sm:$0xff]  }
 0xb28   :  { %5546 = vmatprep.subr.bf16.mxu1 %v7890_v41  ;;  %v7972_v41 = vld [vmem:[#allocation9 + $0x390] ss:$144 sps:$4 sm:$0xff]  }
 0xb2b   :  { %5547 = vmatpush1.bf16.msra.mxu1 %v7888_v42  ;;  %v7977_v42 = vld [vmem:[#allocation9 + $0x49c] ss:$144 sps:$4 sm:$0xff]  }
 0xb2c   :  { %5548 = vmatprep.subr.bf16.mxu1 %v7896_v43  ;;  %v7980_v43 = vld [vmem:[#allocation9 + $0x4b4] ss:$144 sps:$4 sm:$0xff]  }
 0xb2f   :  { %5549 = vmatpush1.bf16.msra.mxu1 %v7894_v44  ;;  %v7975_v44 = vld [vmem:[#allocation9 + $0x498] ss:$144 sps:$4 sm:$0xff]  }
 0xb30   :  { %5550 = vmatprep.subr.bf16.mxu1 %v7902_v46  ;;  %v7983_v46 = vld [vmem:[#allocation9 + $0x5bc] ss:$144 sps:$4 sm:$0xff]  }
 0xb33   :  { %5551 = vmatpush1.bf16.msra.mxu1 %v7900_v47  ;;  %v7981_v47 = vld [vmem:[#allocation9 + $0x5b8] ss:$144 sps:$4 sm:$0xff]  }
 0xb34   :  { %5618 = vmatprep.subr.bf16.mxu1 %v7908_v51  ;;  %v7989_v51 = vld [vmem:[#allocation9 + $0x6dc] ss:$144 sps:$4 sm:$0xff]  }
 0xbe9   :  { %v3718_v53 = vpop.f32.mrb[44].mxu1 }
 0xbea   :  { %v3719_v54 = vadd.f32 %v3718_v53, %v3673_v52  ;;  %v3720_v55 = vpop.f32.mrb[45].mxu1  ;;  %v7992_v52 = vld [vmem:[#allocation9 + $0x6f4] ss:$144 sps:$4 sm:$0xff]   ;;  %v7987_v53 = vld [vmem:[#allocation9 + $0x6d8] ss:$144 sps:$4 sm:$0xff]  }
 0xbeb   :  { %v3721_v56 = vpop.f32.mrb[46].mxu1  ;;  %v7995_v55 = vld [vmem:[#allocation9 + $0x7fc] ss:$144 sps:$4 sm:$0xff]  }
 0xbec   :  { %v3724_v57 = vmax.f32 %v3719_v54, 0.0  ;;  %v3722_v58 = vpop.f32.mrb[47].mxu1  ;;  %v7990_v54 = vld [vmem:[#allocation9 + $0x6f0] ss:$144 sps:$4 sm:$0xff]   ;;  %v7998_v56 = vld [vmem:[#allocation9 + $0x814] ss:$144 sps:$4 sm:$0xff]  }
 0xbed   :  { %v7996_v58 = vld [vmem:[#allocation9 + $0x810] ss:$144 sps:$4 sm:$0xff]  }
 0xbee   :  { %v8879_v59 = vpack.c.bf16 %v3724_v57, %v3724_v57  ;;  %v7993_v57 = vld [vmem:[#allocation9 + $0x7f8] ss:$144 sps:$4 sm:$0xff]  }
 0xbf0   :  { %5487 = vmatmul.mubr.bf16.vlgmr.msra.gmra.mrb[48].mxu0 %v8879_v59  ;;  %5569 = vmatmul.mubr.bf16.vlgmr.msra.gmra.mrb[48].mxu1 %v8879_v59 }
 0xbf1   :  { %5496 = vmatpush1.bf16.msra.mxu0 %v7903_v5  ;;  %5619 = vmatpush1.bf16.msra.mxu1 %v7906_v9  ;;  %v8001_v5 = vld [vmem:[#allocation9 + $0x2c] ss:$144 sps:$4 sm:$0xff]   ;;  %v8004_v9 = vld [vmem:[#allocation9 + $0x44] ss:$144 sps:$4 sm:$0xff]  }
 0xbf2   :  { %5497 = vmatprep.subr.bf16.mxu0 %v7911_v61  ;;  %5620 = vmatprep.subr.bf16.mxu1 %v7914_v62  ;;  %v7999_v61 = vld [vmem:[#allocation9 + $0x28] ss:$144 sps:$4 sm:$0xff]   ;;  %v8002_v62 = vld [vmem:[#allocation9 + $0x40] ss:$144 sps:$4 sm:$0xff]  }
 0xbf3   :  { %5527 = vmatprep.mubr.bf16.mxu0 %v8459_v60  ;;  %5650 = vmatprep.mubr.bf16.mxu1 %v8459_v60 }
 0xbf5   :  { %5498 = vmatpush1.bf16.msra.mxu0 %v7909_v63  ;;  %5621 = vmatpush1.bf16.msra.mxu1 %v7912_v0  ;;  %v8007_v63 = vld [vmem:[#allocation9 + $0x14c] ss:$144 sps:$4 sm:$0xff]   ;;  %v8010_v0 = vld [vmem:[#allocation9 + $0x164] ss:$144 sps:$4 sm:$0xff]  }
 0xbf6   :  { %5499 = vmatprep.subr.bf16.mxu0 %v7917_v1  ;;  %5622 = vmatprep.subr.bf16.mxu1 %v7920_v2  ;;  %v8005_v1 = vld [vmem:[#allocation9 + $0x148] ss:$144 sps:$4 sm:$0xff]   ;;  %v8008_v2 = vld [vmem:[#allocation9 + $0x160] ss:$144 sps:$4 sm:$0xff]  }
 0xbf9   :  { %5500 = vmatpush1.bf16.msra.mxu0 %v7915_v3  ;;  %5623 = vmatpush1.bf16.msra.mxu1 %v7918_v4  ;;  %v8013_v3 = vld [vmem:[#allocation9 + $0x26c] ss:$144 sps:$4 sm:$0xff]   ;;  %v8016_v4 = vld [vmem:[#allocation9 + $0x284] ss:$144 sps:$4 sm:$0xff]  }
 0xbfa   :  { %5501 = vmatprep.subr.bf16.mxu0 %v7923_v6  ;;  %5624 = vmatprep.subr.bf16.mxu1 %v7926_v7  ;;  %v8011_v6 = vld [vmem:[#allocation9 + $0x268] ss:$144 sps:$4 sm:$0xff]   ;;  %v8014_v7 = vld [vmem:[#allocation9 + $0x280] ss:$144 sps:$4 sm:$0xff]  }
 0xbfd   :  { %5502 = vmatpush1.bf16.msra.mxu0 %v7921_v8  ;;  %5625 = vmatpush1.bf16.msra.mxu1 %v7924_v10  ;;  %v8019_v8 = vld [vmem:[#allocation9 + $0x38c] ss:$144 sps:$4 sm:$0xff]   ;;  %v8022_v10 = vld [vmem:[#allocation9 + $0x3a4] ss:$144 sps:$4 sm:$0xff]  }
 0xbfe   :  { %5503 = vmatprep.subr.bf16.mxu0 %v7929_v11  ;;  %5626 = vmatprep.subr.bf16.mxu1 %v7932_v12  ;;  %v8017_v11 = vld [vmem:[#allocation9 + $0x388] ss:$144 sps:$4 sm:$0xff]   ;;  %v8020_v12 = vld [vmem:[#allocation9 + $0x3a0] ss:$144 sps:$4 sm:$0xff]  }
 0xc01   :  { %5504 = vmatpush1.bf16.msra.mxu0 %v7927_v13  ;;  %5627 = vmatpush1.bf16.msra.mxu1 %v7930_v14  ;;  %v8025_v13 = vld [vmem:[#allocation9 + $0x4ac] ss:$144 sps:$4 sm:$0xff]   ;;  %v8028_v14 = vld [vmem:[#allocation9 + $0x4c4] ss:$144 sps:$4 sm:$0xff]  }
 0xc02   :  { %5505 = vmatprep.subr.bf16.mxu0 %v7935_v15  ;;  %5628 = vmatprep.subr.bf16.mxu1 %v7938_v16  ;;  %v8023_v15 = vld [vmem:[#allocation9 + $0x4a8] ss:$144 sps:$4 sm:$0xff]   ;;  %v8026_v16 = vld [vmem:[#allocation9 + $0x4c0] ss:$144 sps:$4 sm:$0xff]  }
 0xc05   :  { %5506 = vmatpush1.bf16.msra.mxu0 %v7933_v17  ;;  %5629 = vmatpush1.bf16.msra.mxu1 %v7936_v18  ;;  %v8031_v17 = vld [vmem:[#allocation9 + $0x5cc] ss:$144 sps:$4 sm:$0xff]   ;;  %v8034_v18 = vld [vmem:[#allocation9 + $0x5e4] ss:$144 sps:$4 sm:$0xff]  }
 0xc06   :  { %5507 = vmatprep.subr.bf16.mxu0 %v7941_v19  ;;  %5630 = vmatprep.subr.bf16.mxu1 %v7944_v20  ;;  %v8029_v19 = vld [vmem:[#allocation9 + $0x5c8] ss:$144 sps:$4 sm:$0xff]   ;;  %v8032_v20 = vld [vmem:[#allocation9 + $0x5e0] ss:$144 sps:$4 sm:$0xff]  }
 0xc09   :  { %5508 = vmatpush1.bf16.msra.mxu0 %v7939_v21  ;;  %5631 = vmatpush1.bf16.msra.mxu1 %v7942_v22  ;;  %v8037_v21 = vld [vmem:[#allocation9 + $0x6ec] ss:$144 sps:$4 sm:$0xff]   ;;  %v8040_v22 = vld [vmem:[#allocation9 + $0x704] ss:$144 sps:$4 sm:$0xff]  }
 0xc0a   :  { %5509 = vmatprep.subr.bf16.mxu0 %v7947_v23  ;;  %5632 = vmatprep.subr.bf16.mxu1 %v7950_v24  ;;  %v8035_v23 = vld [vmem:[#allocation9 + $0x6e8] ss:$144 sps:$4 sm:$0xff]   ;;  %v8038_v24 = vld [vmem:[#allocation9 + $0x700] ss:$144 sps:$4 sm:$0xff]  }
 0xc0d   :  { %5510 = vmatpush1.bf16.msra.mxu0 %v7945_v25  ;;  %5633 = vmatpush1.bf16.msra.mxu1 %v7948_v26  ;;  %v8043_v25 = vld [vmem:[#allocation9 + $0x80c] ss:$144 sps:$4 sm:$0xff]   ;;  %v8046_v26 = vld [vmem:[#allocation9 + $0x824] ss:$144 sps:$4 sm:$0xff]  }
 0xc0e   :  { %5577 = vmatprep.subr.bf16.mxu0 %v7953_v27  ;;  %5700 = vmatprep.subr.bf16.mxu1 %v7956_v28  ;;  %v8041_v27 = vld [vmem:[#allocation9 + $0x808] ss:$144 sps:$4 sm:$0xff]   ;;  %v8044_v28 = vld [vmem:[#allocation9 + $0x820] ss:$144 sps:$4 sm:$0xff]  }
 0xc10   :  { %5528 = vmatmul.mubr.bf16.vlgmr.msra.gmra.mrb[52].mxu0 %v8879_v59  ;;  %5651 = vmatmul.mubr.bf16.vlgmr.msra.gmra.mrb[52].mxu1 %v8879_v59 }
 0xc11   :  { %5578 = vmatpush1.bf16.msra.mxu0 %v7951_v29  ;;  %5701 = vmatpush1.bf16.msra.mxu1 %v7954_v31  ;;  %v8049_v29 = vld [vmem:[#allocation9 + $0x3c] ss:$144 sps:$4 sm:$0xff]   ;;  %v8052_v31 = vld [vmem:[#allocation9 + $0x54] ss:$144 sps:$4 sm:$0xff]  }
 0xc12   :  { %5579 = vmatprep.subr.bf16.mxu0 %v7959_v32  ;;  %5702 = vmatprep.subr.bf16.mxu1 %v7962_v33  ;;  %v8047_v32 = vld [vmem:[#allocation9 + $0x38] ss:$144 sps:$4 sm:$0xff]   ;;  %v8050_v33 = vld [vmem:[#allocation9 + $0x50] ss:$144 sps:$4 sm:$0xff]  }
 0xc13   :  { %5609 = vmatprep.mubr.bf16.mxu0 %v8459_v60  ;;  %5732 = vmatprep.mubr.bf16.mxu1 %v8459_v60 }
 0xc15   :  { %5580 = vmatpush1.bf16.msra.mxu0 %v7957_v34  ;;  %5703 = vmatpush1.bf16.msra.mxu1 %v7960_v35  ;;  %v8055_v34 = vld [vmem:[#allocation9 + $0x15c] ss:$144 sps:$4 sm:$0xff]   ;;  %v8058_v35 = vld [vmem:[#allocation9 + $0x174] ss:$144 sps:$4 sm:$0xff]  }
 0xc16   :  { %5581 = vmatprep.subr.bf16.mxu0 %v7965_v36  ;;  %5704 = vmatprep.subr.bf16.mxu1 %v7968_v37  ;;  %v8053_v36 = vld [vmem:[#allocation9 + $0x158] ss:$144 sps:$4 sm:$0xff]   ;;  %v8056_v37 = vld [vmem:[#allocation9 + $0x170] ss:$144 sps:$4 sm:$0xff]  }
 0xc19   :  { %5582 = vmatpush1.bf16.msra.mxu0 %v7963_v48  ;;  %5705 = vmatpush1.bf16.msra.mxu1 %v7966_v30  ;;  %v8061_v48 = vld [vmem:[#allocation9 + $0x27c] ss:$144 sps:$4 sm:$0xff]   ;;  %v8064_v30 = vld [vmem:[#allocation9 + $0x294] ss:$144 sps:$4 sm:$0xff]  }
 0xc1a   :  { %5583 = vmatprep.subr.bf16.mxu0 %v7971_v38  ;;  %5706 = vmatprep.subr.bf16.mxu1 %v7974_v39  ;;  %v8059_v38 = vld [vmem:[#allocation9 + $0x278] ss:$144 sps:$4 sm:$0xff]   ;;  %v8062_v39 = vld [vmem:[#allocation9 + $0x290] ss:$144 sps:$4 sm:$0xff]  }
 0xc1d   :  { %5584 = vmatpush1.bf16.msra.mxu0 %v7969_v40  ;;  %5707 = vmatpush1.bf16.msra.mxu1 %v7972_v41  ;;  %v8067_v40 = vld [vmem:[#allocation9 + $0x39c] ss:$144 sps:$4 sm:$0xff]   ;;  %v8070_v41 = vld [vmem:[#allocation9 + $0x3b4] ss:$144 sps:$4 sm:$0xff]  }
 0xc1e   :  { %5585 = vmatprep.subr.bf16.mxu0 %v7977_v42  ;;  %5708 = vmatprep.subr.bf16.mxu1 %v7980_v43  ;;  %v8065_v42 = vld [vmem:[#allocation9 + $0x398] ss:$144 sps:$4 sm:$0xff]   ;;  %v8068_v43 = vld [vmem:[#allocation9 + $0x3b0] ss:$144 sps:$4 sm:$0xff]  }
 0xc21   :  { %5586 = vmatpush1.bf16.msra.mxu0 %v7975_v44  ;;  %5709 = vmatpush1.bf16.msra.mxu1 %v7978_v45  ;;  %v8073_v44 = vld [vmem:[#allocation9 + $0x4bc] ss:$144 sps:$4 sm:$0xff]   ;;  %v8076_v45 = vld [vmem:[#allocation9 + $0x4d4] ss:$144 sps:$4 sm:$0xff]  }
 0xc22   :  { %5587 = vmatprep.subr.bf16.mxu0 %v7983_v46  ;;  %5710 = vmatprep.subr.bf16.mxu1 %v7986_v49  ;;  %v8071_v46 = vld [vmem:[#allocation9 + $0x4b8] ss:$144 sps:$4 sm:$0xff]   ;;  %v8074_v49 = vld [vmem:[#allocation9 + $0x4d0] ss:$144 sps:$4 sm:$0xff]  }
 0xc25   :  { %5588 = vmatpush1.bf16.msra.mxu0 %v7981_v47  ;;  %5711 = vmatpush1.bf16.msra.mxu1 %v7984_v50  ;;  %v8079_v47 = vld [vmem:[#allocation9 + $0x5dc] ss:$144 sps:$4 sm:$0xff]   ;;  %v8082_v50 = vld [vmem:[#allocation9 + $0x5f4] ss:$144 sps:$4 sm:$0xff]  }
 0xc26   :  { %5589 = vmatprep.subr.bf16.mxu0 %v7989_v51  ;;  %5712 = vmatprep.subr.bf16.mxu1 %v7992_v52  ;;  %v8077_v51 = vld [vmem:[#allocation9 + $0x5d8] ss:$144 sps:$4 sm:$0xff]   ;;  %v8080_v52 = vld [vmem:[#allocation9 + $0x5f0] ss:$144 sps:$4 sm:$0xff]  }
 0xc29   :  { %5590 = vmatpush1.bf16.msra.mxu0 %v7987_v53  ;;  %5713 = vmatpush1.bf16.msra.mxu1 %v7990_v54  ;;  %v8085_v53 = vld [vmem:[#allocation9 + $0x6fc] ss:$144 sps:$4 sm:$0xff]   ;;  %v8088_v54 = vld [vmem:[#allocation9 + $0x714] ss:$144 sps:$4 sm:$0xff]  }
 0xc2a   :  { %5591 = vmatprep.subr.bf16.mxu0 %v7995_v55  ;;  %5714 = vmatprep.subr.bf16.mxu1 %v7998_v56  ;;  %v8083_v55 = vld [vmem:[#allocation9 + $0x6f8] ss:$144 sps:$4 sm:$0xff]   ;;  %v8086_v56 = vld [vmem:[#allocation9 + $0x710] ss:$144 sps:$4 sm:$0xff]  }
 0xc2d   :  { %5592 = vmatpush1.bf16.msra.mxu0 %v7993_v57  ;;  %5715 = vmatpush1.bf16.msra.mxu1 %v7996_v58  ;;  %v8091_v57 = vld [vmem:[#allocation9 + $0x81c] ss:$144 sps:$4 sm:$0xff]   ;;  %v8094_v58 = vld [vmem:[#allocation9 + $0x834] ss:$144 sps:$4 sm:$0xff]  }
 0xc2e   :  { %5659 = vmatprep.subr.bf16.mxu0 %v8001_v5  ;;  %5782 = vmatprep.subr.bf16.mxu1 %v8004_v9  ;;  %v8089_v5 = vld [vmem:[#allocation9 + $0x818] ss:$144 sps:$4 sm:$0xff]   ;;  %v8092_v9 = vld [vmem:[#allocation9 + $0x830] ss:$144 sps:$4 sm:$0xff]  }
 0xc30   :  { %5610 = vmatmul.mubr.bf16.vlgmr.msra.gmra.mrb[56].mxu0 %v8879_v59  ;;  %5733 = vmatmul.mubr.bf16.vlgmr.msra.gmra.mrb[56].mxu1 %v8879_v59 }
 0xc31   :  { %5660 = vmatpush1.bf16.msra.mxu0 %v7999_v61  ;;  %5783 = vmatpush1.bf16.msra.mxu1 %v8002_v62  ;;  %v8097_v61 = vld [vmem:[#allocation9 + $0x4c] ss:$144 sps:$4 sm:$0xff]   ;;  %v8100_v62 = vld [vmem:[#allocation9 + $0x64] ss:$144 sps:$4 sm:$0xff]  }
 0xc32   :  { %5661 = vmatprep.subr.bf16.mxu0 %v8007_v63  ;;  %5784 = vmatprep.subr.bf16.mxu1 %v8010_v0  ;;  %v8095_v63 = vld [vmem:[#allocation9 + $0x48] ss:$144 sps:$4 sm:$0xff]   ;;  %v8098_v0 = vld [vmem:[#allocation9 + $0x60] ss:$144 sps:$4 sm:$0xff]  }
 0xc33   :  { %5691 = vmatprep.mubr.bf16.mxu0 %v8459_v60  ;;  %5814 = vmatprep.mubr.bf16.mxu1 %v8459_v60 }
 0xc35   :  { %5662 = vmatpush1.bf16.msra.mxu0 %v8005_v1  ;;  %5785 = vmatpush1.bf16.msra.mxu1 %v8008_v2  ;;  %v8103_v1 = vld [vmem:[#allocation9 + $0x16c] ss:$144 sps:$4 sm:$0xff]   ;;  %v8106_v2 = vld [vmem:[#allocation9 + $0x184] ss:$144 sps:$4 sm:$0xff]  }
 0xc36   :  { %5663 = vmatprep.subr.bf16.mxu0 %v8013_v3  ;;  %5786 = vmatprep.subr.bf16.mxu1 %v8016_v4  ;;  %v8101_v3 = vld [vmem:[#allocation9 + $0x168] ss:$144 sps:$4 sm:$0xff]   ;;  %v8104_v4 = vld [vmem:[#allocation9 + $0x180] ss:$144 sps:$4 sm:$0xff]  }
 0xc39   :  { %5664 = vmatpush1.bf16.msra.mxu0 %v8011_v6  ;;  %5787 = vmatpush1.bf16.msra.mxu1 %v8014_v7  ;;  %v8109_v6 = vld [vmem:[#allocation9 + $0x28c] ss:$144 sps:$4 sm:$0xff]   ;;  %v8112_v7 = vld [vmem:[#allocation9 + $0x2a4] ss:$144 sps:$4 sm:$0xff]  }
 0xc3a   :  { %5665 = vmatprep.subr.bf16.mxu0 %v8019_v8  ;;  %5788 = vmatprep.subr.bf16.mxu1 %v8022_v10  ;;  %v8107_v8 = vld [vmem:[#allocation9 + $0x288] ss:$144 sps:$4 sm:$0xff]   ;;  %v8110_v10 = vld [vmem:[#allocation9 + $0x2a0] ss:$144 sps:$4 sm:$0xff]  }
 0xc3d   :  { %5666 = vmatpush1.bf16.msra.mxu0 %v8017_v11  ;;  %5789 = vmatpush1.bf16.msra.mxu1 %v8020_v12  ;;  %v8115_v11 = vld [vmem:[#allocation9 + $0x3ac] ss:$144 sps:$4 sm:$0xff]   ;;  %v8118_v12 = vld [vmem:[#allocation9 + $0x3c4] ss:$144 sps:$4 sm:$0xff]  }
 0xc3e   :  { %5667 = vmatprep.subr.bf16.mxu0 %v8025_v13  ;;  %5790 = vmatprep.subr.bf16.mxu1 %v8028_v14  ;;  %v8113_v13 = vld [vmem:[#allocation9 + $0x3a8] ss:$144 sps:$4 sm:$0xff]   ;;  %v8116_v14 = vld [vmem:[#allocation9 + $0x3c0] ss:$144 sps:$4 sm:$0xff]  }
 0xc41   :  { %5668 = vmatpush1.bf16.msra.mxu0 %v8023_v15  ;;  %5791 = vmatpush1.bf16.msra.mxu1 %v8026_v16  ;;  %v8121_v15 = vld [vmem:[#allocation9 + $0x4cc] ss:$144 sps:$4 sm:$0xff]   ;;  %v8124_v16 = vld [vmem:[#allocation9 + $0x4e4] ss:$144 sps:$4 sm:$0xff]  }
 0xc42   :  { %5669 = vmatprep.subr.bf16.mxu0 %v8031_v17  ;;  %5792 = vmatprep.subr.bf16.mxu1 %v8034_v18  ;;  %v8119_v17 = vld [vmem:[#allocation9 + $0x4c8] ss:$144 sps:$4 sm:$0xff]   ;;  %v8122_v18 = vld [vmem:[#allocation9 + $0x4e0] ss:$144 sps:$4 sm:$0xff]  }
 0xc45   :  { %5670 = vmatpush1.bf16.msra.mxu0 %v8029_v19  ;;  %5793 = vmatpush1.bf16.msra.mxu1 %v8032_v20  ;;  %v8127_v19 = vld [vmem:[#allocation9 + $0x5ec] ss:$144 sps:$4 sm:$0xff]   ;;  %v8130_v20 = vld [vmem:[#allocation9 + $0x604] ss:$144 sps:$4 sm:$0xff]  }
 0xc46   :  { %5671 = vmatprep.subr.bf16.mxu0 %v8037_v21  ;;  %5794 = vmatprep.subr.bf16.mxu1 %v8040_v22  ;;  %v8125_v21 = vld [vmem:[#allocation9 + $0x5e8] ss:$144 sps:$4 sm:$0xff]   ;;  %v8128_v22 = vld [vmem:[#allocation9 + $0x600] ss:$144 sps:$4 sm:$0xff]  }
 0xc49   :  { %5672 = vmatpush1.bf16.msra.mxu0 %v8035_v23  ;;  %5795 = vmatpush1.bf16.msra.mxu1 %v8038_v24  ;;  %v8133_v23 = vld [vmem:[#allocation9 + $0x70c] ss:$144 sps:$4 sm:$0xff]   ;;  %v8136_v24 = vld [vmem:[#allocation9 + $0x724] ss:$144 sps:$4 sm:$0xff]  }
 0xc4a   :  { %5673 = vmatprep.subr.bf16.mxu0 %v8043_v25  ;;  %5796 = vmatprep.subr.bf16.mxu1 %v8046_v26  ;;  %v8131_v25 = vld [vmem:[#allocation9 + $0x708] ss:$144 sps:$4 sm:$0xff]   ;;  %v8134_v26 = vld [vmem:[#allocation9 + $0x720] ss:$144 sps:$4 sm:$0xff]  }
 0xc4d   :  { %5674 = vmatpush1.bf16.msra.mxu0 %v8041_v27  ;;  %5797 = vmatpush1.bf16.msra.mxu1 %v8044_v28  ;;  %v8139_v27 = vld [vmem:[#allocation9 + $0x82c] ss:$144 sps:$4 sm:$0xff]   ;;  %v8142_v28 = vld [vmem:[#allocation9 + $0x844] ss:$144 sps:$4 sm:$0xff]  }
 0xc4e   :  { %5741 = vmatprep.subr.bf16.mxu0 %v8049_v29  ;;  %5864 = vmatprep.subr.bf16.mxu1 %v8052_v31  ;;  %v8137_v29 = vld [vmem:[#allocation9 + $0x828] ss:$144 sps:$4 sm:$0xff]   ;;  %v8140_v31 = vld [vmem:[#allocation9 + $0x840] ss:$144 sps:$4 sm:$0xff]  }
 0xc50   :  { %5692 = vmatmul.mubr.bf16.vlgmr.msra.gmra.mrb[60].mxu0 %v8879_v59  ;;  %5815 = vmatmul.mubr.bf16.vlgmr.msra.gmra.mrb[60].mxu1 %v8879_v59 }
 0xc51   :  { %5742 = vmatpush1.bf16.msra.mxu0 %v8047_v32  ;;  %5865 = vmatpush1.bf16.msra.mxu1 %v8050_v33  ;;  %v8145_v32 = vld [vmem:[#allocation9 + $0x5c] ss:$144 sps:$4 sm:$0xff]   ;;  %v8148_v33 = vld [vmem:[#allocation9 + $0x74] ss:$144 sps:$4 sm:$0xff]  }
 0xc52   :  { %5743 = vmatprep.subr.bf16.mxu0 %v8055_v34  ;;  %5866 = vmatprep.subr.bf16.mxu1 %v8058_v35  ;;  %v8143_v34 = vld [vmem:[#allocation9 + $0x58] ss:$144 sps:$4 sm:$0xff]   ;;  %v8146_v35 = vld [vmem:[#allocation9 + $0x70] ss:$144 sps:$4 sm:$0xff]  }
 0xc53   :  { %5773 = vmatprep.mubr.bf16.mxu0 %v8459_v60  ;;  %5896 = vmatprep.mubr.bf16.mxu1 %v8459_v60 }
 0xc55   :  { %5744 = vmatpush1.bf16.msra.mxu0 %v8053_v36  ;;  %5867 = vmatpush1.bf16.msra.mxu1 %v8056_v37  ;;  %v8151_v36 = vld [vmem:[#allocation9 + $0x17c] ss:$144 sps:$4 sm:$0xff]   ;;  %v8154_v37 = vld [vmem:[#allocation9 + $0x194] ss:$144 sps:$4 sm:$0xff]  }
 0xc56   :  { %5745 = vmatprep.subr.bf16.mxu0 %v8061_v48  ;;  %5868 = vmatprep.subr.bf16.mxu1 %v8064_v30  ;;  %v8149_v48 = vld [vmem:[#allocation9 + $0x178] ss:$144 sps:$4 sm:$0xff]   ;;  %v8152_v30 = vld [vmem:[#allocation9 + $0x190] ss:$144 sps:$4 sm:$0xff]  }
 0xc59   :  { %5746 = vmatpush1.bf16.msra.mxu0 %v8059_v38  ;;  %5869 = vmatpush1.bf16.msra.mxu1 %v8062_v39  ;;  %v8157_v38 = vld [vmem:[#allocation9 + $0x29c] ss:$144 sps:$4 sm:$0xff]   ;;  %v8160_v39 = vld [vmem:[#allocation9 + $0x2b4] ss:$144 sps:$4 sm:$0xff]  }
 0xc5a   :  { %5747 = vmatprep.subr.bf16.mxu0 %v8067_v40  ;;  %5870 = vmatprep.subr.bf16.mxu1 %v8070_v41  ;;  %v8155_v40 = vld [vmem:[#allocation9 + $0x298] ss:$144 sps:$4 sm:$0xff]   ;;  %v8158_v41 = vld [vmem:[#allocation9 + $0x2b0] ss:$144 sps:$4 sm:$0xff]  }
 0xc5d   :  { %5748 = vmatpush1.bf16.msra.mxu0 %v8065_v42  ;;  %5871 = vmatpush1.bf16.msra.mxu1 %v8068_v43  ;;  %v8163_v42 = vld [vmem:[#allocation9 + $0x3bc] ss:$144 sps:$4 sm:$0xff]   ;;  %v8166_v43 = vld [vmem:[#allocation9 + $0x3d4] ss:$144 sps:$4 sm:$0xff]  }
 0xc5e   :  { %5749 = vmatprep.subr.bf16.mxu0 %v8073_v44  ;;  %5872 = vmatprep.subr.bf16.mxu1 %v8076_v45  ;;  %v8161_v44 = vld [vmem:[#allocation9 + $0x3b8] ss:$144 sps:$4 sm:$0xff]   ;;  %v8164_v45 = vld [vmem:[#allocation9 + $0x3d0] ss:$144 sps:$4 sm:$0xff]  }
 0xc61   :  { %5750 = vmatpush1.bf16.msra.mxu0 %v8071_v46  ;;  %5873 = vmatpush1.bf16.msra.mxu1 %v8074_v49  ;;  %v8169_v46 = vld [vmem:[#allocation9 + $0x4dc] ss:$144 sps:$4 sm:$0xff]   ;;  %v8172_v49 = vld [vmem:[#allocation9 + $0x4f4] ss:$144 sps:$4 sm:$0xff]  }
 0xc62   :  { %5751 = vmatprep.subr.bf16.mxu0 %v8079_v47  ;;  %5874 = vmatprep.subr.bf16.mxu1 %v8082_v50  ;;  %v8167_v47 = vld [vmem:[#allocation9 + $0x4d8] ss:$144 sps:$4 sm:$0xff]   ;;  %v8170_v50 = vld [vmem:[#allocation9 + $0x4f0] ss:$144 sps:$4 sm:$0xff]  }
 0xc65   :  { %5752 = vmatpush1.bf16.msra.mxu0 %v8077_v51  ;;  %5875 = vmatpush1.bf16.msra.mxu1 %v8080_v52  ;;  %v8175_v51 = vld [vmem:[#allocation9 + $0x5fc] ss:$144 sps:$4 sm:$0xff]   ;;  %v8178_v52 = vld [vmem:[#allocation9 + $0x614] ss:$144 sps:$4 sm:$0xff]  }
 0xc66   :  { %5753 = vmatprep.subr.bf16.mxu0 %v8085_v53  ;;  %5876 = vmatprep.subr.bf16.mxu1 %v8088_v54  ;;  %v8173_v53 = vld [vmem:[#allocation9 + $0x5f8] ss:$144 sps:$4 sm:$0xff]   ;;  %v8176_v54 = vld [vmem:[#allocation9 + $0x610] ss:$144 sps:$4 sm:$0xff]  }
 0xc69   :  { %5754 = vmatpush1.bf16.msra.mxu0 %v8083_v55  ;;  %5877 = vmatpush1.bf16.msra.mxu1 %v8086_v56  ;;  %v8181_v55 = vld [vmem:[#allocation9 + $0x71c] ss:$144 sps:$4 sm:$0xff]   ;;  %v8184_v56 = vld [vmem:[#allocation9 + $0x734] ss:$144 sps:$4 sm:$0xff]  }
 0xc6a   :  { %5755 = vmatprep.subr.bf16.mxu0 %v8091_v57  ;;  %5878 = vmatprep.subr.bf16.mxu1 %v8094_v58  ;;  %v8179_v57 = vld [vmem:[#allocation9 + $0x718] ss:$144 sps:$4 sm:$0xff]   ;;  %v8182_v58 = vld [vmem:[#allocation9 + $0x730] ss:$144 sps:$4 sm:$0xff]  }
 0xc6d   :  { %5756 = vmatpush1.bf16.msra.mxu0 %v8089_v5  ;;  %5879 = vmatpush1.bf16.msra.mxu1 %v8092_v9  ;;  %v8187_v5 = vld [vmem:[#allocation9 + $0x83c] ss:$144 sps:$4 sm:$0xff]   ;;  %v8190_v9 = vld [vmem:[#allocation9 + $0x854] ss:$144 sps:$4 sm:$0xff]  }
 0xc6e   :  { %5823 = vmatprep.subr.bf16.mxu0 %v8097_v61  ;;  %5946 = vmatprep.subr.bf16.mxu1 %v8100_v62  ;;  %v8185_v61 = vld [vmem:[#allocation9 + $0x838] ss:$144 sps:$4 sm:$0xff]   ;;  %v8188_v62 = vld [vmem:[#allocation9 + $0x850] ss:$144 sps:$4 sm:$0xff]  }
 0xc70   :  { %5774 = vmatmul.mubr.bf16.vlgmr.msra.gmra.mrb[64].mxu0 %v8879_v59  ;;  %5897 = vmatmul.mubr.bf16.vlgmr.msra.gmra.mrb[64].mxu1 %v8879_v59 }
 0xc71   :  { %5824 = vmatpush1.bf16.msra.mxu0 %v8095_v63  ;;  %5947 = vmatpush1.bf16.msra.mxu1 %v8098_v0  ;;  %v8193_v63 = vld [vmem:[#allocation9 + $0x6c] ss:$144 sps:$4 sm:$0xff]   ;;  %v8196_v0 = vld [vmem:[#allocation9 + $0x84] ss:$144 sps:$4 sm:$0xff]  }
 0xc72   :  { %5825 = vmatprep.subr.bf16.mxu0 %v8103_v1  ;;  %5948 = vmatprep.subr.bf16.mxu1 %v8106_v2  ;;  %v8191_v1 = vld [vmem:[#allocation9 + $0x68] ss:$144 sps:$4 sm:$0xff]   ;;  %v8194_v2 = vld [vmem:[#allocation9 + $0x80] ss:$144 sps:$4 sm:$0xff]  }
 0xc73   :  { %5855 = vmatprep.mubr.bf16.mxu0 %v8459_v60  ;;  %5978 = vmatprep.mubr.bf16.mxu1 %v8459_v60 }
 0xc75   :  { %5826 = vmatpush1.bf16.msra.mxu0 %v8101_v3  ;;  %5949 = vmatpush1.bf16.msra.mxu1 %v8104_v4  ;;  %v8199_v3 = vld [vmem:[#allocation9 + $0x18c] ss:$144 sps:$4 sm:$0xff]   ;;  %v8202_v4 = vld [vmem:[#allocation9 + $0x1a4] ss:$144 sps:$4 sm:$0xff]  }
 0xc76   :  { %5827 = vmatprep.subr.bf16.mxu0 %v8109_v6  ;;  %5950 = vmatprep.subr.bf16.mxu1 %v8112_v7  ;;  %v8197_v6 = vld [vmem:[#allocation9 + $0x188] ss:$144 sps:$4 sm:$0xff]   ;;  %v8200_v7 = vld [vmem:[#allocation9 + $0x1a0] ss:$144 sps:$4 sm:$0xff]  }
 0xc79   :  { %5828 = vmatpush1.bf16.msra.mxu0 %v8107_v8  ;;  %5951 = vmatpush1.bf16.msra.mxu1 %v8110_v10  ;;  %v8205_v8 = vld [vmem:[#allocation9 + $0x2ac] ss:$144 sps:$4 sm:$0xff]   ;;  %v8208_v10 = vld [vmem:[#allocation9 + $0x2c4] ss:$144 sps:$4 sm:$0xff]  }
 0xc7a   :  { %5829 = vmatprep.subr.bf16.mxu0 %v8115_v11  ;;  %5952 = vmatprep.subr.bf16.mxu1 %v8118_v12  ;;  %v8203_v11 = vld [vmem:[#allocation9 + $0x2a8] ss:$144 sps:$4 sm:$0xff]   ;;  %v8206_v12 = vld [vmem:[#allocation9 + $0x2c0] ss:$144 sps:$4 sm:$0xff]  }
 0xc7d   :  { %5830 = vmatpush1.bf16.msra.mxu0 %v8113_v13  ;;  %5953 = vmatpush1.bf16.msra.mxu1 %v8116_v14  ;;  %v8211_v13 = vld [vmem:[#allocation9 + $0x3cc] ss:$144 sps:$4 sm:$0xff]   ;;  %v8214_v14 = vld [vmem:[#allocation9 + $0x3e4] ss:$144 sps:$4 sm:$0xff]  }
 0xc7e   :  { %5831 = vmatprep.subr.bf16.mxu0 %v8121_v15  ;;  %5954 = vmatprep.subr.bf16.mxu1 %v8124_v16  ;;  %v8209_v15 = vld [vmem:[#allocation9 + $0x3c8] ss:$144 sps:$4 sm:$0xff]   ;;  %v8212_v16 = vld [vmem:[#allocation9 + $0x3e0] ss:$144 sps:$4 sm:$0xff]  }
 0xc81   :  { %5832 = vmatpush1.bf16.msra.mxu0 %v8119_v17  ;;  %5955 = vmatpush1.bf16.msra.mxu1 %v8122_v18  ;;  %v8217_v17 = vld [vmem:[#allocation9 + $0x4ec] ss:$144 sps:$4 sm:$0xff]   ;;  %v8220_v18 = vld [vmem:[#allocation9 + $0x504] ss:$144 sps:$4 sm:$0xff]  }
 0xc82   :  { %5833 = vmatprep.subr.bf16.mxu0 %v8127_v19  ;;  %5956 = vmatprep.subr.bf16.mxu1 %v8130_v20  ;;  %v8215_v19 = vld [vmem:[#allocation9 + $0x4e8] ss:$144 sps:$4 sm:$0xff]   ;;  %v8218_v20 = vld [vmem:[#allocation9 + $0x500] ss:$144 sps:$4 sm:$0xff]  }
 0xc85   :  { %5834 = vmatpush1.bf16.msra.mxu0 %v8125_v21  ;;  %5957 = vmatpush1.bf16.msra.mxu1 %v8128_v22  ;;  %v8223_v21 = vld [vmem:[#allocation9 + $0x60c] ss:$144 sps:$4 sm:$0xff]   ;;  %v8226_v22 = vld [vmem:[#allocation9 + $0x624] ss:$144 sps:$4 sm:$0xff]  }
 0xc86   :  { %5835 = vmatprep.subr.bf16.mxu0 %v8133_v23  ;;  %5958 = vmatprep.subr.bf16.mxu1 %v8136_v24  ;;  %v8221_v23 = vld [vmem:[#allocation9 + $0x608] ss:$144 sps:$4 sm:$0xff]   ;;  %v8224_v24 = vld [vmem:[#allocation9 + $0x620] ss:$144 sps:$4 sm:$0xff]  }
 0xc89   :  { %5836 = vmatpush1.bf16.msra.mxu0 %v8131_v25  ;;  %5959 = vmatpush1.bf16.msra.mxu1 %v8134_v26  ;;  %v8229_v25 = vld [vmem:[#allocation9 + $0x72c] ss:$144 sps:$4 sm:$0xff]   ;;  %v8232_v26 = vld [vmem:[#allocation9 + $0x744] ss:$144 sps:$4 sm:$0xff]  }
 0xc8a   :  { %5837 = vmatprep.subr.bf16.mxu0 %v8139_v27  ;;  %5960 = vmatprep.subr.bf16.mxu1 %v8142_v28 }
 0xc8d   :  { %5838 = vmatpush1.bf16.msra.mxu0 %v8137_v29  ;;  %5961 = vmatpush1.bf16.msra.mxu1 %v8140_v31 }
 0xc8e   :  { %5905 = vmatprep.subr.bf16.mxu0 %v8145_v32  ;;  %6028 = vmatprep.subr.bf16.mxu1 %v8148_v33 }
 0xc90   :  { %5856 = vmatmul.mubr.bf16.vlgmr.msra.gmra.mrb[68].mxu0 %v8879_v59  ;;  %5979 = vmatmul.mubr.bf16.vlgmr.msra.gmra.mrb[68].mxu1 %v8879_v59 }
 0xc91   :  { %5906 = vmatpush1.bf16.msra.mxu0 %v8143_v34  ;;  %6029 = vmatpush1.bf16.msra.mxu1 %v8146_v35 }
 0xc92   :  { %5907 = vmatprep.subr.bf16.mxu0 %v8151_v36  ;;  %6030 = vmatprep.subr.bf16.mxu1 %v8154_v37  ;;  %v8227_v36 = vld [vmem:[#allocation9 + $0x728] ss:$144 sps:$4 sm:$0xff]   ;;  %v8230_v37 = vld [vmem:[#allocation9 + $0x740] ss:$144 sps:$4 sm:$0xff]  }
 0xc93   :  { %5937 = vmatprep.mubr.bf16.mxu0 %v8459_v60  ;;  %6060 = vmatprep.mubr.bf16.mxu1 %v8459_v60 }
 0xc95   :  { %5908 = vmatpush1.bf16.msra.mxu0 %v8149_v48  ;;  %6031 = vmatpush1.bf16.msra.mxu1 %v8152_v30 }
 0xc96   :  { %5909 = vmatprep.subr.bf16.mxu0 %v8157_v38  ;;  %6032 = vmatprep.subr.bf16.mxu1 %v8160_v39  ;;  %v8235_v38 = vld [vmem:[#allocation9 + $0x84c] ss:$144 sps:$4 sm:$0xff]   ;;  %v8238_v39 = vld [vmem:[#allocation9 + $0x864] ss:$144 sps:$4 sm:$0xff]  }
 0xc99   :  { %5910 = vmatpush1.bf16.msra.mxu0 %v8155_v40  ;;  %6033 = vmatpush1.bf16.msra.mxu1 %v8158_v41  ;;  %v8233_v40 = vld [vmem:[#allocation9 + $0x848] ss:$144 sps:$4 sm:$0xff]   ;;  %v8236_v41 = vld [vmem:[#allocation9 + $0x860] ss:$144 sps:$4 sm:$0xff]  }
 0xc9a   :  { %5911 = vmatprep.subr.bf16.mxu0 %v8163_v42  ;;  %6034 = vmatprep.subr.bf16.mxu1 %v8166_v43  ;;  %v8241_v42 = vld [vmem:[#allocation9 + $0x7c] ss:$144 sps:$4 sm:$0xff]   ;;  %v8239_v43 = vld [vmem:[#allocation9 + $0x78] ss:$144 sps:$4 sm:$0xff]  }
 0xc9d   :  { %5912 = vmatpush1.bf16.msra.mxu0 %v8161_v44  ;;  %6035 = vmatpush1.bf16.msra.mxu1 %v8164_v45  ;;  %v8244_v44 = vld [vmem:[#allocation9 + $0x19c] ss:$144 sps:$4 sm:$0xff]   ;;  %v8242_v45 = vld [vmem:[#allocation9 + $0x198] ss:$144 sps:$4 sm:$0xff]  }
 0xc9e   :  { %5913 = vmatprep.subr.bf16.mxu0 %v8169_v46  ;;  %6036 = vmatprep.subr.bf16.mxu1 %v8172_v49  ;;  %v8247_v46 = vld [vmem:[#allocation9 + $0x2bc] ss:$144 sps:$4 sm:$0xff]   ;;  %v8245_v49 = vld [vmem:[#allocation9 + $0x2b8] ss:$144 sps:$4 sm:$0xff]  }
 0xca1   :  { %5914 = vmatpush1.bf16.msra.mxu0 %v8167_v47  ;;  %6037 = vmatpush1.bf16.msra.mxu1 %v8170_v50  ;;  %v8250_v47 = vld [vmem:[#allocation9 + $0x3dc] ss:$144 sps:$4 sm:$0xff]   ;;  %v8248_v50 = vld [vmem:[#allocation9 + $0x3d8] ss:$144 sps:$4 sm:$0xff]  }
 0xca2   :  { %5915 = vmatprep.subr.bf16.mxu0 %v8175_v51  ;;  %6038 = vmatprep.subr.bf16.mxu1 %v8178_v52  ;;  %v8253_v51 = vld [vmem:[#allocation9 + $0x4fc] ss:$144 sps:$4 sm:$0xff]   ;;  %v8251_v52 = vld [vmem:[#allocation9 + $0x4f8] ss:$144 sps:$4 sm:$0xff]  }
 0xca5   :  { %5916 = vmatpush1.bf16.msra.mxu0 %v8173_v53  ;;  %6039 = vmatpush1.bf16.msra.mxu1 %v8176_v54  ;;  %v8256_v53 = vld [vmem:[#allocation9 + $0x61c] ss:$144 sps:$4 sm:$0xff]   ;;  %v8254_v54 = vld [vmem:[#allocation9 + $0x618] ss:$144 sps:$4 sm:$0xff]  }
 0xca6   :  { %5917 = vmatprep.subr.bf16.mxu0 %v8181_v55  ;;  %6040 = vmatprep.subr.bf16.mxu1 %v8184_v56  ;;  %v8259_v55 = vld [vmem:[#allocation9 + $0x73c] ss:$144 sps:$4 sm:$0xff]  }
 0xca9   :  { %5918 = vmatpush1.bf16.msra.mxu0 %v8179_v57  ;;  %6041 = vmatpush1.bf16.msra.mxu1 %v8182_v58 }
 0xcaa   :  { %5919 = vmatprep.subr.bf16.mxu0 %v8187_v5  ;;  %6042 = vmatprep.subr.bf16.mxu1 %v8190_v9 }
 0xcad   :  { %5920 = vmatpush1.bf16.msra.mxu0 %v8185_v61  ;;  %6043 = vmatpush1.bf16.msra.mxu1 %v8188_v62  ;;  %v8257_v62 = vld [vmem:[#allocation9 + $0x738] ss:$144 sps:$4 sm:$0xff]  }
 0xcae   :  { %5987 = vmatprep.subr.bf16.mxu0 %v8193_v63  ;;  %6110 = vmatprep.subr.bf16.mxu1 %v8196_v0 }
 0xcb0   :  { %5938 = vmatmul.mubr.bf16.vlgmr.msra.gmra.mrb[72].mxu0 %v8879_v59  ;;  %6061 = vmatmul.mubr.bf16.vlgmr.msra.gmra.mrb[72].mxu1 %v8879_v59 }
 0xcb1   :  { %5988 = vmatpush1.bf16.msra.mxu0 %v8191_v1  ;;  %6111 = vmatpush1.bf16.msra.mxu1 %v8194_v2  ;;  %v8262_v1 = vld [vmem:[#allocation9 + $0x85c] ss:$144 sps:$4 sm:$0xff]   ;;  %v8260_v2 = vld [vmem:[#allocation9 + $0x858] ss:$144 sps:$4 sm:$0xff]  }
 0xcb2   :  { %5989 = vmatprep.subr.bf16.mxu0 %v8199_v3  ;;  %6112 = vmatprep.subr.bf16.mxu1 %v8202_v4  ;;  %v8265_v3 = vld [vmem:[#allocation9 + $0x8c] ss:$144 sps:$4 sm:$0xff]   ;;  %v8263_v4 = vld [vmem:[#allocation9 + $0x88] ss:$144 sps:$4 sm:$0xff]  }
 0xcb3   :  { %6019 = vmatprep.mubr.bf16.mxu0 %v8459_v60  ;;  %6142 = vmatprep.mubr.bf16.mxu1 %v8459_v60 }
 0xcb5   :  { %5990 = vmatpush1.bf16.msra.mxu0 %v8197_v6  ;;  %6113 = vmatpush1.bf16.msra.mxu1 %v8200_v7  ;;  %v8268_v6 = vld [vmem:[#allocation9 + $0x1ac] ss:$144 sps:$4 sm:$0xff]   ;;  %v8266_v7 = vld [vmem:[#allocation9 + $0x1a8] ss:$144 sps:$4 sm:$0xff]  }
 0xcb6   :  { %5991 = vmatprep.subr.bf16.mxu0 %v8205_v8  ;;  %6114 = vmatprep.subr.bf16.mxu1 %v8208_v10  ;;  %v8271_v8 = vld [vmem:[#allocation9 + $0x2cc] ss:$144 sps:$4 sm:$0xff]   ;;  %v8269_v10 = vld [vmem:[#allocation9 + $0x2c8] ss:$144 sps:$4 sm:$0xff]  }
 0xcb9   :  { %5992 = vmatpush1.bf16.msra.mxu0 %v8203_v11  ;;  %6115 = vmatpush1.bf16.msra.mxu1 %v8206_v12  ;;  %v8274_v11 = vld [vmem:[#allocation9 + $0x3ec] ss:$144 sps:$4 sm:$0xff]   ;;  %v8272_v12 = vld [vmem:[#allocation9 + $0x3e8] ss:$144 sps:$4 sm:$0xff]  }
 0xcba   :  { %5993 = vmatprep.subr.bf16.mxu0 %v8211_v13  ;;  %6116 = vmatprep.subr.bf16.mxu1 %v8214_v14  ;;  %v8277_v13 = vld [vmem:[#allocation9 + $0x50c] ss:$144 sps:$4 sm:$0xff]   ;;  %v8275_v14 = vld [vmem:[#allocation9 + $0x508] ss:$144 sps:$4 sm:$0xff]  }
 0xcbd   :  { %5994 = vmatpush1.bf16.msra.mxu0 %v8209_v15  ;;  %6117 = vmatpush1.bf16.msra.mxu1 %v8212_v16  ;;  %v8280_v15 = vld [vmem:[#allocation9 + $0x62c] ss:$144 sps:$4 sm:$0xff]   ;;  %v8278_v16 = vld [vmem:[#allocation9 + $0x628] ss:$144 sps:$4 sm:$0xff]  }
 0xcbe   :  { %5995 = vmatprep.subr.bf16.mxu0 %v8217_v17  ;;  %6118 = vmatprep.subr.bf16.mxu1 %v8220_v18  ;;  %v8283_v17 = vld [vmem:[#allocation9 + $0x74c] ss:$144 sps:$4 sm:$0xff]  }
 0xcc1   :  { %5996 = vmatpush1.bf16.msra.mxu0 %v8215_v19  ;;  %6119 = vmatpush1.bf16.msra.mxu1 %v8218_v20 }
 0xcc2   :  { %5997 = vmatprep.subr.bf16.mxu0 %v8223_v21  ;;  %6120 = vmatprep.subr.bf16.mxu1 %v8226_v22 }
 0xcc3   :  { %v5488_v27 = vpop.f32.mrb[48].mxu0  ;;  %v5570_v28 = vpop.f32.mrb[48].mxu1 }
 0xcc4   :  { %v6192_v29 = vpack.c.bf16 %v5570_v28, %v5488_v27  ;;  %v5490_v31 = vpop.f32.mrb[49].mxu0  ;;  %v5572_v32 = vpop.f32.mrb[49].mxu1  ;;  %v8281_v28 = vld [vmem:[#allocation9 + $0x748] ss:$144 sps:$4 sm:$0xff]  }
 0xcc5   :  { %v6193_v33 = vpack.c.bf16 %v5572_v32, %v5490_v31  ;;  %5998 = vmatpush1.bf16.msra.mxu0 %v8221_v23  ;;  %6121 = vmatpush1.bf16.msra.mxu1 %v8224_v24  ;;  %v5492_v34 = vpop.f32.mrb[50].mxu0  ;;  %v5574_v35 = vpop.f32.mrb[50].mxu1  ;;  %v8286_v32 = vld [vmem:[#allocation9 + $0x86c] ss:$144 sps:$4 sm:$0xff]  }
 0xcc6   :  { %v5493_v48 = vpop.f32.mrb[51].mxu0  ;;  %v5575_v30 = vpop.f32.mrb[51].mxu1  ;;  %5999 = vmatprep.subr.bf16.mxu0 %v8229_v25  ;;  %6122 = vmatprep.subr.bf16.mxu1 %v8232_v26 }
 0xcc9   :  { %6000 = vmatpush1.bf16.msra.mxu0 %v8227_v36  ;;  %6123 = vmatpush1.bf16.msra.mxu1 %v8230_v37 }
 0xcca   :  { %6001 = vmatprep.subr.bf16.mxu0 %v8235_v38  ;;  %6124 = vmatprep.subr.bf16.mxu1 %v8238_v39 }
 0xccd   :  { %6002 = vmatpush1.bf16.msra.mxu0 %v8233_v40  ;;  %6125 = vmatpush1.bf16.msra.mxu1 %v8236_v41 }
 0xcce   :  { %6236 = vmatprep.subr.bf16.mxu1 %v6193_v33  ;;  %6069 = vmatprep.subr.bf16.mxu0 %v8241_v42  ;;  %v8284_v33 = vld [vmem:[#allocation9 + $0x868] ss:$144 sps:$4 sm:$0xff]  }
 0xcd0   :  { %6020 = vmatmul.mubr.bf16.vlgmr.msra.gmra.mrb[76].mxu0 %v8879_v59  ;;  %6143 = vmatmul.mubr.bf16.vlgmr.msra.gmra.mrb[76].mxu1 %v8879_v59 }
 0xcd1   :  { %6070 = vmatpush1.bf16.msra.mxu0 %v8239_v43  ;;  %6237 = vmatpush1.bf16.msra.mxu1 %v6192_v29 }
 0xcd2   :  { %6071 = vmatprep.subr.bf16.mxu0 %v8244_v44  ;;  %6101 = vmatprep.mubr.bf16.mxu0 %v8459_v60 }
 0xcd3   :  { %6268 = vmatprep.mubr.bf16.mxu1 %v8459_v60 }
 0xcd5   :  { %6072 = vmatpush1.bf16.msra.mxu0 %v8242_v45 }
 0xcd6   :  { %6073 = vmatprep.subr.bf16.mxu0 %v8247_v46 }
 0xcd9   :  { %6074 = vmatpush1.bf16.msra.mxu0 %v8245_v49 }
 0xcda   :  { %6075 = vmatprep.subr.bf16.mxu0 %v8250_v47 }
 0xcdd   :  { %6076 = vmatpush1.bf16.msra.mxu0 %v8248_v50 }
 0xcde   :  { %6077 = vmatprep.subr.bf16.mxu0 %v8253_v51 }
 0xce1   :  { %6078 = vmatpush1.bf16.msra.mxu0 %v8251_v52 }
 0xce2   :  { %6079 = vmatprep.subr.bf16.mxu0 %v8256_v53 }
 0xce3   :  { %v8913_v56 = vpop.f32.mrb[52].mxu0  ;;  %v5652_v57 = vpop.f32.mrb[52].mxu1 }
 0xce4   :  { %v8915_v58 = vpop.f32.mrb[53].mxu0  ;;  %v5654_v5 = vpop.f32.mrb[53].mxu1 }
 0xce5   :  { %v5533_v9 = vpop.f32.mrb[54].mxu0  ;;  %v5656_v61 = vpop.f32.mrb[54].mxu1  ;;  %6080 = vmatpush1.bf16.msra.mxu0 %v8254_v54 }
 0xce6   :  { %v5534_v63 = vpop.f32.mrb[55].mxu0  ;;  %v5657_v0 = vpop.f32.mrb[55].mxu1  ;;  %6081 = vmatprep.subr.bf16.mxu0 %v8259_v55 }
 0xce9   :  { %6082 = vmatpush1.bf16.msra.mxu0 %v8257_v62 }
 0xcea   :  { %6083 = vmatprep.subr.bf16.mxu0 %v8262_v1 }
 0xced   :  { %6084 = vmatpush1.bf16.msra.mxu0 %v8260_v2 }
 0xcee   :  { %6151 = vmatprep.subr.bf16.mxu0 %v8265_v3 }
 0xcf0   :  { %6102 = vmatmul.mubr.bf16.vlgmr.msra.gmra.mrb[80].mxu0 %v8879_v59 }
 0xcf1   :  { %6152 = vmatpush1.bf16.msra.mxu0 %v8263_v4  ;;  %6183 = vmatprep.mubr.bf16.mxu0 %v8459_v60 }
 0xcf2   :  { %6153 = vmatprep.subr.bf16.mxu0 %v8268_v6 }
 0xcf5   :  { %6154 = vmatpush1.bf16.msra.mxu0 %v8266_v7 }
 0xcf6   :  { %6155 = vmatprep.subr.bf16.mxu0 %v8271_v8 }
 0xcf9   :  { %6156 = vmatpush1.bf16.msra.mxu0 %v8269_v10 }
 0xcfa   :  { %6157 = vmatprep.subr.bf16.mxu0 %v8274_v11 }
 0xcfd   :  { %6158 = vmatpush1.bf16.msra.mxu0 %v8272_v12 }
 0xcfe   :  { %6159 = vmatprep.subr.bf16.mxu0 %v8277_v13 }
 0xd01   :  { %6160 = vmatpush1.bf16.msra.mxu0 %v8275_v14 }
 0xd02   :  { %6161 = vmatprep.subr.bf16.mxu0 %v8280_v15 }
 0xd03   :  { %v8919_v18 = vpop.f32.mrb[56].mxu0  ;;  %v5734_v19 = vpop.f32.mrb[56].mxu1 }
 0xd04   :  { %v6194_v20 = vpack.c.bf16 %v8919_v18, %v8913_v56  ;;  %v6196_v21 = vpack.c.bf16 %v5734_v19, %v5652_v57  ;;  %v8923_v22 = vpop.f32.mrb[57].mxu0  ;;  %v5736_v23 = vpop.f32.mrb[57].mxu1 }
 0xd05   :  { %v6195_v24 = vpack.c.bf16 %v8923_v22, %v8915_v58  ;;  %v6197_v25 = vpack.c.bf16 %v5736_v23, %v5654_v5  ;;  %v5615_v26 = vpop.f32.mrb[58].mxu0  ;;  %v5738_v27 = vpop.f32.mrb[58].mxu1  ;;  %6162 = vmatpush1.bf16.msra.mxu0 %v8278_v16 }
 0xd06   :  { %v5616_v29 = vpop.f32.mrb[59].mxu0  ;;  %v5739_v31 = vpop.f32.mrb[59].mxu1  ;;  %6163 = vmatprep.subr.bf16.mxu0 %v8283_v17  ;;  %v6213_v27 = vld [vmem:[#allocation10 + $0xf0] sm:$0xf] }
 0xd07   :  { %6238 = vmatprep.subr.bf16.mxu1 %v6197_v25 }
 0xd08   :  { %6239 = vmatpush1.bf16.msra.mxu1 %v6196_v21 }
 0xd09   :  { %6164 = vmatpush1.bf16.msra.mxu0 %v8281_v28 }
 0xd0a   :  { %6165 = vmatprep.subr.bf16.mxu0 %v8286_v32 }
 0xd0d   :  { %6166 = vmatpush1.bf16.msra.mxu0 %v8284_v33 }
 0xd10   :  { %6184 = vmatmul.mubr.bf16.vlgmr.msra.gmra.mrb[84].mxu0 %v8879_v59 }
 0xd23   :  { %v8928_v34 = vpop.f32.mrb[60].mxu0  ;;  %v5816_v35 = vpop.f32.mrb[60].mxu1 }
 0xd24   :  { %v5695_v36 = vpop.f32.mrb[61].mxu0  ;;  %v5818_v37 = vpop.f32.mrb[61].mxu1 }
 0xd25   :  { %v5697_v48 = vpop.f32.mrb[62].mxu0  ;;  %v5820_v30 = vpop.f32.mrb[62].mxu1 }
 0xd26   :  { %v5698_v38 = vpop.f32.mrb[63].mxu0  ;;  %v5821_v39 = vpop.f32.mrb[63].mxu1 }
 0xd43   :  { %v5775_v40 = vpop.f32.mrb[64].mxu0  ;;  %v5898_v41 = vpop.f32.mrb[64].mxu1 }
 0xd44   :  { %v6198_v42 = vpack.c.bf16 %v5775_v40, %v8928_v34  ;;  %v6200_v43 = vpack.c.bf16 %v5898_v41, %v5816_v35  ;;  %v5777_v44 = vpop.f32.mrb[65].mxu0  ;;  %v5900_v45 = vpop.f32.mrb[65].mxu1 }
 0xd45   :  { %v6199_v46 = vpack.c.bf16 %v5777_v44, %v5695_v36  ;;  %v6201_v49 = vpack.c.bf16 %v5900_v45, %v5818_v37  ;;  %v5779_v47 = vpop.f32.mrb[66].mxu0  ;;  %v5902_v59 = vpop.f32.mrb[66].mxu1 }
 0xd46   :  { %v5780_v50 = vpop.f32.mrb[67].mxu0  ;;  %v5903_v51 = vpop.f32.mrb[67].mxu1 }
 0xd47   :  { %6240 = vmatprep.subr.bf16.mxu1 %v6201_v49 }
 0xd48   :  { %6241 = vmatpush1.bf16.msra.mxu1 %v6200_v43 }
 0xd63   :  { %v5857_v52 = vpop.f32.mrb[68].mxu0  ;;  %v5980_v53 = vpop.f32.mrb[68].mxu1 }
 0xd64   :  { %v5859_v54 = vpop.f32.mrb[69].mxu0  ;;  %v5982_v55 = vpop.f32.mrb[69].mxu1 }
 0xd65   :  { %v5861_v57 = vpop.f32.mrb[70].mxu0  ;;  %v5984_v5 = vpop.f32.mrb[70].mxu1 }
 0xd66   :  { %v5862_v9 = vpop.f32.mrb[71].mxu0  ;;  %v5985_v61 = vpop.f32.mrb[71].mxu1 }
 0xd83   :  { %v5939_v62 = vpop.f32.mrb[72].mxu0  ;;  %v6062_v63 = vpop.f32.mrb[72].mxu1 }
 0xd84   :  { %v6202_v0 = vpack.c.bf16 %v5939_v62, %v5857_v52  ;;  %v6204_v1 = vpack.c.bf16 %v6062_v63, %v5980_v53  ;;  %v5941_v2 = vpop.f32.mrb[73].mxu0  ;;  %v6064_v3 = vpop.f32.mrb[73].mxu1 }
 0xd85   :  { %v6203_v4 = vpack.c.bf16 %v5941_v2, %v5859_v54  ;;  %v6205_v6 = vpack.c.bf16 %v6064_v3, %v5982_v55  ;;  %v5943_v7 = vpop.f32.mrb[74].mxu0  ;;  %v6066_v8 = vpop.f32.mrb[74].mxu1 }
 0xd86   :  { %v5944_v10 = vpop.f32.mrb[75].mxu0  ;;  %v6067_v11 = vpop.f32.mrb[75].mxu1 }
 0xd87   :  { %6242 = vmatprep.subr.bf16.mxu1 %v6205_v6 }
 0xd88   :  { %6243 = vmatpush1.bf16.msra.mxu1 %v6204_v1 }
 0xda3   :  { %v6021_v12 = vpop.f32.mrb[76].mxu0  ;;  %v6144_v13 = vpop.f32.mrb[76].mxu1 }
 0xda4   :  { %v6208_v14 = vpack.c.bf16 %v6144_v13, %v6144_v13  ;;  %v6023_v15 = vpop.f32.mrb[77].mxu0  ;;  %v6146_v16 = vpop.f32.mrb[77].mxu1 }
 0xda5   :  { %v6209_v17 = vpack.c.bf16 %v6146_v16, %v6146_v16  ;;  %v6025_v19 = vpop.f32.mrb[78].mxu0  ;;  %v6148_v21 = vpop.f32.mrb[78].mxu1 }
 0xda6   :  { %v6225_v23 = vsel %vm2348_vm1, %v6208_v14, 0  ;;  %v6026_v25 = vpop.f32.mrb[79].mxu0  ;;  %v6149_v26 = vpop.f32.mrb[79].mxu1 }
 0xda7   :  { %7034 = vmatprep.subr.msk.bf16.mxu1 %vm2348_vm1, %v6209_v17 }
 0xda8   :  { %6245 = vmatpush1.bf16.msra.mxu1 %v6225_v23 }
 0xda9   :  { %6277 = vmatprep.subr.bf16.mxu1 %v6195_v24 }
 0xdab   :  { %7035 = vmatmul.mubr.msk.bf16.vlgmr.msra.gmra.mrb[80].mxu1 %vm2344_vm2, %v6213_v27 }
 0xdac   :  { %6278 = vmatpush1.bf16.msra.mxu1 %v6194_v20  ;;  %6309 = vmatprep.mubr.bf16.mxu1 %v8459_v60  ;;  %v6219_v20 = vpop.permute.xlu0 %6218 }
 0xdad   :  { %6279 = vmatprep.subr.bf16.mxu1 %v6199_v46 }
 0xdb0   :  { %6280 = vmatpush1.bf16.msra.mxu1 %v6198_v42 }
 0xdb1   :  { %6281 = vmatprep.subr.bf16.mxu1 %v6203_v4 }
 0xdb4   :  { %6282 = vmatpush1.bf16.msra.mxu1 %v6202_v0 }
 0xdc3   :  { %v6103_v28 = vpop.f32.mrb[80].mxu0 }
 0xdc4   :  { %v6206_v29 = vpack.c.bf16 %v6103_v28, %v6021_v12  ;;  %v6105_v31 = vpop.f32.mrb[81].mxu0 }
 0xdc5   :  { %v6207_v32 = vpack.c.bf16 %v6105_v31, %v6023_v15  ;;  %v6107_v33 = vpop.f32.mrb[82].mxu0 }
 0xdc6   :  { %v6108_v34 = vpop.f32.mrb[83].mxu0 }
 0xdc7   :  { %6283 = vmatprep.subr.bf16.mxu1 %v6207_v32 }
 0xdc8   :  { %6284 = vmatpush1.bf16.msra.mxu1 %v6206_v29 }
 0xde3   :  { %v6185_v58 = vpop.f32.mrb[84].mxu0 }
 0xde4   :  { %v6210_v22 = vpack.c.bf16 %v6185_v58, %v6185_v58  ;;  %v6187_v24 = vpop.f32.mrb[85].mxu0 }
 0xde5   :  { %v6211_v35 = vpack.c.bf16 %v6187_v24, %v6187_v24  ;;  %v6189_v56 = vpop.f32.mrb[86].mxu0 }
 0xde6   :  { %v6231_v18 = vsel %vm2348_vm1, %v6210_v22, 0  ;;  %v6190_v60 = vpop.f32.mrb[87].mxu0 }
 0xde7   :  { %7036 = vmatprep.subr.msk.bf16.mxu1 %vm2348_vm1, %v6211_v35 }
 0xde8   :  { %6286 = vmatpush1.bf16.msra.mxu1 %v6231_v18 }
 0xdeb   :  { %7037 = vmatmul.mubr.msk.bf16.vlgmr.msra.gmra.mrb[84].mxu1 %vm2344_vm2, %v6213_v27 }
 0xe7e   :  { %v6270_v36 = vpop.f32.mrb[80].mxu1 }
 0xe7f   :  { %v6271_v37 = vadd.f32 %v6270_v36, %v6219_v20  ;;  %v6272_v48 = vpop.f32.mrb[81].mxu1 }
 0xe80   :  { %v6273_v30 = vadd.f32 %v6272_v48, %v6219_v20  ;;  %v6274_v38 = vpop.f32.mrb[82].mxu1 }
 0xe81   :  { %vm6318_vm6 = vcmp.lt.f32.partialorder %v6271_v37, 0.0  ;;  %v6322_v39 = vsub.f32 0.0, %v6271_v37  ;;  %v6275_v40 = vpop.f32.mrb[83].mxu1 }
 0xe82   :  { %vm6319_vm7 = vcmp.lt.f32.partialorder %v6273_v30, 0.0  ;;  %v6323_v41 = vsub.f32 0.0, %v6273_v30 }
 0xe83   :  { %v6326_v42 = vsel %vm6318_vm6, %v6271_v37, %v6322_v39 }
 0xe84   :  { %v6330_v43 = vmul.f32 1.442695, %v6326_v42  ;;  %v6327_v44 = vsel %vm6319_vm7, %v6273_v30, %v6323_v41 }
 0xe85   :  { %v6332_v45 = vmul.f32 1.442695, %v6327_v44 }
 0xe86   :  { %8287 = vpow2.f32 %v6330_v43 }
 0xe87   :  { %8289 = vpow2.f32 %v6332_v45 }
 0xe90   :  { %v8288_v46 = vpop.eup %8287 }
 0xe91   :  { %v8290_v49 = vpop.eup %8289  ;;  %v6338_v47 = vadd.f32 1.0, %v8288_v46 }
 0xe92   :  { %v6339_v59 = vadd.f32 1.0, %v8290_v49 }
 0xe93   :  { %8291 = vrcp.f32 %v6338_v47 }
 0xe94   :  { %8293 = vrcp.f32 %v6339_v59 }
 0xe9d   :  { %v8292_v50 = vpop.eup %8291 }
 0xe9e   :  { %v8294_v51 = vpop.eup %8293  ;;  %v6346_v52 = vmul.f32 %v8292_v50, %v8288_v46 }
 0xe9f   :  { %v6347_v53 = vmul.f32 %v8294_v51, %v8290_v49 }
 0xea0   :  { %v6350_v54 = vsel %vm6318_vm6, %v6346_v52, %v8292_v50 }
 0xea1   :  { %6354 = vst [vmem:[%s8974_s10] sm:$0xff] %v6350_v54  ;;  %v6351_v55 = vsel %vm6319_vm7, %v6347_v53, %v8294_v51 }
 0xea2   :  { %6355 = vst [vmem:[%s8974_s10 + $0x8] sm:$0xff] %v6351_v55 }
 0xebe   :  { %v6311_v57 = vpop.f32.mrb[84].mxu1 }
 0xebf   :  { %v6312_v5 = vadd.f32 %v6311_v57, %v6219_v20  ;;  %v6313_v9 = vpop.f32.mrb[85].mxu1 }
 0xec0   :  { %v6314_v61 = vadd.f32 %v6313_v9, %v6219_v20  ;;  %v6315_v62 = vpop.f32.mrb[86].mxu1 }
 0xec1   :  { %vm6320_vm8 = vcmp.lt.f32.partialorder %v6312_v5, 0.0  ;;  %v6324_v63 = vsub.f32 0.0, %v6312_v5  ;;  %v6316_v0 = vpop.f32.mrb[87].mxu1 }
 0xec2   :  { %vm6321_vm9 = vcmp.lt.f32.partialorder %v6314_v61, 0.0  ;;  %v6325_v1 = vsub.f32 0.0, %v6314_v61 }
 0xec3   :  { %v6328_v2 = vsel %vm6320_vm8, %v6312_v5, %v6324_v63 }
 0xec4   :  { %v6334_v3 = vmul.f32 1.442695, %v6328_v2  ;;  %v6329_v4 = vsel %vm6321_vm9, %v6314_v61, %v6325_v1 }
 0xec5   :  { %v6336_v6 = vmul.f32 1.442695, %v6329_v4 }
 0xec6   :  { %8295 = vpow2.f32 %v6334_v3 }
 0xec7   :  { %8297 = vpow2.f32 %v6336_v6 }
 0xed0   :  { %v8296_v7 = vpop.eup %8295 }
 0xed1   :  { %v8298_v8 = vpop.eup %8297  ;;  %v6340_v10 = vadd.f32 1.0, %v8296_v7 }
 0xed2   :  { %v6341_v11 = vadd.f32 1.0, %v8298_v8 }
 0xed3   :  { %8299 = vrcp.f32 %v6340_v10 }
 0xed4   :  { %8301 = vrcp.f32 %v6341_v11 }
 0xedd   :  { %v8300_v12 = vpop.eup %8299 }
 0xede   :  { %v8302_v13 = vpop.eup %8301  ;;  %v6348_v14 = vmul.f32 %v8300_v12, %v8296_v7 }
 0xedf   :  { %v6349_v15 = vmul.f32 %v8302_v13, %v8298_v8 }
 0xee0   :  { %v6352_v16 = vsel %vm6320_vm8, %v6348_v14, %v8300_v12 }
 0xee1   :  { %6356 = vst [vmem:[%s8974_s10 + $0x10] sm:$0xff] %v6352_v16  ;;  %v6353_v17 = vsel %vm6321_vm9, %v6349_v15, %v8302_v13 }
 0xee2   :  { %6357 = vst [vmem:[%s8974_s10 + $0x18] sm:$0xff] %v6353_v17 }
 0xee3   :  { %6362 = vsyncpa [#allocation3], 1 }
 0xee4   :  { %6363 = vsyncpa [#allocation5], 1 }
 0xee5   :  { %6364 = vsyncpa [#allocation8], 1 }
 0xee6   :  { %6365 = vsyncpa [#allocation11], 1 }

</bundles_post_ra>
